<compile_context>
chip_gen: v7x
topology: tpu7x:2x2x1
jax: 0.10.0
libtpu: 0.0.40
codegen_flags: <defaults>
</compile_context>

<pallas_src>
import functools

import jax
import jax.numpy as jnp
from jax import lax
from jax.experimental import pallas as pl
from jax.experimental.pallas import tpu as pltpu

NUM_SYMBOLS = 12
EMBED_DIM = 4
HIDDEN_DIM = 128
NUM_ACTIONS = 12
OUT_PAD = 128  # lane-dense padded output width (advantage: 0..11, value: 12)


# ----------------------------------------------------------------------------
# Fused kernel: three LSTM recurrences (gate tables precomputed), fc1 + ReLU,
# merged dueling heads. Single invocation, everything resident in VMEM.
# PyTorch gate order: i, f, g, o.
# ----------------------------------------------------------------------------
def fused_acnet_kernel(gp_ref, gn_ref, gr_ref,
                       whp_ref, whn_ref, whr_ref,
                       fc1w_ref, fc1b_ref,
                       h1w_ref, h1b_ref, h2w_ref, h2b_ref,
                       out_ref):
    f32 = jnp.float32
    T, B, H4 = gp_ref.shape
    H = H4 // 4

    # Load resident weights once (already transposed to (H, 4H) / (K, N)).
    whp = whp_ref[...]
    whn = whn_ref[...]
    whr = whr_ref[...]

    def lstm_step(g_t, h, c, whh_t):
        gates = g_t + jnp.dot(h, whh_t, preferred_element_type=f32)  # (B, 4H)
        i_g = jax.nn.sigmoid(gates[:, 0 * H:1 * H])
        f_g = jax.nn.sigmoid(gates[:, 1 * H:2 * H])
        g_g = jnp.tanh(gates[:, 2 * H:3 * H])
        o_g = jax.nn.sigmoid(gates[:, 3 * H:4 * H])
        c_new = f_g * c + i_g * g_g
        h_new = o_g * jnp.tanh(c_new)
        return h_new, c_new

    z = jnp.zeros((B, H), f32)
    hp, cp = z, z
    hn, cn = z, z
    hr, cr = z, z

    # T is a small static trip count -> straight-line unrolled recurrence; the
    # three independent encoders give the scheduler MXU/EUP overlap per step.
    for t in range(T):
        hp, cp = lstm_step(gp_ref[t], hp, cp, whp)
        hn, cn = lstm_step(gn_ref[t], hn, cn, whn)
        hr, cr = lstm_step(gr_ref[t], hr, cr, whr)

    # concat order matches PyTorch: (pos, neg, regex)
    feat = jnp.concatenate([hp, hn, hr], axis=-1)                       # (B, 3H)
    x = jnp.dot(feat, fc1w_ref[...], preferred_element_type=f32) + fc1b_ref[...]
    x = jnp.maximum(x, 0.0)                                             # (B, H)

    # merged heads layer 1: columns [0:H] = advantage hidden, [H:2H] = value hidden
    hid = jnp.dot(x, h1w_ref[...], preferred_element_type=f32) + h1b_ref[...]
    hid = jnp.maximum(hid, 0.0)                                         # (B, 2H)

    # merged (block-diagonal, zero-padded) layer 2 -> lane-dense (B, 128) output
    out_ref[...] = jnp.dot(hid, h2w_ref[...], preferred_element_type=f32) + h2b_ref[...]


def fused_acnet_call(gp, gn, gr, prep):
    B = gp.shape[1]
    vmem = pl.BlockSpec(memory_space=pltpu.MemorySpace.VMEM)
    args = (
        gp, gn, gr,
        prep["pos_whh_t"], prep["neg_whh_t"], prep["regex_whh_t"],
        prep["fc1_wt"], prep["fc1_b"],
        prep["h1_wt"], prep["h1_b"], prep["h2_w"], prep["h2_b"],
    )
    return pl.pallas_call(
        fused_acnet_kernel,
        out_shape=jax.ShapeDtypeStruct((B, OUT_PAD), jnp.float32),
        in_specs=[vmem] * len(args),
        out_specs=vmem,
    )(*args)


# ----------------------------------------------------------------------------
# Parameter preparation (pure layout plumbing, done once outside the kernel):
#  - per-encoder gate tables  emb @ W_ih.T + (b_ih + b_hh)   -> (12, 4H)
#  - pre-transposed recurrence / fc weights
#  - merged + zero-padded dueling-head weights
# ----------------------------------------------------------------------------
def prepare_params(p):
    H = HIDDEN_DIM
    prep = {}
    for name in ("pos", "neg", "regex"):
        bias = (p[f"{name}_bih"] + p[f"{name}_bhh"]).reshape(1, -1)
        prep[f"{name}_table"] = p["emb"] @ p[f"{name}_wih"].T + bias    # (12, 4H)
        prep[f"{name}_whh_t"] = jnp.asarray(p[f"{name}_whh"].T)         # (H, 4H)

    prep["fc1_wt"] = jnp.asarray(p["fc1_w"].T)                          # (3H, H)
    prep["fc1_b"] = p["fc1_b"].reshape(1, -1)                           # (1, H)

    prep["h1_wt"] = jnp.concatenate([p["adv_w1"], p["val_w1"]], axis=0).T  # (H, 2H)
    prep["h1_b"] = jnp.concatenate([p["adv_b1"], p["val_b1"]]).reshape(1, -1)

    w2 = jnp.zeros((2 * H, OUT_PAD), jnp.float32)
    w2 = w2.at[:H, :NUM_ACTIONS].set(p["adv_w2"].T)                     # adv block
    w2 = w2.at[H:, NUM_ACTIONS:NUM_ACTIONS + 1].set(p["val_w2"].T)      # value block
    prep["h2_w"] = w2                                                   # (2H, 128)

    b2 = jnp.zeros((1, OUT_PAD), jnp.float32)
    b2 = b2.at[0, :NUM_ACTIONS].set(p["adv_b2"])
    b2 = b2.at[0, NUM_ACTIONS].set(p["val_b2"][0])
    prep["h2_b"] = b2                                                   # (1, 128)
    return prep


# ----------------------------------------------------------------------------
# Full forward: token -> gate-table gather (JAX glue) -> fused kernel -> slice.
# ----------------------------------------------------------------------------
@functools.partial(jax.jit, static_argnames=())
def acnet_forward(prep, regex, pos, neg):
    def gate_seq(tokens, table):          # (B, T) -> (T, B, 4H) time-major
        g = jnp.take(table, tokens, axis=0)       # (B, T, 4H)
        return jnp.transpose(g, (1, 0, 2))

    gp = gate_seq(pos, prep["pos_table"])
    gn = gate_seq(neg, prep["neg_table"])
    gr = gate_seq(regex, prep["regex_table"])

    out = fused_acnet_call(gp, gn, gr, prep)      # (B, 128) lane-dense
    advantage = out[:, :NUM_ACTIONS]
    value = out[:, NUM_ACTIONS:NUM_ACTIONS + 1]
    return value, advantage


# ----------------------------------------------------------------------------
# Pure-JAX reference (for correctness check).
# ----------------------------------------------------------------------------
def lstm_ref(x_emb, w_ih, w_hh, b_ih, b_hh):
    T, B, E = x_emb.shape
    H = w_hh.shape[1]

    def step(carry, x_t):
        h, c = carry
        gates = x_t @ w_ih.T + b_ih + h @ w_hh.T + b_hh
        i = jax.nn.sigmoid(gates[:, 0 * H:1 * H])
        f = jax.nn.sigmoid(gates[:, 1 * H:2 * H])
        g = jnp.tanh(gates[:, 2 * H:3 * H])
        o = jax.nn.sigmoid(gates[:, 3 * H:4 * H])
        c = f * c + i * g
        h = o * jnp.tanh(c)
        return (h, c), h

    h0 = jnp.zeros((B, H), jnp.float32)
    (_, _), hs = lax.scan(step, (h0, h0), x_emb)
    return hs[-1]


def acnet_forward_ref(p, regex, pos, neg):
    emb = p["emb"]

    def embed_tm(tok):
        return jnp.transpose(jnp.take(emb, tok, axis=0), (1, 0, 2))

    regex_h = lstm_ref(embed_tm(regex), p["regex_wih"], p["regex_whh"], p["regex_bih"], p["regex_bhh"])
    pos_h = lstm_ref(embed_tm(pos), p["pos_wih"], p["pos_whh"], p["pos_bih"], p["pos_bhh"])
    neg_h = lstm_ref(embed_tm(neg), p["neg_wih"], p["neg_whh"], p["neg_bih"], p["neg_bhh"])
    feat = jnp.concatenate([pos_h, neg_h, regex_h], axis=-1)
    x = jax.nn.relu(feat @ p["fc1_w"].T + p["fc1_b"])
    a = jax.nn.relu(x @ p["adv_w1"].T + p["adv_b1"]) @ p["adv_w2"].T + p["adv_b2"]
    v = jax.nn.relu(x @ p["val_w1"].T + p["val_b1"]) @ p["val_w2"].T + p["val_b2"]
    return v, a


# ----------------------------------------------------------------------------
# Deterministic parameter init (PyTorch layout W[out, in]).
# ----------------------------------------------------------------------------
def init_params(key):
    H, E, A = HIDDEN_DIM, EMBED_DIM, NUM_ACTIONS
    keys = jax.random.split(key, 24)
    k = iter(keys)

    def w(kk, shape, scale=0.1):
        return (scale * jax.random.normal(kk, shape)).astype(jnp.float32)

    p = {"emb": w(next(k), (NUM_SYMBOLS, E))}
    for name in ("pos", "neg", "regex"):
        p[f"{name}_wih"] = w(next(k), (4 * H, E))
        p[f"{name}_whh"] = w(next(k), (4 * H, H))
        p[f"{name}_bih"] = w(next(k), (4 * H,))
        p[f"{name}_bhh"] = w(next(k), (4 * H,))
    p["fc1_w"] = w(next(k), (H, 3 * H))
    p["fc1_b"] = w(next(k), (H,))
    p["adv_w1"] = w(next(k), (H, H))
    p["adv_b1"] = w(next(k), (H,))
    p["adv_w2"] = w(next(k), (A, H))
    p["adv_b2"] = w(next(k), (A,))
    p["val_w1"] = w(next(k), (H, H))
    p["val_b1"] = w(next(k), (H,))
    p["val_w2"] = w(next(k), (1, H))
    p["val_b2"] = w(next(k), (1,))
    return p


if __name__ == "__main__":
    key = jax.random.PRNGKey(0)
    pkey, rkey, poskey, negkey = jax.random.split(key, 4)
    params = init_params(pkey)
    prep = prepare_params(params)

    B, T_REGEX, T_POS, T_NEG = 2, 8, 8, 8
    regex = jax.random.randint(rkey, (B, T_REGEX), 0, NUM_SYMBOLS, dtype=jnp.int32)
    pos = jax.random.randint(poskey, (B, T_POS), 0, NUM_SYMBOLS, dtype=jnp.int32)
    neg = jax.random.randint(negkey, (B, T_NEG), 0, NUM_SYMBOLS, dtype=jnp.int32)

    value, advantage = acnet_forward(prep, regex, pos, neg)
    jax.block_until_ready((value, advantage))

    v_ref, a_ref = acnet_forward_ref(params, regex, pos, neg)
    assert value.shape == (B, 1) and advantage.shape == (B, NUM_ACTIONS)
    assert jnp.allclose(value, v_ref, atol=1e-4, rtol=1e-4)
    assert jnp.allclose(advantage, a_ref, atol=1e-4, rtol=1e-4)

    print("KERNEL_OK")
</pallas_src>

<mosaic_0001>
module attributes {stable_mosaic.version = 11 : i64} {
  func.func @fused_acnet_kernel(%arg0: memref<8x2x512xf32, #tpu.memory_space<vmem>>, %arg1: memref<8x2x512xf32, #tpu.memory_space<vmem>>, %arg2: memref<8x2x512xf32, #tpu.memory_space<vmem>>, %arg3: memref<128x512xf32, #tpu.memory_space<vmem>>, %arg4: memref<128x512xf32, #tpu.memory_space<vmem>>, %arg5: memref<128x512xf32, #tpu.memory_space<vmem>>, %arg6: memref<384x128xf32, #tpu.memory_space<vmem>>, %arg7: memref<1x128xf32, #tpu.memory_space<vmem>>, %arg8: memref<128x256xf32, #tpu.memory_space<vmem>>, %arg9: memref<1x256xf32, #tpu.memory_space<vmem>>, %arg10: memref<256x128xf32, #tpu.memory_space<vmem>>, %arg11: memref<1x128xf32, #tpu.memory_space<vmem>>, %arg12: memref<2x128xf32, #tpu.memory_space<vmem>>) attributes {dimension_semantics = [], scalar_prefetch = 0 : i64, scratch_operands = 0 : i64, tpu.core_type = #tpu.core_type<tc>} {
    %c0 = arith.constant 0 : index
    %c0_0 = arith.constant 0 : index
    %0 = vector.load %arg3[%c0, %c0_0] : memref<128x512xf32, #tpu.memory_space<vmem>>, vector<128x512xf32>
    %c0_1 = arith.constant 0 : index
    %c0_2 = arith.constant 0 : index
    %1 = vector.load %arg4[%c0_1, %c0_2] : memref<128x512xf32, #tpu.memory_space<vmem>>, vector<128x512xf32>
    %c0_3 = arith.constant 0 : index
    %c0_4 = arith.constant 0 : index
    %2 = vector.load %arg5[%c0_3, %c0_4] : memref<128x512xf32, #tpu.memory_space<vmem>>, vector<128x512xf32>
    %cst = arith.constant 0.000000e+00 : f32
    %3 = vector.broadcast %cst : f32 to vector<2x128xf32>
    %c0_5 = arith.constant 0 : index
    %c0_6 = arith.constant 0 : index
    %c0_7 = arith.constant 0 : index
    %4 = vector.load %arg0[%c0_5, %c0_6, %c0_7] : memref<8x2x512xf32, #tpu.memory_space<vmem>>, vector<1x2x512xf32>
    %5 = vector.shape_cast %4 : vector<1x2x512xf32> to vector<2x512xf32>
    %cst_8 = arith.constant dense<0.000000e+00> : vector<2x512xf32>
    %6 = tpu.matmul %3, %0, %cst_8 {dimension_numbers = #tpu.dot_dimension_numbers<[1], [0], [0], [1], [0, 0, 1, 1], [], []>} : vector<2x128xf32>, vector<128x512xf32>, vector<2x512xf32> -> vector<2x512xf32>
    %7 = arith.addf %5, %6 : vector<2x512xf32>
    %8 = vector.extract_strided_slice %7 {offsets = [0, 0], sizes = [2, 128], strides = [1, 1]} : vector<2x512xf32> to vector<2x128xf32>
    %9 = arith.negf %8 : vector<2x128xf32>
    %10 = math.exp %9 : vector<2x128xf32>
    %cst_9 = arith.constant 1.000000e+00 : f32
    %11 = vector.broadcast %cst_9 : f32 to vector<2x128xf32>
    %12 = arith.addf %11, %10 : vector<2x128xf32>
    %13 = arith.divf %11, %12 : vector<2x128xf32>
    %14 = vector.extract_strided_slice %7 {offsets = [0, 128], sizes = [2, 128], strides = [1, 1]} : vector<2x512xf32> to vector<2x128xf32>
    %15 = arith.negf %14 : vector<2x128xf32>
    %16 = math.exp %15 : vector<2x128xf32>
    %cst_10 = arith.constant 1.000000e+00 : f32
    %17 = vector.broadcast %cst_10 : f32 to vector<2x128xf32>
    %18 = arith.addf %17, %16 : vector<2x128xf32>
    %19 = arith.divf %17, %18 : vector<2x128xf32>
    %20 = vector.extract_strided_slice %7 {offsets = [0, 256], sizes = [2, 128], strides = [1, 1]} : vector<2x512xf32> to vector<2x128xf32>
    %21 = math.tanh %20 : vector<2x128xf32>
    %22 = vector.extract_strided_slice %7 {offsets = [0, 384], sizes = [2, 128], strides = [1, 1]} : vector<2x512xf32> to vector<2x128xf32>
    %23 = arith.negf %22 : vector<2x128xf32>
    %24 = math.exp %23 : vector<2x128xf32>
    %cst_11 = arith.constant 1.000000e+00 : f32
    %25 = vector.broadcast %cst_11 : f32 to vector<2x128xf32>
    %26 = arith.addf %25, %24 : vector<2x128xf32>
    %27 = arith.divf %25, %26 : vector<2x128xf32>
    %28 = arith.mulf %19, %3 : vector<2x128xf32>
    %29 = arith.mulf %13, %21 : vector<2x128xf32>
    %30 = arith.addf %28, %29 : vector<2x128xf32>
    %31 = math.tanh %30 : vector<2x128xf32>
    %32 = arith.mulf %27, %31 : vector<2x128xf32>
    %c0_12 = arith.constant 0 : index
    %c0_13 = arith.constant 0 : index
    %c0_14 = arith.constant 0 : index
    %33 = vector.load %arg1[%c0_12, %c0_13, %c0_14] : memref<8x2x512xf32, #tpu.memory_space<vmem>>, vector<1x2x512xf32>
    %34 = vector.shape_cast %33 : vector<1x2x512xf32> to vector<2x512xf32>
    %cst_15 = arith.constant dense<0.000000e+00> : vector<2x512xf32>
    %35 = tpu.matmul %3, %1, %cst_15 {dimension_numbers = #tpu.dot_dimension_numbers<[1], [0], [0], [1], [0, 0, 1, 1], [], []>} : vector<2x128xf32>, vector<128x512xf32>, vector<2x512xf32> -> vector<2x512xf32>
    %36 = arith.addf %34, %35 : vector<2x512xf32>
    %37 = vector.extract_strided_slice %36 {offsets = [0, 0], sizes = [2, 128], strides = [1, 1]} : vector<2x512xf32> to vector<2x128xf32>
    %38 = arith.negf %37 : vector<2x128xf32>
    %39 = math.exp %38 : vector<2x128xf32>
    %cst_16 = arith.constant 1.000000e+00 : f32
    %40 = vector.broadcast %cst_16 : f32 to vector<2x128xf32>
    %41 = arith.addf %40, %39 : vector<2x128xf32>
    %42 = arith.divf %40, %41 : vector<2x128xf32>
    %43 = vector.extract_strided_slice %36 {offsets = [0, 128], sizes = [2, 128], strides = [1, 1]} : vector<2x512xf32> to vector<2x128xf32>
    %44 = arith.negf %43 : vector<2x128xf32>
    %45 = math.exp %44 : vector<2x128xf32>
    %cst_17 = arith.constant 1.000000e+00 : f32
    %46 = vector.broadcast %cst_17 : f32 to vector<2x128xf32>
    %47 = arith.addf %46, %45 : vector<2x128xf32>
    %48 = arith.divf %46, %47 : vector<2x128xf32>
    %49 = vector.extract_strided_slice %36 {offsets = [0, 256], sizes = [2, 128], strides = [1, 1]} : vector<2x512xf32> to vector<2x128xf32>
    %50 = math.tanh %49 : vector<2x128xf32>
    %51 = vector.extract_strided_slice %36 {offsets = [0, 384], sizes = [2, 128], strides = [1, 1]} : vector<2x512xf32> to vector<2x128xf32>
    %52 = arith.negf %51 : vector<2x128xf32>
    %53 = math.exp %52 : vector<2x128xf32>
    %cst_18 = arith.constant 1.000000e+00 : f32
    %54 = vector.broadcast %cst_18 : f32 to vector<2x128xf32>
    %55 = arith.addf %54, %53 : vector<2x128xf32>
    %56 = arith.divf %54, %55 : vector<2x128xf32>
    %57 = arith.mulf %48, %3 : vector<2x128xf32>
    %58 = arith.mulf %42, %50 : vector<2x128xf32>
    %59 = arith.addf %57, %58 : vector<2x128xf32>
    %60 = math.tanh %59 : vector<2x128xf32>
    %61 = arith.mulf %56, %60 : vector<2x128xf32>
    %c0_19 = arith.constant 0 : index
    %c0_20 = arith.constant 0 : index
    %c0_21 = arith.constant 0 : index
    %62 = vector.load %arg2[%c0_19, %c0_20, %c0_21] : memref<8x2x512xf32, #tpu.memory_space<vmem>>, vector<1x2x512xf32>
    %63 = vector.shape_cast %62 : vector<1x2x512xf32> to vector<2x512xf32>
    %cst_22 = arith.constant dense<0.000000e+00> : vector<2x512xf32>
    %64 = tpu.matmul %3, %2, %cst_22 {dimension_numbers = #tpu.dot_dimension_numbers<[1], [0], [0], [1], [0, 0, 1, 1], [], []>} : vector<2x128xf32>, vector<128x512xf32>, vector<2x512xf32> -> vector<2x512xf32>
    %65 = arith.addf %63, %64 : vector<2x512xf32>
    %66 = vector.extract_strided_slice %65 {offsets = [0, 0], sizes = [2, 128], strides = [1, 1]} : vector<2x512xf32> to vector<2x128xf32>
    %67 = arith.negf %66 : vector<2x128xf32>
    %68 = math.exp %67 : vector<2x128xf32>
    %cst_23 = arith.constant 1.000000e+00 : f32
    %69 = vector.broadcast %cst_23 : f32 to vector<2x128xf32>
    %70 = arith.addf %69, %68 : vector<2x128xf32>
    %71 = arith.divf %69, %70 : vector<2x128xf32>
    %72 = vector.extract_strided_slice %65 {offsets = [0, 128], sizes = [2, 128], strides = [1, 1]} : vector<2x512xf32> to vector<2x128xf32>
    %73 = arith.negf %72 : vector<2x128xf32>
    %74 = math.exp %73 : vector<2x128xf32>
    %cst_24 = arith.constant 1.000000e+00 : f32
    %75 = vector.broadcast %cst_24 : f32 to vector<2x128xf32>
    %76 = arith.addf %75, %74 : vector<2x128xf32>
    %77 = arith.divf %75, %76 : vector<2x128xf32>
    %78 = vector.extract_strided_slice %65 {offsets = [0, 256], sizes = [2, 128], strides = [1, 1]} : vector<2x512xf32> to vector<2x128xf32>
    %79 = math.tanh %78 : vector<2x128xf32>
    %80 = vector.extract_strided_slice %65 {offsets = [0, 384], sizes = [2, 128], strides = [1, 1]} : vector<2x512xf32> to vector<2x128xf32>
    %81 = arith.negf %80 : vector<2x128xf32>
    %82 = math.exp %81 : vector<2x128xf32>
    %cst_25 = arith.constant 1.000000e+00 : f32
    %83 = vector.broadcast %cst_25 : f32 to vector<2x128xf32>
    %84 = arith.addf %83, %82 : vector<2x128xf32>
    %85 = arith.divf %83, %84 : vector<2x128xf32>
    %86 = arith.mulf %77, %3 : vector<2x128xf32>
    %87 = arith.mulf %71, %79 : vector<2x128xf32>
    %88 = arith.addf %86, %87 : vector<2x128xf32>
    %89 = math.tanh %88 : vector<2x128xf32>
    %90 = arith.mulf %85, %89 : vector<2x128xf32>
    %c1 = arith.constant 1 : index
    %c0_26 = arith.constant 0 : index
    %c0_27 = arith.constant 0 : index
    %91 = vector.load %arg0[%c1, %c0_26, %c0_27] : memref<8x2x512xf32, #tpu.memory_space<vmem>>, vector<1x2x512xf32>
    %92 = vector.shape_cast %91 : vector<1x2x512xf32> to vector<2x512xf32>
    %cst_28 = arith.constant dense<0.000000e+00> : vector<2x512xf32>
    %93 = tpu.matmul %32, %0, %cst_28 {dimension_numbers = #tpu.dot_dimension_numbers<[1], [0], [0], [1], [0, 0, 1, 1], [], []>} : vector<2x128xf32>, vector<128x512xf32>, vector<2x512xf32> -> vector<2x512xf32>
    %94 = arith.addf %92, %93 : vector<2x512xf32>
    %95 = vector.extract_strided_slice %94 {offsets = [0, 0], sizes = [2, 128], strides = [1, 1]} : vector<2x512xf32> to vector<2x128xf32>
    %96 = arith.negf %95 : vector<2x128xf32>
    %97 = math.exp %96 : vector<2x128xf32>
    %cst_29 = arith.constant 1.000000e+00 : f32
    %98 = vector.broadcast %cst_29 : f32 to vector<2x128xf32>
    %99 = arith.addf %98, %97 : vector<2x128xf32>
    %100 = arith.divf %98, %99 : vector<2x128xf32>
    %101 = vector.extract_strided_slice %94 {offsets = [0, 128], sizes = [2, 128], strides = [1, 1]} : vector<2x512xf32> to vector<2x128xf32>
    %102 = arith.negf %101 : vector<2x128xf32>
    %103 = math.exp %102 : vector<2x128xf32>
    %cst_30 = arith.constant 1.000000e+00 : f32
    %104 = vector.broadcast %cst_30 : f32 to vector<2x128xf32>
    %105 = arith.addf %104, %103 : vector<2x128xf32>
    %106 = arith.divf %104, %105 : vector<2x128xf32>
    %107 = vector.extract_strided_slice %94 {offsets = [0, 256], sizes = [2, 128], strides = [1, 1]} : vector<2x512xf32> to vector<2x128xf32>
    %108 = math.tanh %107 : vector<2x128xf32>
    %109 = vector.extract_strided_slice %94 {offsets = [0, 384], sizes = [2, 128], strides = [1, 1]} : vector<2x512xf32> to vector<2x128xf32>
    %110 = arith.negf %109 : vector<2x128xf32>
    %111 = math.exp %110 : vector<2x128xf32>
    %cst_31 = arith.constant 1.000000e+00 : f32
    %112 = vector.broadcast %cst_31 : f32 to vector<2x128xf32>
    %113 = arith.addf %112, %111 : vector<2x128xf32>
    %114 = arith.divf %112, %113 : vector<2x128xf32>
    %115 = arith.mulf %106, %30 : vector<2x128xf32>
    %116 = arith.mulf %100, %108 : vector<2x128xf32>
    %117 = arith.addf %115, %116 : vector<2x128xf32>
    %118 = math.tanh %117 : vector<2x128xf32>
    %119 = arith.mulf %114, %118 : vector<2x128xf32>
    %c1_32 = arith.constant 1 : index
    %c0_33 = arith.constant 0 : index
    %c0_34 = arith.constant 0 : index
    %120 = vector.load %arg1[%c1_32, %c0_33, %c0_34] : memref<8x2x512xf32, #tpu.memory_space<vmem>>, vector<1x2x512xf32>
    %121 = vector.shape_cast %120 : vector<1x2x512xf32> to vector<2x512xf32>
    %cst_35 = arith.constant dense<0.000000e+00> : vector<2x512xf32>
    %122 = tpu.matmul %61, %1, %cst_35 {dimension_numbers = #tpu.dot_dimension_numbers<[1], [0], [0], [1], [0, 0, 1, 1], [], []>} : vector<2x128xf32>, vector<128x512xf32>, vector<2x512xf32> -> vector<2x512xf32>
    %123 = arith.addf %121, %122 : vector<2x512xf32>
    %124 = vector.extract_strided_slice %123 {offsets = [0, 0], sizes = [2, 128], strides = [1, 1]} : vector<2x512xf32> to vector<2x128xf32>
    %125 = arith.negf %124 : vector<2x128xf32>
    %126 = math.exp %125 : vector<2x128xf32>
    %cst_36 = arith.constant 1.000000e+00 : f32
    %127 = vector.broadcast %cst_36 : f32 to vector<2x128xf32>
    %128 = arith.addf %127, %126 : vector<2x128xf32>
    %129 = arith.divf %127, %128 : vector<2x128xf32>
    %130 = vector.extract_strided_slice %123 {offsets = [0, 128], sizes = [2, 128], strides = [1, 1]} : vector<2x512xf32> to vector<2x128xf32>
    %131 = arith.negf %130 : vector<2x128xf32>
    %132 = math.exp %131 : vector<2x128xf32>
    %cst_37 = arith.constant 1.000000e+00 : f32
    %133 = vector.broadcast %cst_37 : f32 to vector<2x128xf32>
    %134 = arith.addf %133, %132 : vector<2x128xf32>
    %135 = arith.divf %133, %134 : vector<2x128xf32>
    %136 = vector.extract_strided_slice %123 {offsets = [0, 256], sizes = [2, 128], strides = [1, 1]} : vector<2x512xf32> to vector<2x128xf32>
    %137 = math.tanh %136 : vector<2x128xf32>
    %138 = vector.extract_strided_slice %123 {offsets = [0, 384], sizes = [2, 128], strides = [1, 1]} : vector<2x512xf32> to vector<2x128xf32>
    %139 = arith.negf %138 : vector<2x128xf32>
    %140 = math.exp %139 : vector<2x128xf32>
    %cst_38 = arith.constant 1.000000e+00 : f32
    %141 = vector.broadcast %cst_38 : f32 to vector<2x128xf32>
    %142 = arith.addf %141, %140 : vector<2x128xf32>
    %143 = arith.divf %141, %142 : vector<2x128xf32>
    %144 = arith.mulf %135, %59 : vector<2x128xf32>
    %145 = arith.mulf %129, %137 : vector<2x128xf32>
    %146 = arith.addf %144, %145 : vector<2x128xf32>
    %147 = math.tanh %146 : vector<2x128xf32>
    %148 = arith.mulf %143, %147 : vector<2x128xf32>
    %c1_39 = arith.constant 1 : index
    %c0_40 = arith.constant 0 : index
    %c0_41 = arith.constant 0 : index
    %149 = vector.load %arg2[%c1_39, %c0_40, %c0_41] : memref<8x2x512xf32, #tpu.memory_space<vmem>>, vector<1x2x512xf32>
    %150 = vector.shape_cast %149 : vector<1x2x512xf32> to vector<2x512xf32>
    %cst_42 = arith.constant dense<0.000000e+00> : vector<2x512xf32>
    %151 = tpu.matmul %90, %2, %cst_42 {dimension_numbers = #tpu.dot_dimension_numbers<[1], [0], [0], [1], [0, 0, 1, 1], [], []>} : vector<2x128xf32>, vector<128x512xf32>, vector<2x512xf32> -> vector<2x512xf32>
    %152 = arith.addf %150, %151 : vector<2x512xf32>
    %153 = vector.extract_strided_slice %152 {offsets = [0, 0], sizes = [2, 128], strides = [1, 1]} : vector<2x512xf32> to vector<2x128xf32>
    %154 = arith.negf %153 : vector<2x128xf32>
    %155 = math.exp %154 : vector<2x128xf32>
    %cst_43 = arith.constant 1.000000e+00 : f32
    %156 = vector.broadcast %cst_43 : f32 to vector<2x128xf32>
    %157 = arith.addf %156, %155 : vector<2x128xf32>
    %158 = arith.divf %156, %157 : vector<2x128xf32>
    %159 = vector.extract_strided_slice %152 {offsets = [0, 128], sizes = [2, 128], strides = [1, 1]} : vector<2x512xf32> to vector<2x128xf32>
    %160 = arith.negf %159 : vector<2x128xf32>
    %161 = math.exp %160 : vector<2x128xf32>
    %cst_44 = arith.constant 1.000000e+00 : f32
    %162 = vector.broadcast %cst_44 : f32 to vector<2x128xf32>
    %163 = arith.addf %162, %161 : vector<2x128xf32>
    %164 = arith.divf %162, %163 : vector<2x128xf32>
    %165 = vector.extract_strided_slice %152 {offsets = [0, 256], sizes = [2, 128], strides = [1, 1]} : vector<2x512xf32> to vector<2x128xf32>
    %166 = math.tanh %165 : vector<2x128xf32>
    %167 = vector.extract_strided_slice %152 {offsets = [0, 384], sizes = [2, 128], strides = [1, 1]} : vector<2x512xf32> to vector<2x128xf32>
    %168 = arith.negf %167 : vector<2x128xf32>
    %169 = math.exp %168 : vector<2x128xf32>
    %cst_45 = arith.constant 1.000000e+00 : f32
    %170 = vector.broadcast %cst_45 : f32 to vector<2x128xf32>
    %171 = arith.addf %170, %169 : vector<2x128xf32>
    %172 = arith.divf %170, %171 : vector<2x128xf32>
    %173 = arith.mulf %164, %88 : vector<2x128xf32>
    %174 = arith.mulf %158, %166 : vector<2x128xf32>
    %175 = arith.addf %173, %174 : vector<2x128xf32>
    %176 = math.tanh %175 : vector<2x128xf32>
    %177 = arith.mulf %172, %176 : vector<2x128xf32>
    %c2 = arith.constant 2 : index
    %c0_46 = arith.constant 0 : index
    %c0_47 = arith.constant 0 : index
    %178 = vector.load %arg0[%c2, %c0_46, %c0_47] : memref<8x2x512xf32, #tpu.memory_space<vmem>>, vector<1x2x512xf32>
    %179 = vector.shape_cast %178 : vector<1x2x512xf32> to vector<2x512xf32>
    %cst_48 = arith.constant dense<0.000000e+00> : vector<2x512xf32>
    %180 = tpu.matmul %119, %0, %cst_48 {dimension_numbers = #tpu.dot_dimension_numbers<[1], [0], [0], [1], [0, 0, 1, 1], [], []>} : vector<2x128xf32>, vector<128x512xf32>, vector<2x512xf32> -> vector<2x512xf32>
    %181 = arith.addf %179, %180 : vector<2x512xf32>
    %182 = vector.extract_strided_slice %181 {offsets = [0, 0], sizes = [2, 128], strides = [1, 1]} : vector<2x512xf32> to vector<2x128xf32>
    %183 = arith.negf %182 : vector<2x128xf32>
    %184 = math.exp %183 : vector<2x128xf32>
    %cst_49 = arith.constant 1.000000e+00 : f32
    %185 = vector.broadcast %cst_49 : f32 to vector<2x128xf32>
    %186 = arith.addf %185, %184 : vector<2x128xf32>
    %187 = arith.divf %185, %186 : vector<2x128xf32>
    %188 = vector.extract_strided_slice %181 {offsets = [0, 128], sizes = [2, 128], strides = [1, 1]} : vector<2x512xf32> to vector<2x128xf32>
    %189 = arith.negf %188 : vector<2x128xf32>
    %190 = math.exp %189 : vector<2x128xf32>
    %cst_50 = arith.constant 1.000000e+00 : f32
    %191 = vector.broadcast %cst_50 : f32 to vector<2x128xf32>
    %192 = arith.addf %191, %190 : vector<2x128xf32>
    %193 = arith.divf %191, %192 : vector<2x128xf32>
    %194 = vector.extract_strided_slice %181 {offsets = [0, 256], sizes = [2, 128], strides = [1, 1]} : vector<2x512xf32> to vector<2x128xf32>
    %195 = math.tanh %194 : vector<2x128xf32>
    %196 = vector.extract_strided_slice %181 {offsets = [0, 384], sizes = [2, 128], strides = [1, 1]} : vector<2x512xf32> to vector<2x128xf32>
    %197 = arith.negf %196 : vector<2x128xf32>
    %198 = math.exp %197 : vector<2x128xf32>
    %cst_51 = arith.constant 1.000000e+00 : f32
    %199 = vector.broadcast %cst_51 : f32 to vector<2x128xf32>
    %200 = arith.addf %199, %198 : vector<2x128xf32>
    %201 = arith.divf %199, %200 : vector<2x128xf32>
    %202 = arith.mulf %193, %117 : vector<2x128xf32>
    %203 = arith.mulf %187, %195 : vector<2x128xf32>
    %204 = arith.addf %202, %203 : vector<2x128xf32>
    %205 = math.tanh %204 : vector<2x128xf32>
    %206 = arith.mulf %201, %205 : vector<2x128xf32>
    %c2_52 = arith.constant 2 : index
    %c0_53 = arith.constant 0 : index
    %c0_54 = arith.constant 0 : index
    %207 = vector.load %arg1[%c2_52, %c0_53, %c0_54] : memref<8x2x512xf32, #tpu.memory_space<vmem>>, vector<1x2x512xf32>
    %208 = vector.shape_cast %207 : vector<1x2x512xf32> to vector<2x512xf32>
    %cst_55 = arith.constant dense<0.000000e+00> : vector<2x512xf32>
    %209 = tpu.matmul %148, %1, %cst_55 {dimension_numbers = #tpu.dot_dimension_numbers<[1], [0], [0], [1], [0, 0, 1, 1], [], []>} : vector<2x128xf32>, vector<128x512xf32>, vector<2x512xf32> -> vector<2x512xf32>
    %210 = arith.addf %208, %209 : vector<2x512xf32>
    %211 = vector.extract_strided_slice %210 {offsets = [0, 0], sizes = [2, 128], strides = [1, 1]} : vector<2x512xf32> to vector<2x128xf32>
    %212 = arith.negf %211 : vector<2x128xf32>
    %213 = math.exp %212 : vector<2x128xf32>
    %cst_56 = arith.constant 1.000000e+00 : f32
    %214 = vector.broadcast %cst_56 : f32 to vector<2x128xf32>
    %215 = arith.addf %214, %213 : vector<2x128xf32>
    %216 = arith.divf %214, %215 : vector<2x128xf32>
    %217 = vector.extract_strided_slice %210 {offsets = [0, 128], sizes = [2, 128], strides = [1, 1]} : vector<2x512xf32> to vector<2x128xf32>
    %218 = arith.negf %217 : vector<2x128xf32>
    %219 = math.exp %218 : vector<2x128xf32>
    %cst_57 = arith.constant 1.000000e+00 : f32
    %220 = vector.broadcast %cst_57 : f32 to vector<2x128xf32>
    %221 = arith.addf %220, %219 : vector<2x128xf32>
    %222 = arith.divf %220, %221 : vector<2x128xf32>
    %223 = vector.extract_strided_slice %210 {offsets = [0, 256], sizes = [2, 128], strides = [1, 1]} : vector<2x512xf32> to vector<2x128xf32>
    %224 = math.tanh %223 : vector<2x128xf32>
    %225 = vector.extract_strided_slice %210 {offsets = [0, 384], sizes = [2, 128], strides = [1, 1]} : vector<2x512xf32> to vector<2x128xf32>
    %226 = arith.negf %225 : vector<2x128xf32>
    %227 = math.exp %226 : vector<2x128xf32>
    %cst_58 = arith.constant 1.000000e+00 : f32
    %228 = vector.broadcast %cst_58 : f32 to vector<2x128xf32>
    %229 = arith.addf %228, %227 : vector<2x128xf32>
    %230 = arith.divf %228, %229 : vector<2x128xf32>
    %231 = arith.mulf %222, %146 : vector<2x128xf32>
    %232 = arith.mulf %216, %224 : vector<2x128xf32>
    %233 = arith.addf %231, %232 : vector<2x128xf32>
    %234 = math.tanh %233 : vector<2x128xf32>
    %235 = arith.mulf %230, %234 : vector<2x128xf32>
    %c2_59 = arith.constant 2 : index
    %c0_60 = arith.constant 0 : index
    %c0_61 = arith.constant 0 : index
    %236 = vector.load %arg2[%c2_59, %c0_60, %c0_61] : memref<8x2x512xf32, #tpu.memory_space<vmem>>, vector<1x2x512xf32>
    %237 = vector.shape_cast %236 : vector<1x2x512xf32> to vector<2x512xf32>
    %cst_62 = arith.constant dense<0.000000e+00> : vector<2x512xf32>
    %238 = tpu.matmul %177, %2, %cst_62 {dimension_numbers = #tpu.dot_dimension_numbers<[1], [0], [0], [1], [0, 0, 1, 1], [], []>} : vector<2x128xf32>, vector<128x512xf32>, vector<2x512xf32> -> vector<2x512xf32>
    %239 = arith.addf %237, %238 : vector<2x512xf32>
    %240 = vector.extract_strided_slice %239 {offsets = [0, 0], sizes = [2, 128], strides = [1, 1]} : vector<2x512xf32> to vector<2x128xf32>
    %241 = arith.negf %240 : vector<2x128xf32>
    %242 = math.exp %241 : vector<2x128xf32>
    %cst_63 = arith.constant 1.000000e+00 : f32
    %243 = vector.broadcast %cst_63 : f32 to vector<2x128xf32>
    %244 = arith.addf %243, %242 : vector<2x128xf32>
    %245 = arith.divf %243, %244 : vector<2x128xf32>
    %246 = vector.extract_strided_slice %239 {offsets = [0, 128], sizes = [2, 128], strides = [1, 1]} : vector<2x512xf32> to vector<2x128xf32>
    %247 = arith.negf %246 : vector<2x128xf32>
    %248 = math.exp %247 : vector<2x128xf32>
    %cst_64 = arith.constant 1.000000e+00 : f32
    %249 = vector.broadcast %cst_64 : f32 to vector<2x128xf32>
    %250 = arith.addf %249, %248 : vector<2x128xf32>
    %251 = arith.divf %249, %250 : vector<2x128xf32>
    %252 = vector.extract_strided_slice %239 {offsets = [0, 256], sizes = [2, 128], strides = [1, 1]} : vector<2x512xf32> to vector<2x128xf32>
    %253 = math.tanh %252 : vector<2x128xf32>
    %254 = vector.extract_strided_slice %239 {offsets = [0, 384], sizes = [2, 128], strides = [1, 1]} : vector<2x512xf32> to vector<2x128xf32>
    %255 = arith.negf %254 : vector<2x128xf32>
    %256 = math.exp %255 : vector<2x128xf32>
    %cst_65 = arith.constant 1.000000e+00 : f32
    %257 = vector.broadcast %cst_65 : f32 to vector<2x128xf32>
    %258 = arith.addf %257, %256 : vector<2x128xf32>
    %259 = arith.divf %257, %258 : vector<2x128xf32>
    %260 = arith.mulf %251, %175 : vector<2x128xf32>
    %261 = arith.mulf %245, %253 : vector<2x128xf32>
    %262 = arith.addf %260, %261 : vector<2x128xf32>
    %263 = math.tanh %262 : vector<2x128xf32>
    %264 = arith.mulf %259, %263 : vector<2x128xf32>
    %c3 = arith.constant 3 : index
    %c0_66 = arith.constant 0 : index
    %c0_67 = arith.constant 0 : index
    %265 = vector.load %arg0[%c3, %c0_66, %c0_67] : memref<8x2x512xf32, #tpu.memory_space<vmem>>, vector<1x2x512xf32>
    %266 = vector.shape_cast %265 : vector<1x2x512xf32> to vector<2x512xf32>
    %cst_68 = arith.constant dense<0.000000e+00> : vector<2x512xf32>
    %267 = tpu.matmul %206, %0, %cst_68 {dimension_numbers = #tpu.dot_dimension_numbers<[1], [0], [0], [1], [0, 0, 1, 1], [], []>} : vector<2x128xf32>, vector<128x512xf32>, vector<2x512xf32> -> vector<2x512xf32>
    %268 = arith.addf %266, %267 : vector<2x512xf32>
    %269 = vector.extract_strided_slice %268 {offsets = [0, 0], sizes = [2, 128], strides = [1, 1]} : vector<2x512xf32> to vector<2x128xf32>
    %270 = arith.negf %269 : vector<2x128xf32>
    %271 = math.exp %270 : vector<2x128xf32>
    %cst_69 = arith.constant 1.000000e+00 : f32
    %272 = vector.broadcast %cst_69 : f32 to vector<2x128xf32>
    %273 = arith.addf %272, %271 : vector<2x128xf32>
    %274 = arith.divf %272, %273 : vector<2x128xf32>
    %275 = vector.extract_strided_slice %268 {offsets = [0, 128], sizes = [2, 128], strides = [1, 1]} : vector<2x512xf32> to vector<2x128xf32>
    %276 = arith.negf %275 : vector<2x128xf32>
    %277 = math.exp %276 : vector<2x128xf32>
    %cst_70 = arith.constant 1.000000e+00 : f32
    %278 = vector.broadcast %cst_70 : f32 to vector<2x128xf32>
    %279 = arith.addf %278, %277 : vector<2x128xf32>
    %280 = arith.divf %278, %279 : vector<2x128xf32>
    %281 = vector.extract_strided_slice %268 {offsets = [0, 256], sizes = [2, 128], strides = [1, 1]} : vector<2x512xf32> to vector<2x128xf32>
    %282 = math.tanh %281 : vector<2x128xf32>
    %283 = vector.extract_strided_slice %268 {offsets = [0, 384], sizes = [2, 128], strides = [1, 1]} : vector<2x512xf32> to vector<2x128xf32>
    %284 = arith.negf %283 : vector<2x128xf32>
    %285 = math.exp %284 : vector<2x128xf32>
    %cst_71 = arith.constant 1.000000e+00 : f32
    %286 = vector.broadcast %cst_71 : f32 to vector<2x128xf32>
    %287 = arith.addf %286, %285 : vector<2x128xf32>
    %288 = arith.divf %286, %287 : vector<2x128xf32>
    %289 = arith.mulf %280, %204 : vector<2x128xf32>
    %290 = arith.mulf %274, %282 : vector<2x128xf32>
    %291 = arith.addf %289, %290 : vector<2x128xf32>
    %292 = math.tanh %291 : vector<2x128xf32>
    %293 = arith.mulf %288, %292 : vector<2x128xf32>
    %c3_72 = arith.constant 3 : index
    %c0_73 = arith.constant 0 : index
    %c0_74 = arith.constant 0 : index
    %294 = vector.load %arg1[%c3_72, %c0_73, %c0_74] : memref<8x2x512xf32, #tpu.memory_space<vmem>>, vector<1x2x512xf32>
    %295 = vector.shape_cast %294 : vector<1x2x512xf32> to vector<2x512xf32>
    %cst_75 = arith.constant dense<0.000000e+00> : vector<2x512xf32>
    %296 = tpu.matmul %235, %1, %cst_75 {dimension_numbers = #tpu.dot_dimension_numbers<[1], [0], [0], [1], [0, 0, 1, 1], [], []>} : vector<2x128xf32>, vector<128x512xf32>, vector<2x512xf32> -> vector<2x512xf32>
    %297 = arith.addf %295, %296 : vector<2x512xf32>
    %298 = vector.extract_strided_slice %297 {offsets = [0, 0], sizes = [2, 128], strides = [1, 1]} : vector<2x512xf32> to vector<2x128xf32>
    %299 = arith.negf %298 : vector<2x128xf32>
    %300 = math.exp %299 : vector<2x128xf32>
    %cst_76 = arith.constant 1.000000e+00 : f32
    %301 = vector.broadcast %cst_76 : f32 to vector<2x128xf32>
    %302 = arith.addf %301, %300 : vector<2x128xf32>
    %303 = arith.divf %301, %302 : vector<2x128xf32>
    %304 = vector.extract_strided_slice %297 {offsets = [0, 128], sizes = [2, 128], strides = [1, 1]} : vector<2x512xf32> to vector<2x128xf32>
    %305 = arith.negf %304 : vector<2x128xf32>
    %306 = math.exp %305 : vector<2x128xf32>
    %cst_77 = arith.constant 1.000000e+00 : f32
    %307 = vector.broadcast %cst_77 : f32 to vector<2x128xf32>
    %308 = arith.addf %307, %306 : vector<2x128xf32>
    %309 = arith.divf %307, %308 : vector<2x128xf32>
    %310 = vector.extract_strided_slice %297 {offsets = [0, 256], sizes = [2, 128], strides = [1, 1]} : vector<2x512xf32> to vector<2x128xf32>
    %311 = math.tanh %310 : vector<2x128xf32>
    %312 = vector.extract_strided_slice %297 {offsets = [0, 384], sizes = [2, 128], strides = [1, 1]} : vector<2x512xf32> to vector<2x128xf32>
    %313 = arith.negf %312 : vector<2x128xf32>
    %314 = math.exp %313 : vector<2x128xf32>
    %cst_78 = arith.constant 1.000000e+00 : f32
    %315 = vector.broadcast %cst_78 : f32 to vector<2x128xf32>
    %316 = arith.addf %315, %314 : vector<2x128xf32>
    %317 = arith.divf %315, %316 : vector<2x128xf32>
    %318 = arith.mulf %309, %233 : vector<2x128xf32>
    %319 = arith.mulf %303, %311 : vector<2x128xf32>
    %320 = arith.addf %318, %319 : vector<2x128xf32>
    %321 = math.tanh %320 : vector<2x128xf32>
    %322 = arith.mulf %317, %321 : vector<2x128xf32>
    %c3_79 = arith.constant 3 : index
    %c0_80 = arith.constant 0 : index
    %c0_81 = arith.constant 0 : index
    %323 = vector.load %arg2[%c3_79, %c0_80, %c0_81] : memref<8x2x512xf32, #tpu.memory_space<vmem>>, vector<1x2x512xf32>
    %324 = vector.shape_cast %323 : vector<1x2x512xf32> to vector<2x512xf32>
    %cst_82 = arith.constant dense<0.000000e+00> : vector<2x512xf32>
    %325 = tpu.matmul %264, %2, %cst_82 {dimension_numbers = #tpu.dot_dimension_numbers<[1], [0], [0], [1], [0, 0, 1, 1], [], []>} : vector<2x128xf32>, vector<128x512xf32>, vector<2x512xf32> -> vector<2x512xf32>
    %326 = arith.addf %324, %325 : vector<2x512xf32>
    %327 = vector.extract_strided_slice %326 {offsets = [0, 0], sizes = [2, 128], strides = [1, 1]} : vector<2x512xf32> to vector<2x128xf32>
    %328 = arith.negf %327 : vector<2x128xf32>
    %329 = math.exp %328 : vector<2x128xf32>
    %cst_83 = arith.constant 1.000000e+00 : f32
    %330 = vector.broadcast %cst_83 : f32 to vector<2x128xf32>
    %331 = arith.addf %330, %329 : vector<2x128xf32>
    %332 = arith.divf %330, %331 : vector<2x128xf32>
    %333 = vector.extract_strided_slice %326 {offsets = [0, 128], sizes = [2, 128], strides = [1, 1]} : vector<2x512xf32> to vector<2x128xf32>
    %334 = arith.negf %333 : vector<2x128xf32>
    %335 = math.exp %334 : vector<2x128xf32>
    %cst_84 = arith.constant 1.000000e+00 : f32
    %336 = vector.broadcast %cst_84 : f32 to vector<2x128xf32>
    %337 = arith.addf %336, %335 : vector<2x128xf32>
    %338 = arith.divf %336, %337 : vector<2x128xf32>
    %339 = vector.extract_strided_slice %326 {offsets = [0, 256], sizes = [2, 128], strides = [1, 1]} : vector<2x512xf32> to vector<2x128xf32>
    %340 = math.tanh %339 : vector<2x128xf32>
    %341 = vector.extract_strided_slice %326 {offsets = [0, 384], sizes = [2, 128], strides = [1, 1]} : vector<2x512xf32> to vector<2x128xf32>
    %342 = arith.negf %341 : vector<2x128xf32>
    %343 = math.exp %342 : vector<2x128xf32>
    %cst_85 = arith.constant 1.000000e+00 : f32
    %344 = vector.broadcast %cst_85 : f32 to vector<2x128xf32>
    %345 = arith.addf %344, %343 : vector<2x128xf32>
    %346 = arith.divf %344, %345 : vector<2x128xf32>
    %347 = arith.mulf %338, %262 : vector<2x128xf32>
    %348 = arith.mulf %332, %340 : vector<2x128xf32>
    %349 = arith.addf %347, %348 : vector<2x128xf32>
    %350 = math.tanh %349 : vector<2x128xf32>
    %351 = arith.mulf %346, %350 : vector<2x128xf32>
    %c4 = arith.constant 4 : index
    %c0_86 = arith.constant 0 : index
    %c0_87 = arith.constant 0 : index
    %352 = vector.load %arg0[%c4, %c0_86, %c0_87] : memref<8x2x512xf32, #tpu.memory_space<vmem>>, vector<1x2x512xf32>
    %353 = vector.shape_cast %352 : vector<1x2x512xf32> to vector<2x512xf32>
    %cst_88 = arith.constant dense<0.000000e+00> : vector<2x512xf32>
    %354 = tpu.matmul %293, %0, %cst_88 {dimension_numbers = #tpu.dot_dimension_numbers<[1], [0], [0], [1], [0, 0, 1, 1], [], []>} : vector<2x128xf32>, vector<128x512xf32>, vector<2x512xf32> -> vector<2x512xf32>
    %355 = arith.addf %353, %354 : vector<2x512xf32>
    %356 = vector.extract_strided_slice %355 {offsets = [0, 0], sizes = [2, 128], strides = [1, 1]} : vector<2x512xf32> to vector<2x128xf32>
    %357 = arith.negf %356 : vector<2x128xf32>
    %358 = math.exp %357 : vector<2x128xf32>
    %cst_89 = arith.constant 1.000000e+00 : f32
    %359 = vector.broadcast %cst_89 : f32 to vector<2x128xf32>
    %360 = arith.addf %359, %358 : vector<2x128xf32>
    %361 = arith.divf %359, %360 : vector<2x128xf32>
    %362 = vector.extract_strided_slice %355 {offsets = [0, 128], sizes = [2, 128], strides = [1, 1]} : vector<2x512xf32> to vector<2x128xf32>
    %363 = arith.negf %362 : vector<2x128xf32>
    %364 = math.exp %363 : vector<2x128xf32>
    %cst_90 = arith.constant 1.000000e+00 : f32
    %365 = vector.broadcast %cst_90 : f32 to vector<2x128xf32>
    %366 = arith.addf %365, %364 : vector<2x128xf32>
    %367 = arith.divf %365, %366 : vector<2x128xf32>
    %368 = vector.extract_strided_slice %355 {offsets = [0, 256], sizes = [2, 128], strides = [1, 1]} : vector<2x512xf32> to vector<2x128xf32>
    %369 = math.tanh %368 : vector<2x128xf32>
    %370 = vector.extract_strided_slice %355 {offsets = [0, 384], sizes = [2, 128], strides = [1, 1]} : vector<2x512xf32> to vector<2x128xf32>
    %371 = arith.negf %370 : vector<2x128xf32>
    %372 = math.exp %371 : vector<2x128xf32>
    %cst_91 = arith.constant 1.000000e+00 : f32
    %373 = vector.broadcast %cst_91 : f32 to vector<2x128xf32>
    %374 = arith.addf %373, %372 : vector<2x128xf32>
    %375 = arith.divf %373, %374 : vector<2x128xf32>
    %376 = arith.mulf %367, %291 : vector<2x128xf32>
    %377 = arith.mulf %361, %369 : vector<2x128xf32>
    %378 = arith.addf %376, %377 : vector<2x128xf32>
    %379 = math.tanh %378 : vector<2x128xf32>
    %380 = arith.mulf %375, %379 : vector<2x128xf32>
    %c4_92 = arith.constant 4 : index
    %c0_93 = arith.constant 0 : index
    %c0_94 = arith.constant 0 : index
    %381 = vector.load %arg1[%c4_92, %c0_93, %c0_94] : memref<8x2x512xf32, #tpu.memory_space<vmem>>, vector<1x2x512xf32>
    %382 = vector.shape_cast %381 : vector<1x2x512xf32> to vector<2x512xf32>
    %cst_95 = arith.constant dense<0.000000e+00> : vector<2x512xf32>
    %383 = tpu.matmul %322, %1, %cst_95 {dimension_numbers = #tpu.dot_dimension_numbers<[1], [0], [0], [1], [0, 0, 1, 1], [], []>} : vector<2x128xf32>, vector<128x512xf32>, vector<2x512xf32> -> vector<2x512xf32>
    %384 = arith.addf %382, %383 : vector<2x512xf32>
    %385 = vector.extract_strided_slice %384 {offsets = [0, 0], sizes = [2, 128], strides = [1, 1]} : vector<2x512xf32> to vector<2x128xf32>
    %386 = arith.negf %385 : vector<2x128xf32>
    %387 = math.exp %386 : vector<2x128xf32>
    %cst_96 = arith.constant 1.000000e+00 : f32
    %388 = vector.broadcast %cst_96 : f32 to vector<2x128xf32>
    %389 = arith.addf %388, %387 : vector<2x128xf32>
    %390 = arith.divf %388, %389 : vector<2x128xf32>
    %391 = vector.extract_strided_slice %384 {offsets = [0, 128], sizes = [2, 128], strides = [1, 1]} : vector<2x512xf32> to vector<2x128xf32>
    %392 = arith.negf %391 : vector<2x128xf32>
    %393 = math.exp %392 : vector<2x128xf32>
    %cst_97 = arith.constant 1.000000e+00 : f32
    %394 = vector.broadcast %cst_97 : f32 to vector<2x128xf32>
    %395 = arith.addf %394, %393 : vector<2x128xf32>
    %396 = arith.divf %394, %395 : vector<2x128xf32>
    %397 = vector.extract_strided_slice %384 {offsets = [0, 256], sizes = [2, 128], strides = [1, 1]} : vector<2x512xf32> to vector<2x128xf32>
    %398 = math.tanh %397 : vector<2x128xf32>
    %399 = vector.extract_strided_slice %384 {offsets = [0, 384], sizes = [2, 128], strides = [1, 1]} : vector<2x512xf32> to vector<2x128xf32>
    %400 = arith.negf %399 : vector<2x128xf32>
    %401 = math.exp %400 : vector<2x128xf32>
    %cst_98 = arith.constant 1.000000e+00 : f32
    %402 = vector.broadcast %cst_98 : f32 to vector<2x128xf32>
    %403 = arith.addf %402, %401 : vector<2x128xf32>
    %404 = arith.divf %402, %403 : vector<2x128xf32>
    %405 = arith.mulf %396, %320 : vector<2x128xf32>
    %406 = arith.mulf %390, %398 : vector<2x128xf32>
    %407 = arith.addf %405, %406 : vector<2x128xf32>
    %408 = math.tanh %407 : vector<2x128xf32>
    %409 = arith.mulf %404, %408 : vector<2x128xf32>
    %c4_99 = arith.constant 4 : index
    %c0_100 = arith.constant 0 : index
    %c0_101 = arith.constant 0 : index
    %410 = vector.load %arg2[%c4_99, %c0_100, %c0_101] : memref<8x2x512xf32, #tpu.memory_space<vmem>>, vector<1x2x512xf32>
    %411 = vector.shape_cast %410 : vector<1x2x512xf32> to vector<2x512xf32>
    %cst_102 = arith.constant dense<0.000000e+00> : vector<2x512xf32>
    %412 = tpu.matmul %351, %2, %cst_102 {dimension_numbers = #tpu.dot_dimension_numbers<[1], [0], [0], [1], [0, 0, 1, 1], [], []>} : vector<2x128xf32>, vector<128x512xf32>, vector<2x512xf32> -> vector<2x512xf32>
    %413 = arith.addf %411, %412 : vector<2x512xf32>
    %414 = vector.extract_strided_slice %413 {offsets = [0, 0], sizes = [2, 128], strides = [1, 1]} : vector<2x512xf32> to vector<2x128xf32>
    %415 = arith.negf %414 : vector<2x128xf32>
    %416 = math.exp %415 : vector<2x128xf32>
    %cst_103 = arith.constant 1.000000e+00 : f32
    %417 = vector.broadcast %cst_103 : f32 to vector<2x128xf32>
    %418 = arith.addf %417, %416 : vector<2x128xf32>
    %419 = arith.divf %417, %418 : vector<2x128xf32>
    %420 = vector.extract_strided_slice %413 {offsets = [0, 128], sizes = [2, 128], strides = [1, 1]} : vector<2x512xf32> to vector<2x128xf32>
    %421 = arith.negf %420 : vector<2x128xf32>
    %422 = math.exp %421 : vector<2x128xf32>
    %cst_104 = arith.constant 1.000000e+00 : f32
    %423 = vector.broadcast %cst_104 : f32 to vector<2x128xf32>
    %424 = arith.addf %423, %422 : vector<2x128xf32>
    %425 = arith.divf %423, %424 : vector<2x128xf32>
    %426 = vector.extract_strided_slice %413 {offsets = [0, 256], sizes = [2, 128], strides = [1, 1]} : vector<2x512xf32> to vector<2x128xf32>
    %427 = math.tanh %426 : vector<2x128xf32>
    %428 = vector.extract_strided_slice %413 {offsets = [0, 384], sizes = [2, 128], strides = [1, 1]} : vector<2x512xf32> to vector<2x128xf32>
    %429 = arith.negf %428 : vector<2x128xf32>
    %430 = math.exp %429 : vector<2x128xf32>
    %cst_105 = arith.constant 1.000000e+00 : f32
    %431 = vector.broadcast %cst_105 : f32 to vector<2x128xf32>
    %432 = arith.addf %431, %430 : vector<2x128xf32>
    %433 = arith.divf %431, %432 : vector<2x128xf32>
    %434 = arith.mulf %425, %349 : vector<2x128xf32>
    %435 = arith.mulf %419, %427 : vector<2x128xf32>
    %436 = arith.addf %434, %435 : vector<2x128xf32>
    %437 = math.tanh %436 : vector<2x128xf32>
    %438 = arith.mulf %433, %437 : vector<2x128xf32>
    %c5 = arith.constant 5 : index
    %c0_106 = arith.constant 0 : index
    %c0_107 = arith.constant 0 : index
    %439 = vector.load %arg0[%c5, %c0_106, %c0_107] : memref<8x2x512xf32, #tpu.memory_space<vmem>>, vector<1x2x512xf32>
    %440 = vector.shape_cast %439 : vector<1x2x512xf32> to vector<2x512xf32>
    %cst_108 = arith.constant dense<0.000000e+00> : vector<2x512xf32>
    %441 = tpu.matmul %380, %0, %cst_108 {dimension_numbers = #tpu.dot_dimension_numbers<[1], [0], [0], [1], [0, 0, 1, 1], [], []>} : vector<2x128xf32>, vector<128x512xf32>, vector<2x512xf32> -> vector<2x512xf32>
    %442 = arith.addf %440, %441 : vector<2x512xf32>
    %443 = vector.extract_strided_slice %442 {offsets = [0, 0], sizes = [2, 128], strides = [1, 1]} : vector<2x512xf32> to vector<2x128xf32>
    %444 = arith.negf %443 : vector<2x128xf32>
    %445 = math.exp %444 : vector<2x128xf32>
    %cst_109 = arith.constant 1.000000e+00 : f32
    %446 = vector.broadcast %cst_109 : f32 to vector<2x128xf32>
    %447 = arith.addf %446, %445 : vector<2x128xf32>
    %448 = arith.divf %446, %447 : vector<2x128xf32>
    %449 = vector.extract_strided_slice %442 {offsets = [0, 128], sizes = [2, 128], strides = [1, 1]} : vector<2x512xf32> to vector<2x128xf32>
    %450 = arith.negf %449 : vector<2x128xf32>
    %451 = math.exp %450 : vector<2x128xf32>
    %cst_110 = arith.constant 1.000000e+00 : f32
    %452 = vector.broadcast %cst_110 : f32 to vector<2x128xf32>
    %453 = arith.addf %452, %451 : vector<2x128xf32>
    %454 = arith.divf %452, %453 : vector<2x128xf32>
    %455 = vector.extract_strided_slice %442 {offsets = [0, 256], sizes = [2, 128], strides = [1, 1]} : vector<2x512xf32> to vector<2x128xf32>
    %456 = math.tanh %455 : vector<2x128xf32>
    %457 = vector.extract_strided_slice %442 {offsets = [0, 384], sizes = [2, 128], strides = [1, 1]} : vector<2x512xf32> to vector<2x128xf32>
    %458 = arith.negf %457 : vector<2x128xf32>
    %459 = math.exp %458 : vector<2x128xf32>
    %cst_111 = arith.constant 1.000000e+00 : f32
    %460 = vector.broadcast %cst_111 : f32 to vector<2x128xf32>
    %461 = arith.addf %460, %459 : vector<2x128xf32>
    %462 = arith.divf %460, %461 : vector<2x128xf32>
    %463 = arith.mulf %454, %378 : vector<2x128xf32>
    %464 = arith.mulf %448, %456 : vector<2x128xf32>
    %465 = arith.addf %463, %464 : vector<2x128xf32>
    %466 = math.tanh %465 : vector<2x128xf32>
    %467 = arith.mulf %462, %466 : vector<2x128xf32>
    %c5_112 = arith.constant 5 : index
    %c0_113 = arith.constant 0 : index
    %c0_114 = arith.constant 0 : index
    %468 = vector.load %arg1[%c5_112, %c0_113, %c0_114] : memref<8x2x512xf32, #tpu.memory_space<vmem>>, vector<1x2x512xf32>
    %469 = vector.shape_cast %468 : vector<1x2x512xf32> to vector<2x512xf32>
    %cst_115 = arith.constant dense<0.000000e+00> : vector<2x512xf32>
    %470 = tpu.matmul %409, %1, %cst_115 {dimension_numbers = #tpu.dot_dimension_numbers<[1], [0], [0], [1], [0, 0, 1, 1], [], []>} : vector<2x128xf32>, vector<128x512xf32>, vector<2x512xf32> -> vector<2x512xf32>
    %471 = arith.addf %469, %470 : vector<2x512xf32>
    %472 = vector.extract_strided_slice %471 {offsets = [0, 0], sizes = [2, 128], strides = [1, 1]} : vector<2x512xf32> to vector<2x128xf32>
    %473 = arith.negf %472 : vector<2x128xf32>
    %474 = math.exp %473 : vector<2x128xf32>
    %cst_116 = arith.constant 1.000000e+00 : f32
    %475 = vector.broadcast %cst_116 : f32 to vector<2x128xf32>
    %476 = arith.addf %475, %474 : vector<2x128xf32>
    %477 = arith.divf %475, %476 : vector<2x128xf32>
    %478 = vector.extract_strided_slice %471 {offsets = [0, 128], sizes = [2, 128], strides = [1, 1]} : vector<2x512xf32> to vector<2x128xf32>
    %479 = arith.negf %478 : vector<2x128xf32>
    %480 = math.exp %479 : vector<2x128xf32>
    %cst_117 = arith.constant 1.000000e+00 : f32
    %481 = vector.broadcast %cst_117 : f32 to vector<2x128xf32>
    %482 = arith.addf %481, %480 : vector<2x128xf32>
    %483 = arith.divf %481, %482 : vector<2x128xf32>
    %484 = vector.extract_strided_slice %471 {offsets = [0, 256], sizes = [2, 128], strides = [1, 1]} : vector<2x512xf32> to vector<2x128xf32>
    %485 = math.tanh %484 : vector<2x128xf32>
    %486 = vector.extract_strided_slice %471 {offsets = [0, 384], sizes = [2, 128], strides = [1, 1]} : vector<2x512xf32> to vector<2x128xf32>
    %487 = arith.negf %486 : vector<2x128xf32>
    %488 = math.exp %487 : vector<2x128xf32>
    %cst_118 = arith.constant 1.000000e+00 : f32
    %489 = vector.broadcast %cst_118 : f32 to vector<2x128xf32>
    %490 = arith.addf %489, %488 : vector<2x128xf32>
    %491 = arith.divf %489, %490 : vector<2x128xf32>
    %492 = arith.mulf %483, %407 : vector<2x128xf32>
    %493 = arith.mulf %477, %485 : vector<2x128xf32>
    %494 = arith.addf %492, %493 : vector<2x128xf32>
    %495 = math.tanh %494 : vector<2x128xf32>
    %496 = arith.mulf %491, %495 : vector<2x128xf32>
    %c5_119 = arith.constant 5 : index
    %c0_120 = arith.constant 0 : index
    %c0_121 = arith.constant 0 : index
    %497 = vector.load %arg2[%c5_119, %c0_120, %c0_121] : memref<8x2x512xf32, #tpu.memory_space<vmem>>, vector<1x2x512xf32>
    %498 = vector.shape_cast %497 : vector<1x2x512xf32> to vector<2x512xf32>
    %cst_122 = arith.constant dense<0.000000e+00> : vector<2x512xf32>
    %499 = tpu.matmul %438, %2, %cst_122 {dimension_numbers = #tpu.dot_dimension_numbers<[1], [0], [0], [1], [0, 0, 1, 1], [], []>} : vector<2x128xf32>, vector<128x512xf32>, vector<2x512xf32> -> vector<2x512xf32>
    %500 = arith.addf %498, %499 : vector<2x512xf32>
    %501 = vector.extract_strided_slice %500 {offsets = [0, 0], sizes = [2, 128], strides = [1, 1]} : vector<2x512xf32> to vector<2x128xf32>
    %502 = arith.negf %501 : vector<2x128xf32>
    %503 = math.exp %502 : vector<2x128xf32>
    %cst_123 = arith.constant 1.000000e+00 : f32
    %504 = vector.broadcast %cst_123 : f32 to vector<2x128xf32>
    %505 = arith.addf %504, %503 : vector<2x128xf32>
    %506 = arith.divf %504, %505 : vector<2x128xf32>
    %507 = vector.extract_strided_slice %500 {offsets = [0, 128], sizes = [2, 128], strides = [1, 1]} : vector<2x512xf32> to vector<2x128xf32>
    %508 = arith.negf %507 : vector<2x128xf32>
    %509 = math.exp %508 : vector<2x128xf32>
    %cst_124 = arith.constant 1.000000e+00 : f32
    %510 = vector.broadcast %cst_124 : f32 to vector<2x128xf32>
    %511 = arith.addf %510, %509 : vector<2x128xf32>
    %512 = arith.divf %510, %511 : vector<2x128xf32>
    %513 = vector.extract_strided_slice %500 {offsets = [0, 256], sizes = [2, 128], strides = [1, 1]} : vector<2x512xf32> to vector<2x128xf32>
    %514 = math.tanh %513 : vector<2x128xf32>
    %515 = vector.extract_strided_slice %500 {offsets = [0, 384], sizes = [2, 128], strides = [1, 1]} : vector<2x512xf32> to vector<2x128xf32>
    %516 = arith.negf %515 : vector<2x128xf32>
    %517 = math.exp %516 : vector<2x128xf32>
    %cst_125 = arith.constant 1.000000e+00 : f32
    %518 = vector.broadcast %cst_125 : f32 to vector<2x128xf32>
    %519 = arith.addf %518, %517 : vector<2x128xf32>
    %520 = arith.divf %518, %519 : vector<2x128xf32>
    %521 = arith.mulf %512, %436 : vector<2x128xf32>
    %522 = arith.mulf %506, %514 : vector<2x128xf32>
    %523 = arith.addf %521, %522 : vector<2x128xf32>
    %524 = math.tanh %523 : vector<2x128xf32>
    %525 = arith.mulf %520, %524 : vector<2x128xf32>
    %c6 = arith.constant 6 : index
    %c0_126 = arith.constant 0 : index
    %c0_127 = arith.constant 0 : index
    %526 = vector.load %arg0[%c6, %c0_126, %c0_127] : memref<8x2x512xf32, #tpu.memory_space<vmem>>, vector<1x2x512xf32>
    %527 = vector.shape_cast %526 : vector<1x2x512xf32> to vector<2x512xf32>
    %cst_128 = arith.constant dense<0.000000e+00> : vector<2x512xf32>
    %528 = tpu.matmul %467, %0, %cst_128 {dimension_numbers = #tpu.dot_dimension_numbers<[1], [0], [0], [1], [0, 0, 1, 1], [], []>} : vector<2x128xf32>, vector<128x512xf32>, vector<2x512xf32> -> vector<2x512xf32>
    %529 = arith.addf %527, %528 : vector<2x512xf32>
    %530 = vector.extract_strided_slice %529 {offsets = [0, 0], sizes = [2, 128], strides = [1, 1]} : vector<2x512xf32> to vector<2x128xf32>
    %531 = arith.negf %530 : vector<2x128xf32>
    %532 = math.exp %531 : vector<2x128xf32>
    %cst_129 = arith.constant 1.000000e+00 : f32
    %533 = vector.broadcast %cst_129 : f32 to vector<2x128xf32>
    %534 = arith.addf %533, %532 : vector<2x128xf32>
    %535 = arith.divf %533, %534 : vector<2x128xf32>
    %536 = vector.extract_strided_slice %529 {offsets = [0, 128], sizes = [2, 128], strides = [1, 1]} : vector<2x512xf32> to vector<2x128xf32>
    %537 = arith.negf %536 : vector<2x128xf32>
    %538 = math.exp %537 : vector<2x128xf32>
    %cst_130 = arith.constant 1.000000e+00 : f32
    %539 = vector.broadcast %cst_130 : f32 to vector<2x128xf32>
    %540 = arith.addf %539, %538 : vector<2x128xf32>
    %541 = arith.divf %539, %540 : vector<2x128xf32>
    %542 = vector.extract_strided_slice %529 {offsets = [0, 256], sizes = [2, 128], strides = [1, 1]} : vector<2x512xf32> to vector<2x128xf32>
    %543 = math.tanh %542 : vector<2x128xf32>
    %544 = vector.extract_strided_slice %529 {offsets = [0, 384], sizes = [2, 128], strides = [1, 1]} : vector<2x512xf32> to vector<2x128xf32>
    %545 = arith.negf %544 : vector<2x128xf32>
    %546 = math.exp %545 : vector<2x128xf32>
    %cst_131 = arith.constant 1.000000e+00 : f32
    %547 = vector.broadcast %cst_131 : f32 to vector<2x128xf32>
    %548 = arith.addf %547, %546 : vector<2x128xf32>
    %549 = arith.divf %547, %548 : vector<2x128xf32>
    %550 = arith.mulf %541, %465 : vector<2x128xf32>
    %551 = arith.mulf %535, %543 : vector<2x128xf32>
    %552 = arith.addf %550, %551 : vector<2x128xf32>
    %553 = math.tanh %552 : vector<2x128xf32>
    %554 = arith.mulf %549, %553 : vector<2x128xf32>
    %c6_132 = arith.constant 6 : index
    %c0_133 = arith.constant 0 : index
    %c0_134 = arith.constant 0 : index
    %555 = vector.load %arg1[%c6_132, %c0_133, %c0_134] : memref<8x2x512xf32, #tpu.memory_space<vmem>>, vector<1x2x512xf32>
    %556 = vector.shape_cast %555 : vector<1x2x512xf32> to vector<2x512xf32>
    %cst_135 = arith.constant dense<0.000000e+00> : vector<2x512xf32>
    %557 = tpu.matmul %496, %1, %cst_135 {dimension_numbers = #tpu.dot_dimension_numbers<[1], [0], [0], [1], [0, 0, 1, 1], [], []>} : vector<2x128xf32>, vector<128x512xf32>, vector<2x512xf32> -> vector<2x512xf32>
    %558 = arith.addf %556, %557 : vector<2x512xf32>
    %559 = vector.extract_strided_slice %558 {offsets = [0, 0], sizes = [2, 128], strides = [1, 1]} : vector<2x512xf32> to vector<2x128xf32>
    %560 = arith.negf %559 : vector<2x128xf32>
    %561 = math.exp %560 : vector<2x128xf32>
    %cst_136 = arith.constant 1.000000e+00 : f32
    %562 = vector.broadcast %cst_136 : f32 to vector<2x128xf32>
    %563 = arith.addf %562, %561 : vector<2x128xf32>
    %564 = arith.divf %562, %563 : vector<2x128xf32>
    %565 = vector.extract_strided_slice %558 {offsets = [0, 128], sizes = [2, 128], strides = [1, 1]} : vector<2x512xf32> to vector<2x128xf32>
    %566 = arith.negf %565 : vector<2x128xf32>
    %567 = math.exp %566 : vector<2x128xf32>
    %cst_137 = arith.constant 1.000000e+00 : f32
    %568 = vector.broadcast %cst_137 : f32 to vector<2x128xf32>
    %569 = arith.addf %568, %567 : vector<2x128xf32>
    %570 = arith.divf %568, %569 : vector<2x128xf32>
    %571 = vector.extract_strided_slice %558 {offsets = [0, 256], sizes = [2, 128], strides = [1, 1]} : vector<2x512xf32> to vector<2x128xf32>
    %572 = math.tanh %571 : vector<2x128xf32>
    %573 = vector.extract_strided_slice %558 {offsets = [0, 384], sizes = [2, 128], strides = [1, 1]} : vector<2x512xf32> to vector<2x128xf32>
    %574 = arith.negf %573 : vector<2x128xf32>
    %575 = math.exp %574 : vector<2x128xf32>
    %cst_138 = arith.constant 1.000000e+00 : f32
    %576 = vector.broadcast %cst_138 : f32 to vector<2x128xf32>
    %577 = arith.addf %576, %575 : vector<2x128xf32>
    %578 = arith.divf %576, %577 : vector<2x128xf32>
    %579 = arith.mulf %570, %494 : vector<2x128xf32>
    %580 = arith.mulf %564, %572 : vector<2x128xf32>
    %581 = arith.addf %579, %580 : vector<2x128xf32>
    %582 = math.tanh %581 : vector<2x128xf32>
    %583 = arith.mulf %578, %582 : vector<2x128xf32>
    %c6_139 = arith.constant 6 : index
    %c0_140 = arith.constant 0 : index
    %c0_141 = arith.constant 0 : index
    %584 = vector.load %arg2[%c6_139, %c0_140, %c0_141] : memref<8x2x512xf32, #tpu.memory_space<vmem>>, vector<1x2x512xf32>
    %585 = vector.shape_cast %584 : vector<1x2x512xf32> to vector<2x512xf32>
    %cst_142 = arith.constant dense<0.000000e+00> : vector<2x512xf32>
    %586 = tpu.matmul %525, %2, %cst_142 {dimension_numbers = #tpu.dot_dimension_numbers<[1], [0], [0], [1], [0, 0, 1, 1], [], []>} : vector<2x128xf32>, vector<128x512xf32>, vector<2x512xf32> -> vector<2x512xf32>
    %587 = arith.addf %585, %586 : vector<2x512xf32>
    %588 = vector.extract_strided_slice %587 {offsets = [0, 0], sizes = [2, 128], strides = [1, 1]} : vector<2x512xf32> to vector<2x128xf32>
    %589 = arith.negf %588 : vector<2x128xf32>
    %590 = math.exp %589 : vector<2x128xf32>
    %cst_143 = arith.constant 1.000000e+00 : f32
    %591 = vector.broadcast %cst_143 : f32 to vector<2x128xf32>
    %592 = arith.addf %591, %590 : vector<2x128xf32>
    %593 = arith.divf %591, %592 : vector<2x128xf32>
    %594 = vector.extract_strided_slice %587 {offsets = [0, 128], sizes = [2, 128], strides = [1, 1]} : vector<2x512xf32> to vector<2x128xf32>
    %595 = arith.negf %594 : vector<2x128xf32>
    %596 = math.exp %595 : vector<2x128xf32>
    %cst_144 = arith.constant 1.000000e+00 : f32
    %597 = vector.broadcast %cst_144 : f32 to vector<2x128xf32>
    %598 = arith.addf %597, %596 : vector<2x128xf32>
    %599 = arith.divf %597, %598 : vector<2x128xf32>
    %600 = vector.extract_strided_slice %587 {offsets = [0, 256], sizes = [2, 128], strides = [1, 1]} : vector<2x512xf32> to vector<2x128xf32>
    %601 = math.tanh %600 : vector<2x128xf32>
    %602 = vector.extract_strided_slice %587 {offsets = [0, 384], sizes = [2, 128], strides = [1, 1]} : vector<2x512xf32> to vector<2x128xf32>
    %603 = arith.negf %602 : vector<2x128xf32>
    %604 = math.exp %603 : vector<2x128xf32>
    %cst_145 = arith.constant 1.000000e+00 : f32
    %605 = vector.broadcast %cst_145 : f32 to vector<2x128xf32>
    %606 = arith.addf %605, %604 : vector<2x128xf32>
    %607 = arith.divf %605, %606 : vector<2x128xf32>
    %608 = arith.mulf %599, %523 : vector<2x128xf32>
    %609 = arith.mulf %593, %601 : vector<2x128xf32>
    %610 = arith.addf %608, %609 : vector<2x128xf32>
    %611 = math.tanh %610 : vector<2x128xf32>
    %612 = arith.mulf %607, %611 : vector<2x128xf32>
    %c7 = arith.constant 7 : index
    %c0_146 = arith.constant 0 : index
    %c0_147 = arith.constant 0 : index
    %613 = vector.load %arg0[%c7, %c0_146, %c0_147] : memref<8x2x512xf32, #tpu.memory_space<vmem>>, vector<1x2x512xf32>
    %614 = vector.shape_cast %613 : vector<1x2x512xf32> to vector<2x512xf32>
    %cst_148 = arith.constant dense<0.000000e+00> : vector<2x512xf32>
    %615 = tpu.matmul %554, %0, %cst_148 {dimension_numbers = #tpu.dot_dimension_numbers<[1], [0], [0], [1], [0, 0, 1, 1], [], []>} : vector<2x128xf32>, vector<128x512xf32>, vector<2x512xf32> -> vector<2x512xf32>
    %616 = arith.addf %614, %615 : vector<2x512xf32>
    %617 = vector.extract_strided_slice %616 {offsets = [0, 0], sizes = [2, 128], strides = [1, 1]} : vector<2x512xf32> to vector<2x128xf32>
    %618 = arith.negf %617 : vector<2x128xf32>
    %619 = math.exp %618 : vector<2x128xf32>
    %cst_149 = arith.constant 1.000000e+00 : f32
    %620 = vector.broadcast %cst_149 : f32 to vector<2x128xf32>
    %621 = arith.addf %620, %619 : vector<2x128xf32>
    %622 = arith.divf %620, %621 : vector<2x128xf32>
    %623 = vector.extract_strided_slice %616 {offsets = [0, 128], sizes = [2, 128], strides = [1, 1]} : vector<2x512xf32> to vector<2x128xf32>
    %624 = arith.negf %623 : vector<2x128xf32>
    %625 = math.exp %624 : vector<2x128xf32>
    %cst_150 = arith.constant 1.000000e+00 : f32
    %626 = vector.broadcast %cst_150 : f32 to vector<2x128xf32>
    %627 = arith.addf %626, %625 : vector<2x128xf32>
    %628 = arith.divf %626, %627 : vector<2x128xf32>
    %629 = vector.extract_strided_slice %616 {offsets = [0, 256], sizes = [2, 128], strides = [1, 1]} : vector<2x512xf32> to vector<2x128xf32>
    %630 = math.tanh %629 : vector<2x128xf32>
    %631 = vector.extract_strided_slice %616 {offsets = [0, 384], sizes = [2, 128], strides = [1, 1]} : vector<2x512xf32> to vector<2x128xf32>
    %632 = arith.negf %631 : vector<2x128xf32>
    %633 = math.exp %632 : vector<2x128xf32>
    %cst_151 = arith.constant 1.000000e+00 : f32
    %634 = vector.broadcast %cst_151 : f32 to vector<2x128xf32>
    %635 = arith.addf %634, %633 : vector<2x128xf32>
    %636 = arith.divf %634, %635 : vector<2x128xf32>
    %637 = arith.mulf %628, %552 : vector<2x128xf32>
    %638 = arith.mulf %622, %630 : vector<2x128xf32>
    %639 = arith.addf %637, %638 : vector<2x128xf32>
    %640 = math.tanh %639 : vector<2x128xf32>
    %641 = arith.mulf %636, %640 : vector<2x128xf32>
    %c7_152 = arith.constant 7 : index
    %c0_153 = arith.constant 0 : index
    %c0_154 = arith.constant 0 : index
    %642 = vector.load %arg1[%c7_152, %c0_153, %c0_154] : memref<8x2x512xf32, #tpu.memory_space<vmem>>, vector<1x2x512xf32>
    %643 = vector.shape_cast %642 : vector<1x2x512xf32> to vector<2x512xf32>
    %cst_155 = arith.constant dense<0.000000e+00> : vector<2x512xf32>
    %644 = tpu.matmul %583, %1, %cst_155 {dimension_numbers = #tpu.dot_dimension_numbers<[1], [0], [0], [1], [0, 0, 1, 1], [], []>} : vector<2x128xf32>, vector<128x512xf32>, vector<2x512xf32> -> vector<2x512xf32>
    %645 = arith.addf %643, %644 : vector<2x512xf32>
    %646 = vector.extract_strided_slice %645 {offsets = [0, 0], sizes = [2, 128], strides = [1, 1]} : vector<2x512xf32> to vector<2x128xf32>
    %647 = arith.negf %646 : vector<2x128xf32>
    %648 = math.exp %647 : vector<2x128xf32>
    %cst_156 = arith.constant 1.000000e+00 : f32
    %649 = vector.broadcast %cst_156 : f32 to vector<2x128xf32>
    %650 = arith.addf %649, %648 : vector<2x128xf32>
    %651 = arith.divf %649, %650 : vector<2x128xf32>
    %652 = vector.extract_strided_slice %645 {offsets = [0, 128], sizes = [2, 128], strides = [1, 1]} : vector<2x512xf32> to vector<2x128xf32>
    %653 = arith.negf %652 : vector<2x128xf32>
    %654 = math.exp %653 : vector<2x128xf32>
    %cst_157 = arith.constant 1.000000e+00 : f32
    %655 = vector.broadcast %cst_157 : f32 to vector<2x128xf32>
    %656 = arith.addf %655, %654 : vector<2x128xf32>
    %657 = arith.divf %655, %656 : vector<2x128xf32>
    %658 = vector.extract_strided_slice %645 {offsets = [0, 256], sizes = [2, 128], strides = [1, 1]} : vector<2x512xf32> to vector<2x128xf32>
    %659 = math.tanh %658 : vector<2x128xf32>
    %660 = vector.extract_strided_slice %645 {offsets = [0, 384], sizes = [2, 128], strides = [1, 1]} : vector<2x512xf32> to vector<2x128xf32>
    %661 = arith.negf %660 : vector<2x128xf32>
    %662 = math.exp %661 : vector<2x128xf32>
    %cst_158 = arith.constant 1.000000e+00 : f32
    %663 = vector.broadcast %cst_158 : f32 to vector<2x128xf32>
    %664 = arith.addf %663, %662 : vector<2x128xf32>
    %665 = arith.divf %663, %664 : vector<2x128xf32>
    %666 = arith.mulf %657, %581 : vector<2x128xf32>
    %667 = arith.mulf %651, %659 : vector<2x128xf32>
    %668 = arith.addf %666, %667 : vector<2x128xf32>
    %669 = math.tanh %668 : vector<2x128xf32>
    %670 = arith.mulf %665, %669 : vector<2x128xf32>
    %c7_159 = arith.constant 7 : index
    %c0_160 = arith.constant 0 : index
    %c0_161 = arith.constant 0 : index
    %671 = vector.load %arg2[%c7_159, %c0_160, %c0_161] : memref<8x2x512xf32, #tpu.memory_space<vmem>>, vector<1x2x512xf32>
    %672 = vector.shape_cast %671 : vector<1x2x512xf32> to vector<2x512xf32>
    %cst_162 = arith.constant dense<0.000000e+00> : vector<2x512xf32>
    %673 = tpu.matmul %612, %2, %cst_162 {dimension_numbers = #tpu.dot_dimension_numbers<[1], [0], [0], [1], [0, 0, 1, 1], [], []>} : vector<2x128xf32>, vector<128x512xf32>, vector<2x512xf32> -> vector<2x512xf32>
    %674 = arith.addf %672, %673 : vector<2x512xf32>
    %675 = vector.extract_strided_slice %674 {offsets = [0, 0], sizes = [2, 128], strides = [1, 1]} : vector<2x512xf32> to vector<2x128xf32>
    %676 = arith.negf %675 : vector<2x128xf32>
    %677 = math.exp %676 : vector<2x128xf32>
    %cst_163 = arith.constant 1.000000e+00 : f32
    %678 = vector.broadcast %cst_163 : f32 to vector<2x128xf32>
    %679 = arith.addf %678, %677 : vector<2x128xf32>
    %680 = arith.divf %678, %679 : vector<2x128xf32>
    %681 = vector.extract_strided_slice %674 {offsets = [0, 128], sizes = [2, 128], strides = [1, 1]} : vector<2x512xf32> to vector<2x128xf32>
    %682 = arith.negf %681 : vector<2x128xf32>
    %683 = math.exp %682 : vector<2x128xf32>
    %cst_164 = arith.constant 1.000000e+00 : f32
    %684 = vector.broadcast %cst_164 : f32 to vector<2x128xf32>
    %685 = arith.addf %684, %683 : vector<2x128xf32>
    %686 = arith.divf %684, %685 : vector<2x128xf32>
    %687 = vector.extract_strided_slice %674 {offsets = [0, 256], sizes = [2, 128], strides = [1, 1]} : vector<2x512xf32> to vector<2x128xf32>
    %688 = math.tanh %687 : vector<2x128xf32>
    %689 = vector.extract_strided_slice %674 {offsets = [0, 384], sizes = [2, 128], strides = [1, 1]} : vector<2x512xf32> to vector<2x128xf32>
    %690 = arith.negf %689 : vector<2x128xf32>
    %691 = math.exp %690 : vector<2x128xf32>
    %cst_165 = arith.constant 1.000000e+00 : f32
    %692 = vector.broadcast %cst_165 : f32 to vector<2x128xf32>
    %693 = arith.addf %692, %691 : vector<2x128xf32>
    %694 = arith.divf %692, %693 : vector<2x128xf32>
    %695 = arith.mulf %686, %610 : vector<2x128xf32>
    %696 = arith.mulf %680, %688 : vector<2x128xf32>
    %697 = arith.addf %695, %696 : vector<2x128xf32>
    %698 = math.tanh %697 : vector<2x128xf32>
    %699 = arith.mulf %694, %698 : vector<2x128xf32>
    %700 = tpu.concatenate %641, %670, %699 in 1 : vector<2x128xf32>, vector<2x128xf32>, vector<2x128xf32> -> vector<2x384xf32>
    %c0_166 = arith.constant 0 : index
    %c0_167 = arith.constant 0 : index
    %701 = vector.load %arg6[%c0_166, %c0_167] : memref<384x128xf32, #tpu.memory_space<vmem>>, vector<384x128xf32>
    %cst_168 = arith.constant dense<0.000000e+00> : vector<2x128xf32>
    %702 = tpu.matmul %700, %701, %cst_168 {dimension_numbers = #tpu.dot_dimension_numbers<[1], [0], [0], [1], [0, 0, 1, 1], [], []>} : vector<2x384xf32>, vector<384x128xf32>, vector<2x128xf32> -> vector<2x128xf32>
    %c0_169 = arith.constant 0 : index
    %c0_170 = arith.constant 0 : index
    %703 = vector.load %arg7[%c0_169, %c0_170] : memref<1x128xf32, #tpu.memory_space<vmem>>, vector<1x128xf32>
    %704 = vector.broadcast %703 : vector<1x128xf32> to vector<2x128xf32>
    %705 = arith.addf %702, %704 : vector<2x128xf32>
    %cst_171 = arith.constant 0.000000e+00 : f32
    %706 = vector.broadcast %cst_171 : f32 to vector<2x128xf32>
    %707 = arith.maximumf %705, %706 : vector<2x128xf32>
    %c0_172 = arith.constant 0 : index
    %c0_173 = arith.constant 0 : index
    %708 = vector.load %arg8[%c0_172, %c0_173] : memref<128x256xf32, #tpu.memory_space<vmem>>, vector<128x256xf32>
    %cst_174 = arith.constant dense<0.000000e+00> : vector<2x256xf32>
    %709 = tpu.matmul %707, %708, %cst_174 {dimension_numbers = #tpu.dot_dimension_numbers<[1], [0], [0], [1], [0, 0, 1, 1], [], []>} : vector<2x128xf32>, vector<128x256xf32>, vector<2x256xf32> -> vector<2x256xf32>
    %c0_175 = arith.constant 0 : index
    %c0_176 = arith.constant 0 : index
    %710 = vector.load %arg9[%c0_175, %c0_176] : memref<1x256xf32, #tpu.memory_space<vmem>>, vector<1x256xf32>
    %711 = vector.broadcast %710 : vector<1x256xf32> to vector<2x256xf32>
    %712 = arith.addf %709, %711 : vector<2x256xf32>
    %cst_177 = arith.constant 0.000000e+00 : f32
    %713 = vector.broadcast %cst_177 : f32 to vector<2x256xf32>
    %714 = arith.maximumf %712, %713 : vector<2x256xf32>
    %c0_178 = arith.constant 0 : index
    %c0_179 = arith.constant 0 : index
    %715 = vector.load %arg10[%c0_178, %c0_179] : memref<256x128xf32, #tpu.memory_space<vmem>>, vector<256x128xf32>
    %cst_180 = arith.constant dense<0.000000e+00> : vector<2x128xf32>
    %716 = tpu.matmul %714, %715, %cst_180 {dimension_numbers = #tpu.dot_dimension_numbers<[1], [0], [0], [1], [0, 0, 1, 1], [], []>} : vector<2x256xf32>, vector<256x128xf32>, vector<2x128xf32> -> vector<2x128xf32>
    %c0_181 = arith.constant 0 : index
    %c0_182 = arith.constant 0 : index
    %717 = vector.load %arg11[%c0_181, %c0_182] : memref<1x128xf32, #tpu.memory_space<vmem>>, vector<1x128xf32>
    %718 = vector.broadcast %717 : vector<1x128xf32> to vector<2x128xf32>
    %719 = arith.addf %716, %718 : vector<2x128xf32>
    %c0_183 = arith.constant 0 : index
    %c0_184 = arith.constant 0 : index
    %720 = vector.load %arg12[%c0_183, %c0_184] : memref<2x128xf32, #tpu.memory_space<vmem>>, vector<2x128xf32>
    tpu.vector_store %arg12[%c0_183, %c0_184], %719 {strides = array<i32>} : memref<2x128xf32, #tpu.memory_space<vmem>>, vector<2x128xf32>,
    return
  }
}

</mosaic_0001>

<bundles_post_ra>
// kernel: acnet_forward.1
= control target key start
LH: loop header
LB: loop body
LE: loop exit
PB: predicated region body
PF: predicated region fallthrough
CT: control target
= control target key end

     0   :  { %17 = vsyncpa [#allocation3], 0  ;;  %s9812_s0 = inlined_call_operand.vmem [shape: f32[8,2,512], index: 0, kind: input, shape index: {}]   ;;  %s9813_s1 = inlined_call_operand.vmem [shape: f32[8,2,512], index: 1, kind: input, shape index: {}]   ;;  %s9814_s2 = inlined_call_operand.vmem [shape: f32[8,2,512], index: 2, kind: input, shape index: {}]   ;;  %s9815_s3 = inlined_call_operand.vmem [shape: f32[128,512], index: 3, kind: input, shape index: {}]   ;;  %s9816_s4 = inlined_call_operand.vmem [shape: f32[128,512], index: 4, kind: input, shape index: {}]   ;;  %s9817_s5 = inlined_call_operand.vmem [shape: f32[128,512], index: 5, kind: input, shape index: {}]   ;;  %s9818_s6 = inlined_call_operand.vmem [shape: f32[384,128], index: 6, kind: input, shape index: {}]   ;;  %s9819_s7 = inlined_call_operand.vmem [shape: f32[1,128], index: 7, kind: input, shape index: {}]   ;;  %s9820_s8 = inlined_call_operand.hbm [shape: f32[128,256], index: 8, kind: input, shape index: {}]   ;;  %s9821_s9 = inlined_call_operand.vmem [shape: f32[1,256], index: 9, kind: input, shape index: {}]   ;;  %s9822_s10 = inlined_call_operand.hbm [shape: f32[256,128], index: 10, kind: input, shape index: {}]   ;;  %s9823_s11 = inlined_call_operand.vmem [shape: f32[1,128], index: 11, kind: input, shape index: {}]   ;;  %s9824_s12 = inlined_call_operand.vmem [shape: f32[2,128], index: 12, kind: output, shape index: {}]  }
   0x1   :  { %18 = vsyncpa [#allocation5], 0  ;;  %s7754_s21 = smov [#allocation2]   ;;  %s7706_s25 = scalar_lea.hbm %s9820_s8, 4096 }
   0x2   :  { %s40_s22 = sshll.u32 %s7754_s21, 4  ;;  %p7707_p0 = scmp.ne.s32.totalorder %s9820_s8, %s7706_s25  ;;  %s41_s22 = int_to_ptr.vmem [resolvable:$true] %s40_s22 }
   0x3   :  { %p7710_p1 = scmp.lt.u32.totalorder %s7706_s25, %s9820_s8 }
   0x5   :  { %p7712_p2 = pnand %p7710_p1, %p7707_p0 }
   0x7   :  { %7715 = shalt.err (!%p7712_p2)
}
   0x8   :  { %s7716_s30 = scalar_lea.vmem %s41_s22, 4096  ;;  %p7721_p4 = scmp.lt.s32.totalorder %s41_s22, %s41_s22 }
   0x9   :  { %p7717_p3 = scmp.ne.s32.totalorder %s41_s22, %s7716_s30  ;;  %p7722_p5 = scmp.lt.s32.totalorder %s7716_s30, %s7716_s30 }
   0xb   :  { %p7723_p6 = por %p7722_p5, %p7721_p4 }
   0xd   :  { %p7724_p7 = pnand %p7723_p6, %p7717_p3 }
   0xf   :  { %7727 = shalt.err (!%p7724_p7)
}
  0x10   :  { %s7755_s13 = smov 256   ;;  %s7756_s14 = smov 16  }
  0x11   :  { %46 = dma.hbm_to_vmem [thread:$0]  %s9820_s8, 4096, %s41_s22, [#allocation3], %s7755_s13, %s7755_s13, %s7756_s14  }
  0x12   :  { %s7757_s17 = smov [#allocation4]   ;;  %s7728_s21 = scalar_lea.hbm %s9822_s10, 4096 }
  0x13   :  { %s54_s18 = sshll.u32 %s7757_s17, 4  ;;  %p7729_p8 = scmp.ne.s32.totalorder %s9822_s10, %s7728_s21  ;;  %s55_s18 = int_to_ptr.vmem [resolvable:$true] %s54_s18 }
  0x14   :  { %p7732_p9 = scmp.lt.u32.totalorder %s7728_s21, %s9822_s10 }
  0x16   :  { %p7734_p10 = pnand %p7732_p9, %p7729_p8 }
  0x18   :  { %7737 = shalt.err (!%p7734_p10)
}
  0x19   :  { %s7738_s27 = scalar_lea.vmem %s55_s18, 4096  ;;  %p7743_p12 = scmp.lt.s32.totalorder %s55_s18, %s55_s18 }
  0x1a   :  { %p7739_p11 = scmp.ne.s32.totalorder %s55_s18, %s7738_s27  ;;  %p7744_p13 = scmp.lt.s32.totalorder %s7738_s27, %s7738_s27 }
  0x1c   :  { %p7745_p0 = por %p7744_p13, %p7743_p12 }
  0x1e   :  { %p7746_p1 = pnand %p7745_p0, %p7739_p11 }
  0x20   :  { %7749 = shalt.err (!%p7746_p1)
}
  0x21   :  { %s7758_s8 = smov 128   ;;  %s7759_s22 = smov 8  }
  0x22   :  { %60 = dma.hbm_to_vmem [thread:$0]  %s9822_s10, 4096, %s55_s18, [#allocation5], %s7758_s8, %s7758_s8, %s7759_s22  }
  0x23   :  { %7750 = dma.done.wait [#allocation3], 4096  }
  0x24   :  { %7751 = vsyncadd [#allocation3], 4294963200 }
  0x25   :  { %7752 = dma.done.wait [#allocation5], 4096  }
  0x26   :  { %7753 = vsyncadd [#allocation5], 4294963200  ;;  %v9825_v0 = vmov 0.0   ;;  %v70_v1 = vld [vmem:[%s9815_s3 + $0x8] sm:$0xff]  ;;  %v72_v3 = vld [vmem:[%s9815_s3 + $0x18] sm:$0xff]  ;;  %vm7763_vm0 = vmmov 0  }
  0x27   :  { %326 = vmatprep.mubr.f32.mxu0 %v9825_v0  ;;  %397 = vmatprep.mubr.f32.mxu1 %v9825_v0  ;;  %v74_v2 = vld [vmem:[%s9815_s3 + $0x28] sm:$0xff]  ;;  %v76_v5 = vld [vmem:[%s9815_s3 + $0x38] sm:$0xff]  ;;  %v69_v6 = vld [vmem:[%s9815_s3] sm:$0xff] }
  0x28   :  { %v7864_v4 = vpack.c.bf16 %v74_v2, %v70_v1  ;;  %v73_v7 = vld [vmem:[%s9815_s3 + $0x20] sm:$0xff]  ;;  %v7875_v8 = vpack.c.bf16 %v76_v5, %v72_v3  ;;  %v71_v10 = vld [vmem:[%s9815_s3 + $0x10] sm:$0xff]  ;;  %v78_v12 = vld [vmem:[%s9815_s3 + $0x48] sm:$0xff] }
  0x29   :  { %v7877_v9 = vpack.c.bf16 %v73_v7, %v69_v6  ;;  %v75_v11 = vld [vmem:[%s9815_s3 + $0x30] sm:$0xff]  ;;  %v82_v14 = vld [vmem:[%s9815_s3 + $0x68] sm:$0xff]  ;;  %v80_v15 = vld [vmem:[%s9815_s3 + $0x58] sm:$0xff] }
  0x2a   :  { %10013 = vst [vmem:[#allocation8_spill] sm:$0xff] %v7864_v4  ;;  %10014 = vst [vmem:[#allocation9_spill] sm:$0xff] %v7875_v8  ;;  %5657 = vmatprep.subr.bf16.mxu0 %v7864_v4  ;;  %v7889_v13 = vpack.c.bf16 %v75_v11, %v71_v10  ;;  %v84_v16 = vld [vmem:[%s9815_s3 + $0x78] sm:$0xff]  ;;  %5689 = vmatprep.subr.bf16.mxu1 %v7875_v8  ;;  %v7902_v17 = vpack.c.bf16 %v82_v14, %v78_v12  ;;  %v77_v19 = vld [vmem:[%s9815_s3 + $0x40] sm:$0xff] }
  0x2b   :  { %10015 = vst [vmem:[#allocation10_spill] sm:$0xff] %v7877_v9  ;;  %5659 = vmatpush1.bf16.msra.mxu0 %v7877_v9  ;;  %v7904_v18 = vpack.c.bf16 %v84_v16, %v80_v15  ;;  %v81_v20 = vld [vmem:[%s9815_s3 + $0x60] sm:$0xff]  ;;  %v79_v21 = vld [vmem:[%s9815_s3 + $0x50] sm:$0xff]  ;;  %v86_v24 = vld [vmem:[%s9815_s3 + $0x88] sm:$0xff] }
  0x2c   :  { %10016 = vst [vmem:[#allocation11_spill] sm:$0xff] %v7889_v13  ;;  %10017 = vst [vmem:[#allocation12_spill] sm:$0xff] %v7902_v17  ;;  %5691 = vmatpush1.bf16.msra.mxu1 %v7889_v13  ;;  %v7916_v22 = vpack.c.bf16 %v81_v20, %v77_v19  ;;  %v83_v23 = vld [vmem:[%s9815_s3 + $0x70] sm:$0xff]  ;;  %v90_v25 = vld [vmem:[%s9815_s3 + $0xa8] sm:$0xff]  ;;  %5661 = vmatprep.subr.bf16.mxu0 %v7902_v17 }
  0x2d   :  { %10018 = vst [vmem:[#allocation13_spill] sm:$0xff] %v7904_v18  ;;  %5693 = vmatprep.subr.bf16.mxu1 %v7904_v18  ;;  %v7929_v26 = vpack.c.bf16 %v83_v23, %v79_v21  ;;  %v7931_v27 = vpack.c.bf16 %v90_v25, %v86_v24  ;;  %v88_v28 = vld [vmem:[%s9815_s3 + $0x98] sm:$0xff]  ;;  %v85_v30 = vld [vmem:[%s9815_s3 + $0x80] sm:$0xff]  ;;  %v87_v33 = vld [vmem:[%s9815_s3 + $0x90] sm:$0xff] }
  0x2e   :  { %10019 = vst [vmem:[#allocation14_spill] sm:$0xff] %v7916_v22  ;;  %v92_v29 = vld [vmem:[%s9815_s3 + $0xb8] sm:$0xff]  ;;  %v89_v32 = vld [vmem:[%s9815_s3 + $0xa0] sm:$0xff]  ;;  %v91_v34 = vld [vmem:[%s9815_s3 + $0xb0] sm:$0xff] }
  0x2f   :  { %10020 = vst [vmem:[#allocation15_spill] sm:$0xff] %v7929_v26  ;;  %10021 = vst [vmem:[#allocation16_spill] sm:$0xff] %v7931_v27  ;;  %v7942_v31 = vpack.c.bf16 %v92_v29, %v88_v28  ;;  %5663 = vmatpush1.bf16.msra.mxu0 %v7916_v22  ;;  %v7954_v35 = vpack.c.bf16 %v89_v32, %v85_v30  ;;  %v94_v36 = vld [vmem:[%s9815_s3 + $0xc8] sm:$0xff]  ;;  %v96_v38 = vld [vmem:[%s9815_s3 + $0xd8] sm:$0xff]  ;;  %v7967_v39 = vpack.c.bf16 %v91_v34, %v87_v33 }
  0x30   :  { %v98_v37 = vld [vmem:[%s9815_s3 + $0xe8] sm:$0xff]  ;;  %5695 = vmatpush1.bf16.msra.mxu1 %v7929_v26  ;;  %5665 = vmatprep.subr.bf16.mxu0 %v7931_v27  ;;  %v100_v41 = vld [vmem:[%s9815_s3 + $0xf8] sm:$0xff]  ;;  %v93_v42 = vld [vmem:[%s9815_s3 + $0xc0] sm:$0xff] }
  0x31   :  { %10022 = vst [vmem:[#allocation17_spill] sm:$0xff] %v7942_v31  ;;  %10023 = vst [vmem:[#allocation18_spill] sm:$0xff] %v7954_v35  ;;  %v7969_v40 = vpack.c.bf16 %v98_v37, %v94_v36  ;;  %v97_v43 = vld [vmem:[%s9815_s3 + $0xe0] sm:$0xff]  ;;  %5697 = vmatprep.subr.bf16.mxu1 %v7942_v31  ;;  %v7981_v44 = vpack.c.bf16 %v100_v41, %v96_v38  ;;  %v95_v45 = vld [vmem:[%s9815_s3 + $0xd0] sm:$0xff] }
  0x32   :  { %10024 = vst [vmem:[#allocation19_spill] sm:$0xff] %v7967_v39  ;;  %v99_v46 = vld [vmem:[%s9815_s3 + $0xf0] sm:$0xff]  ;;  %v102_v47 = vld [vmem:[%s9815_s3 + $0x108] sm:$0xff]  ;;  %v104_v49 = vld [vmem:[%s9815_s3 + $0x118] sm:$0xff]  ;;  %v8002_v51 = vpack.c.bf16 %v97_v43, %v93_v42 }
  0x33   :  { %10025 = vst [vmem:[#allocation20_spill] sm:$0xff] %v7969_v40  ;;  %10026 = vst [vmem:[#allocation21_spill] sm:$0xff] %v7981_v44  ;;  %v106_v48 = vld [vmem:[%s9815_s3 + $0x128] sm:$0xff]  ;;  %v108_v50 = vld [vmem:[%s9815_s3 + $0x138] sm:$0xff]  ;;  %5667 = vmatpush1.bf16.msra.mxu0 %v7954_v35  ;;  %v8006_v52 = vpack.c.bf16 %v99_v46, %v95_v45 }
  0x34   :  { %10027 = vst [vmem:[#allocation22_spill] sm:$0xff] %v8002_v51  ;;  %5699 = vmatpush1.bf16.msra.mxu1 %v7967_v39  ;;  %5669 = vmatprep.subr.bf16.mxu0 %v7969_v40  ;;  %v8008_v53 = vpack.c.bf16 %v106_v48, %v102_v47  ;;  %v101_v54 = vld [vmem:[%s9815_s3 + $0x100] sm:$0xff]  ;;  %v103_v56 = vld [vmem:[%s9815_s3 + $0x110] sm:$0xff]  ;;  %v8020_v57 = vpack.c.bf16 %v108_v50, %v104_v49  ;;  %v110_v59 = vld [vmem:[%s9815_s3 + $0x148] sm:$0xff] }
  0x35   :  { %10028 = vst [vmem:[#allocation23_spill] sm:$0xff] %v8006_v52  ;;  %v105_v55 = vld [vmem:[%s9815_s3 + $0x120] sm:$0xff]  ;;  %5701 = vmatprep.subr.bf16.mxu1 %v7981_v44  ;;  %v107_v58 = vld [vmem:[%s9815_s3 + $0x130] sm:$0xff]  ;;  %v114_v60 = vld [vmem:[%s9815_s3 + $0x168] sm:$0xff] }
  0x36   :  { %10029 = vst [vmem:[#allocation24_spill] sm:$0xff] %v8008_v53  ;;  %10030 = vst [vmem:[#allocation25_spill] sm:$0xff] %v8020_v57  ;;  %v112_v61 = vld [vmem:[%s9815_s3 + $0x158] sm:$0xff]  ;;  %v8038_v63 = vpack.c.bf16 %v105_v55, %v101_v54  ;;  %v8042_v1 = vpack.c.bf16 %v107_v58, %v103_v56  ;;  %v8044_v2 = vpack.c.bf16 %v114_v60, %v110_v59  ;;  %v109_v3 = vld [vmem:[%s9815_s3 + $0x140] sm:$0xff] }
  0x37   :  { %v116_v62 = vld [vmem:[%s9815_s3 + $0x178] sm:$0xff]  ;;  %5671 = vmatpush1.bf16.msra.mxu0 %v8002_v51  ;;  %v113_v5 = vld [vmem:[%s9815_s3 + $0x160] sm:$0xff]  ;;  %v111_v6 = vld [vmem:[%s9815_s3 + $0x150] sm:$0xff] }
  0x38   :  { %10031 = vst [vmem:[#allocation26_spill] sm:$0xff] %v8038_v63  ;;  %5703 = vmatpush1.bf16.msra.mxu1 %v8006_v52  ;;  %5673 = vmatprep.subr.bf16.mxu0 %v8008_v53  ;;  %10032 = vst [vmem:[#allocation27_spill] sm:$0xff] %v8042_v1  ;;  %v8056_v7 = vpack.c.bf16 %v116_v62, %v112_v61  ;;  %v115_v10 = vld [vmem:[%s9815_s3 + $0x170] sm:$0xff]  ;;  %v118_v11 = vld [vmem:[%s9815_s3 + $0x188] sm:$0xff]  ;;  %v8074_v16 = vpack.c.bf16 %v113_v5, %v109_v3 }
  0x39   :  { %10033 = vst [vmem:[#allocation28_spill] sm:$0xff] %v8044_v2  ;;  %5705 = vmatprep.subr.bf16.mxu1 %v8020_v57  ;;  %v122_v12 = vld [vmem:[%s9815_s3 + $0x1a8] sm:$0xff]  ;;  %v120_v14 = vld [vmem:[%s9815_s3 + $0x198] sm:$0xff]  ;;  %v8078_v19 = vpack.c.bf16 %v115_v10, %v111_v6  ;;  %v117_v21 = vld [vmem:[%s9815_s3 + $0x180] sm:$0xff] }
  0x3a   :  { %10034 = vst [vmem:[#allocation29_spill] sm:$0xff] %v8056_v7  ;;  %v124_v15 = vld [vmem:[%s9815_s3 + $0x1b8] sm:$0xff]  ;;  %10035 = vst [vmem:[#allocation30_spill] sm:$0xff] %v8074_v16  ;;  %v8080_v20 = vpack.c.bf16 %v122_v12, %v118_v11  ;;  %v121_v23 = vld [vmem:[%s9815_s3 + $0x1a0] sm:$0xff] }
  0x3b   :  { %5675 = vmatpush1.bf16.msra.mxu0 %v8038_v63  ;;  %10036 = vst [vmem:[#allocation31_spill] sm:$0xff] %v8078_v19  ;;  %v119_v24 = vld [vmem:[%s9815_s3 + $0x190] sm:$0xff]  ;;  %v8092_v25 = vpack.c.bf16 %v124_v15, %v120_v14  ;;  %v126_v29 = vld [vmem:[%s9815_s3 + $0x1c8] sm:$0xff]  ;;  %v128_v32 = vld [vmem:[%s9815_s3 + $0x1d8] sm:$0xff]  ;;  %v8110_v34 = vpack.c.bf16 %v121_v23, %v117_v21 }
  0x3c   :  { %5707 = vmatpush1.bf16.msra.mxu1 %v8042_v1  ;;  %5677 = vmatprep.subr.bf16.mxu0 %v8044_v2  ;;  %10037 = vst [vmem:[#allocation32_spill] sm:$0xff] %v8080_v20  ;;  %v123_v28 = vld [vmem:[%s9815_s3 + $0x1b0] sm:$0xff]  ;;  %v130_v30 = vld [vmem:[%s9815_s3 + $0x1e8] sm:$0xff]  ;;  %v132_v33 = vld [vmem:[%s9815_s3 + $0x1f8] sm:$0xff] }
  0x3d   :  { %5709 = vmatprep.subr.bf16.mxu1 %v8056_v7  ;;  %10038 = vst [vmem:[#allocation33_spill] sm:$0xff] %v8092_v25  ;;  %10039 = vst [vmem:[#allocation34_spill] sm:$0xff] %v8110_v34  ;;  %v8114_v36 = vpack.c.bf16 %v123_v28, %v119_v24  ;;  %v8116_v37 = vpack.c.bf16 %v130_v30, %v126_v29  ;;  %v125_v38 = vld [vmem:[%s9815_s3 + $0x1c0] sm:$0xff]  ;;  %v127_v42 = vld [vmem:[%s9815_s3 + $0x1d0] sm:$0xff]  ;;  %v8128_v43 = vpack.c.bf16 %v132_v33, %v128_v32 }
  0x3e   :  { %v129_v41 = vld [vmem:[%s9815_s3 + $0x1e0] sm:$0xff]  ;;  %v131_v45 = vld [vmem:[%s9815_s3 + $0x1f0] sm:$0xff]  ;;  %v134_v46 = vld [vmem:[%s9816_s4 + $0x8] sm:$0xff] }
  0x3f   :  { %5679 = vmatpush1.bf16.msra.mxu0 %v8074_v16  ;;  %10040 = vst [vmem:[#allocation35_spill] sm:$0xff] %v8114_v36  ;;  %10041 = vst [vmem:[#allocation36_spill] sm:$0xff] %v8116_v37  ;;  %v138_v47 = vld [vmem:[%s9816_s4 + $0x28] sm:$0xff]  ;;  %v136_v48 = vld [vmem:[%s9816_s4 + $0x18] sm:$0xff]  ;;  %v8146_v50 = vpack.c.bf16 %v129_v41, %v125_v38  ;;  %v8150_v54 = vpack.c.bf16 %v131_v45, %v127_v42 }
  0x40   :  { %5711 = vmatpush1.bf16.msra.mxu1 %v8078_v19  ;;  %5681 = vmatprep.subr.bf16.mxu0 %v8080_v20  ;;  %10042 = vst [vmem:[#allocation37_spill] sm:$0xff] %v8128_v43  ;;  %v140_v49 = vld [vmem:[%s9816_s4 + $0x38] sm:$0xff]  ;;  %v8152_v55 = vpack.c.bf16 %v138_v47, %v134_v46  ;;  %v133_v56 = vld [vmem:[%s9816_s4] sm:$0xff]  ;;  %v135_v59 = vld [vmem:[%s9816_s4 + $0x10] sm:$0xff] }
  0x41   :  { %5713 = vmatprep.subr.bf16.mxu1 %v8092_v25  ;;  %10043 = vst [vmem:[#allocation38_spill] sm:$0xff] %v8146_v50  ;;  %10044 = vst [vmem:[#allocation39_spill] sm:$0xff] %v8150_v54  ;;  %v137_v58 = vld [vmem:[%s9816_s4 + $0x20] sm:$0xff]  ;;  %v8164_v60 = vpack.c.bf16 %v140_v49, %v136_v48  ;;  %v139_v61 = vld [vmem:[%s9816_s4 + $0x30] sm:$0xff] }
  0x42   :  { %10045 = vst [vmem:[#allocation40_spill] sm:$0xff] %v8152_v55  ;;  %v142_v62 = vld [vmem:[%s9816_s4 + $0x48] sm:$0xff]  ;;  %v144_v5 = vld [vmem:[%s9816_s4 + $0x58] sm:$0xff]  ;;  %v8182_v10 = vpack.c.bf16 %v137_v58, %v133_v56  ;;  %v8186_v11 = vpack.c.bf16 %v139_v61, %v135_v59  ;;  %v141_v14 = vld [vmem:[%s9816_s4 + $0x40] sm:$0xff] }
  0x43   :  { %5683 = vmatpush1.bf16.msra.mxu0 %v8110_v34  ;;  %10046 = vst [vmem:[#allocation41_spill] sm:$0xff] %v8164_v60  ;;  %v146_v3 = vld [vmem:[%s9816_s4 + $0x68] sm:$0xff]  ;;  %v148_v6 = vld [vmem:[%s9816_s4 + $0x78] sm:$0xff]  ;;  %v145_v15 = vld [vmem:[%s9816_s4 + $0x60] sm:$0xff] }
  0x44   :  { %5715 = vmatpush1.bf16.msra.mxu1 %v8114_v36  ;;  %5685 = vmatprep.subr.bf16.mxu0 %v8116_v37  ;;  %v8188_v12 = vpack.c.bf16 %v146_v3, %v142_v62  ;;  %v143_v21 = vld [vmem:[%s9816_s4 + $0x50] sm:$0xff]  ;;  %v8200_v23 = vpack.c.bf16 %v148_v6, %v144_v5  ;;  %v150_v28 = vld [vmem:[%s9816_s4 + $0x88] sm:$0xff]  ;;  %v152_v30 = vld [vmem:[%s9816_s4 + $0x98] sm:$0xff]  ;;  %v8220_v33 = vpack.c.bf16 %v145_v15, %v141_v14 }
  0x45   :  { %5717 = vmatprep.subr.bf16.mxu1 %v8128_v43  ;;  %v147_v24 = vld [vmem:[%s9816_s4 + $0x70] sm:$0xff]  ;;  %v154_v29 = vld [vmem:[%s9816_s4 + $0xa8] sm:$0xff]  ;;  %v156_v32 = vld [vmem:[%s9816_s4 + $0xb8] sm:$0xff] }
  0x46   :  { %v8224_v38 = vpack.c.bf16 %v147_v24, %v143_v21  ;;  %v8226_v41 = vpack.c.bf16 %v154_v29, %v150_v28  ;;  %v149_v42 = vld [vmem:[%s9816_s4 + $0x80] sm:$0xff]  ;;  %v151_v46 = vld [vmem:[%s9816_s4 + $0x90] sm:$0xff]  ;;  %v8238_v47 = vpack.c.bf16 %v156_v32, %v152_v30  ;;  %v158_v49 = vld [vmem:[%s9816_s4 + $0xc8] sm:$0xff] }
  0x47   :  { %5687 = vmatpush1.bf16.msra.mxu0 %v8146_v50  ;;  %v153_v45 = vld [vmem:[%s9816_s4 + $0xa0] sm:$0xff]  ;;  %v155_v48 = vld [vmem:[%s9816_s4 + $0xb0] sm:$0xff]  ;;  %v162_v56 = vld [vmem:[%s9816_s4 + $0xe8] sm:$0xff] }
  0x48   :  { %5719 = vmatpush1.bf16.msra.mxu1 %v8150_v54  ;;  %5721 = vmatprep.subr.bf16.mxu0 %v8152_v55  ;;  %v160_v58 = vld [vmem:[%s9816_s4 + $0xd8] sm:$0xff]  ;;  %v8258_v61 = vpack.c.bf16 %v153_v45, %v149_v42  ;;  %v8262_v62 = vpack.c.bf16 %v155_v48, %v151_v46  ;;  %v8264_v3 = vpack.c.bf16 %v162_v56, %v158_v49  ;;  %v157_v5 = vld [vmem:[%s9816_s4 + $0xc0] sm:$0xff]  ;;  %v159_v14 = vld [vmem:[%s9816_s4 + $0xd0] sm:$0xff] }
  0x49   :  { %5753 = vmatprep.subr.bf16.mxu1 %v8164_v60  ;;  %v164_v59 = vld [vmem:[%s9816_s4 + $0xf8] sm:$0xff]  ;;  %v161_v6 = vld [vmem:[%s9816_s4 + $0xe0] sm:$0xff]  ;;  %v163_v21 = vld [vmem:[%s9816_s4 + $0xf0] sm:$0xff] }
  0x4a   :  { %327 = vmatmul.mubr.f32.vlgmr.msra.gmra.mrb[0].mxu0 %v9825_v0  ;;  %v8276_v15 = vpack.c.bf16 %v164_v59, %v160_v58  ;;  %v166_v24 = vld [vmem:[%s9816_s4 + $0x108] sm:$0xff]  ;;  %v168_v29 = vld [vmem:[%s9816_s4 + $0x118] sm:$0xff]  ;;  %v8294_v32 = vpack.c.bf16 %v161_v6, %v157_v5  ;;  %v8298_v42 = vpack.c.bf16 %v163_v21, %v159_v14  ;;  %v165_v46 = vld [vmem:[%s9816_s4 + $0x100] sm:$0xff] }
  0x4b   :  { %398 = vmatmul.mubr.f32.vlgmr.msra.gmra.mrb[0].mxu1 %v9825_v0  ;;  %5723 = vmatpush1.bf16.msra.mxu0 %v8182_v10  ;;  %v170_v28 = vld [vmem:[%s9816_s4 + $0x128] sm:$0xff]  ;;  %v172_v30 = vld [vmem:[%s9816_s4 + $0x138] sm:$0xff]  ;;  %v169_v48 = vld [vmem:[%s9816_s4 + $0x120] sm:$0xff] }
  0x4c   :  { %5755 = vmatpush1.bf16.msra.mxu1 %v8186_v11  ;;  %5725 = vmatprep.subr.bf16.mxu0 %v8188_v12  ;;  %10047 = vst [vmem:[#allocation42_spill] sm:$0xff] %v8276_v15  ;;  %10048 = vst [vmem:[#allocation43_spill] sm:$0xff] %v8294_v32  ;;  %v8300_v45 = vpack.c.bf16 %v170_v28, %v166_v24  ;;  %v167_v49 = vld [vmem:[%s9816_s4 + $0x110] sm:$0xff]  ;;  %v8312_v56 = vpack.c.bf16 %v172_v30, %v168_v29  ;;  %v174_v59 = vld [vmem:[%s9816_s4 + $0x148] sm:$0xff] }
  0x4d   :  { %5757 = vmatprep.subr.bf16.mxu1 %v8200_v23  ;;  %523 = vmatprep.mubr.f32.mxu0 %v9825_v0  ;;  %10049 = vst [vmem:[#allocation44_spill] sm:$0xff] %v8298_v42  ;;  %v171_v58 = vld [vmem:[%s9816_s4 + $0x130] sm:$0xff]  ;;  %v178_v5 = vld [vmem:[%s9816_s4 + $0x168] sm:$0xff]  ;;  %v176_v6 = vld [vmem:[%s9816_s4 + $0x158] sm:$0xff]  ;;  %v8330_v21 = vpack.c.bf16 %v169_v48, %v165_v46 }
  0x4e   :  { %594 = vmatprep.mubr.f32.mxu1 %v9825_v0  ;;  %10050 = vst [vmem:[#allocation45_spill] sm:$0xff] %v8300_v45  ;;  %10051 = vst [vmem:[#allocation46_spill] sm:$0xff] %v8312_v56  ;;  %v180_v14 = vld [vmem:[%s9816_s4 + $0x178] sm:$0xff]  ;;  %v8334_v24 = vpack.c.bf16 %v171_v58, %v167_v49  ;;  %v8336_v28 = vpack.c.bf16 %v178_v5, %v174_v59  ;;  %v173_v29 = vld [vmem:[%s9816_s4 + $0x140] sm:$0xff] }
  0x4f   :  { %5727 = vmatpush1.bf16.msra.mxu0 %v8220_v33  ;;  %10052 = vst [vmem:[#allocation47_spill] sm:$0xff] %v8330_v21  ;;  %v177_v30 = vld [vmem:[%s9816_s4 + $0x160] sm:$0xff]  ;;  %v175_v46 = vld [vmem:[%s9816_s4 + $0x150] sm:$0xff]  ;;  %v8348_v48 = vpack.c.bf16 %v180_v14, %v176_v6  ;;  %v182_v58 = vld [vmem:[%s9816_s4 + $0x188] sm:$0xff] }
  0x50   :  { %5759 = vmatpush1.bf16.msra.mxu1 %v8224_v38  ;;  %5729 = vmatprep.subr.bf16.mxu0 %v8226_v41  ;;  %10053 = vst [vmem:[#allocation48_spill] sm:$0xff] %v8334_v24  ;;  %10054 = vst [vmem:[#allocation49_spill] sm:$0xff] %v8336_v28  ;;  %v179_v49 = vld [vmem:[%s9816_s4 + $0x170] sm:$0xff]  ;;  %v186_v59 = vld [vmem:[%s9816_s4 + $0x1a8] sm:$0xff]  ;;  %v8366_v14 = vpack.c.bf16 %v177_v30, %v173_v29 }
  0x51   :  { %5761 = vmatprep.subr.bf16.mxu1 %v8238_v47  ;;  %10055 = vst [vmem:[#allocation50_spill] sm:$0xff] %v8348_v48  ;;  %v184_v5 = vld [vmem:[%s9816_s4 + $0x198] sm:$0xff]  ;;  %v8370_v0 = vpack.c.bf16 %v179_v49, %v175_v46  ;;  %v183_v29 = vld [vmem:[%s9816_s4 + $0x190] sm:$0xff]  ;;  %v190_v49 = vld [vmem:[%s9816_s4 + $0x1c8] sm:$0xff] }
  0x52   :  { %v188_v6 = vld [vmem:[%s9816_s4 + $0x1b8] sm:$0xff]  ;;  %10056 = vst [vmem:[#allocation51_spill] sm:$0xff] %v8366_v14  ;;  %v187_v46 = vld [vmem:[%s9816_s4 + $0x1b0] sm:$0xff] }
  0x53   :  { %5731 = vmatpush1.bf16.msra.mxu0 %v8258_v61  ;;  %10057 = vst [vmem:[#allocation52_spill] sm:$0xff] %v8370_v0  ;;  %v8384_v30 = vpack.c.bf16 %v188_v6, %v184_v5  ;;  %v196_v5 = vld [vmem:[%s9816_s4 + $0x1f8] sm:$0xff] }
  0x54   :  { %5763 = vmatpush1.bf16.msra.mxu1 %v8262_v62  ;;  %5733 = vmatprep.subr.bf16.mxu0 %v8264_v3 }
  0x55   :  { %5765 = vmatprep.subr.bf16.mxu1 %v8276_v15  ;;  %10059 = vst [vmem:[#allocation54_spill] sm:$0xff] %v8384_v30 }
  0x57   :  { %5735 = vmatpush1.bf16.msra.mxu0 %v8294_v32  ;;  %v217_v32 = vld [vmem:[%s9817_s5 + $0xa0] sm:$0xff] }
  0x58   :  { %5767 = vmatpush1.bf16.msra.mxu1 %v8298_v42  ;;  %5737 = vmatprep.subr.bf16.mxu0 %v8300_v45  ;;  %v181_v45 = vld [vmem:[%s9816_s4 + $0x180] sm:$0xff] }
  0x59   :  { %5769 = vmatprep.subr.bf16.mxu1 %v8312_v56  ;;  %v8372_v56 = vpack.c.bf16 %v186_v59, %v182_v58  ;;  %v185_v42 = vld [vmem:[%s9816_s4 + $0x1a0] sm:$0xff]  ;;  %v194_v58 = vld [vmem:[%s9816_s4 + $0x1e8] sm:$0xff]  ;;  %v192_v59 = vld [vmem:[%s9816_s4 + $0x1d8] sm:$0xff] }
  0x5a   :  { %v8402_v6 = vpack.c.bf16 %v185_v42, %v181_v45  ;;  %v191_v42 = vld [vmem:[%s9816_s4 + $0x1d0] sm:$0xff]  ;;  %v8420_v45 = vpack.c.bf16 %v196_v5, %v192_v59  ;;  %v204_v59 = vld [vmem:[%s9817_s5 + $0x38] sm:$0xff] }
  0x5b   :  { %5739 = vmatpush1.bf16.msra.mxu0 %v8330_v21  ;;  %10058 = vst [vmem:[#allocation53_spill] sm:$0xff] %v8372_v56  ;;  %v193_v21 = vld [vmem:[%s9816_s4 + $0x1e0] sm:$0xff] }
  0x5c   :  { %5771 = vmatpush1.bf16.msra.mxu1 %v8334_v24  ;;  %5741 = vmatprep.subr.bf16.mxu0 %v8336_v28  ;;  %10060 = vst [vmem:[#allocation55_spill] sm:$0xff] %v8402_v6  ;;  %v8408_v28 = vpack.c.bf16 %v194_v58, %v190_v49  ;;  %v189_v24 = vld [vmem:[%s9816_s4 + $0x1c0] sm:$0xff]  ;;  %10063 = vst [vmem:[#allocation58_spill] sm:$0xff] %v8420_v45  ;;  %v202_v49 = vld [vmem:[%s9817_s5 + $0x28] sm:$0xff] }
  0x5d   :  { %5773 = vmatprep.subr.bf16.mxu1 %v8348_v48  ;;  %v8406_v48 = vpack.c.bf16 %v187_v46, %v183_v29  ;;  %v195_v29 = vld [vmem:[%s9816_s4 + $0x1f0] sm:$0xff]  ;;  %v198_v46 = vld [vmem:[%s9817_s5 + $0x8] sm:$0xff]  ;;  %v200_v58 = vld [vmem:[%s9817_s5 + $0x18] sm:$0xff]  ;;  %v8438_v5 = vpack.c.bf16 %v193_v21, %v189_v24 }
  0x5e   :  { %10062 = vst [vmem:[#allocation57_spill] sm:$0xff] %v8408_v28  ;;  %v199_v21 = vld [vmem:[%s9817_s5 + $0x10] sm:$0xff]  ;;  %v8456_v24 = vpack.c.bf16 %v204_v59, %v200_v58  ;;  %v212_v58 = vld [vmem:[%s9817_s5 + $0x78] sm:$0xff] }
  0x5f   :  { %5743 = vmatpush1.bf16.msra.mxu0 %v8366_v14  ;;  %10061 = vst [vmem:[#allocation56_spill] sm:$0xff] %v8406_v48  ;;  %10064 = vst [vmem:[#allocation59_spill] sm:$0xff] %v8438_v5  ;;  %v201_v14 = vld [vmem:[%s9817_s5 + $0x20] sm:$0xff] }
  0x60   :  { %5775 = vmatpush1.bf16.msra.mxu1 %v8370_v0  ;;  %5745 = vmatprep.subr.bf16.mxu0 %v8372_v56  ;;  %v8444_v56 = vpack.c.bf16 %v202_v49, %v198_v46  ;;  %v197_v0 = vld [vmem:[%s9817_s5] sm:$0xff]  ;;  %10067 = vst [vmem:[#allocation62_spill] sm:$0xff] %v8456_v24  ;;  %v210_v46 = vld [vmem:[%s9817_s5 + $0x68] sm:$0xff]  ;;  %v208_v49 = vld [vmem:[%s9817_s5 + $0x58] sm:$0xff] }
  0x61   :  { %5777 = vmatprep.subr.bf16.mxu1 %v8384_v30  ;;  %v8442_v30 = vpack.c.bf16 %v195_v29, %v191_v42  ;;  %v203_v42 = vld [vmem:[%s9817_s5 + $0x30] sm:$0xff]  ;;  %v206_v29 = vld [vmem:[%s9817_s5 + $0x48] sm:$0xff]  ;;  %v8474_v59 = vpack.c.bf16 %v201_v14, %v197_v0  ;;  %v8492_v14 = vpack.c.bf16 %v212_v58, %v208_v49  ;;  %v220_v49 = vld [vmem:[%s9817_s5 + $0xb8] sm:$0xff] }
  0x62   :  { %10066 = vst [vmem:[#allocation61_spill] sm:$0xff] %v8444_v56  ;;  %v207_v0 = vld [vmem:[%s9817_s5 + $0x50] sm:$0xff] }
  0x63   :  { %5747 = vmatpush1.bf16.msra.mxu0 %v8402_v6  ;;  %10065 = vst [vmem:[#allocation60_spill] sm:$0xff] %v8442_v30  ;;  %10068 = vst [vmem:[#allocation63_spill] sm:$0xff] %v8474_v59  ;;  %v209_v6 = vld [vmem:[%s9817_s5 + $0x60] sm:$0xff] }
  0x64   :  { %5779 = vmatpush1.bf16.msra.mxu1 %v8406_v48  ;;  %5749 = vmatprep.subr.bf16.mxu0 %v8408_v28  ;;  %v8480_v28 = vpack.c.bf16 %v210_v46, %v206_v29  ;;  %v205_v48 = vld [vmem:[%s9817_s5 + $0x40] sm:$0xff]  ;;  %10071 = vst [vmem:[#allocation66_spill] sm:$0xff] %v8492_v14  ;;  %v218_v29 = vld [vmem:[%s9817_s5 + $0xa8] sm:$0xff]  ;;  %v10072_v46 = vmov 0.0  }
  0x65   :  { %5781 = vmatprep.subr.bf16.mxu1 %v8420_v45  ;;  %v8478_v45 = vpack.c.bf16 %v203_v42, %v199_v21  ;;  %v211_v21 = vld [vmem:[%s9817_s5 + $0x70] sm:$0xff]  ;;  %v214_v42 = vld [vmem:[%s9817_s5 + $0x88] sm:$0xff]  ;;  %v8512_v58 = vpack.c.bf16 %v209_v6, %v205_v48 }
  0x66   :  { %10070 = vst [vmem:[#allocation65_spill] sm:$0xff] %v8480_v28  ;;  %v215_v48 = vld [vmem:[%s9817_s5 + $0x90] sm:$0xff] }
  0x67   :  { %5751 = vmatpush1.bf16.msra.mxu0 %v8438_v5  ;;  %10069 = vst [vmem:[#allocation64_spill] sm:$0xff] %v8478_v45  ;;  %10073 = vst [vmem:[#allocation67_spill] sm:$0xff] %v8512_v58  ;;  %v213_v5 = vld [vmem:[%s9817_s5 + $0x80] sm:$0xff] }
  0x68   :  { %5783 = vmatpush1.bf16.msra.mxu1 %v8442_v30  ;;  %5785 = vmatprep.subr.bf16.mxu0 %v8444_v56  ;;  %v8516_v56 = vpack.c.bf16 %v211_v21, %v207_v0  ;;  %v8518_v30 = vpack.c.bf16 %v218_v29, %v214_v42  ;;  %v219_v0 = vld [vmem:[%s9817_s5 + $0xb0] sm:$0xff]  ;;  %v222_v21 = vld [vmem:[%s9817_s5 + $0xc8] sm:$0xff]  ;;  %v224_v29 = vld [vmem:[%s9817_s5 + $0xd8] sm:$0xff] }
  0x69   :  { %5817 = vmatprep.subr.bf16.mxu1 %v8456_v24  ;;  %v216_v24 = vld [vmem:[%s9817_s5 + $0x98] sm:$0xff]  ;;  %v226_v42 = vld [vmem:[%s9817_s5 + $0xe8] sm:$0xff] }
  0x6a   :  { %524 = vmatmul.mubr.f32.vlgmr.msra.gmra.mrb[2].mxu0 %v10072_v46  ;;  %10074 = vst [vmem:[#allocation68_spill] sm:$0xff] %v8516_v56  ;;  %10075 = vst [vmem:[#allocation69_spill] sm:$0xff] %v8518_v30  ;;  %v8530_v6 = vpack.c.bf16 %v220_v49, %v216_v24  ;;  %v228_v24 = vld [vmem:[%s9817_s5 + $0xf8] sm:$0xff]  ;;  %v8550_v49 = vpack.c.bf16 %v217_v32, %v213_v5  ;;  %v223_v32 = vld [vmem:[%s9817_s5 + $0xd0] sm:$0xff] }
  0x6b   :  { %595 = vmatmul.mubr.f32.vlgmr.msra.gmra.mrb[2].mxu1 %v10072_v46  ;;  %5787 = vmatpush1.bf16.msra.mxu0 %v8474_v59  ;;  %v225_v59 = vld [vmem:[%s9817_s5 + $0xe0] sm:$0xff]  ;;  %v8568_v5 = vpack.c.bf16 %v228_v24, %v224_v29  ;;  %v236_v29 = vld [vmem:[%s9817_s5 + $0x138] sm:$0xff] }
  0x6c   :  { %5819 = vmatpush1.bf16.msra.mxu1 %v8478_v45  ;;  %5789 = vmatprep.subr.bf16.mxu0 %v8480_v28  ;;  %10076 = vst [vmem:[#allocation70_spill] sm:$0xff] %v8530_v6  ;;  %10077 = vst [vmem:[#allocation71_spill] sm:$0xff] %v8550_v49  ;;  %v8556_v28 = vpack.c.bf16 %v226_v42, %v222_v21  ;;  %v221_v45 = vld [vmem:[%s9817_s5 + $0xc0] sm:$0xff]  ;;  %v234_v21 = vld [vmem:[%s9817_s5 + $0x128] sm:$0xff] }
  0x6d   :  { %5821 = vmatprep.subr.bf16.mxu1 %v8492_v14  ;;  %720 = vmatprep.mubr.f32.mxu0 %v10072_v46  ;;  %v8554_v14 = vpack.c.bf16 %v219_v0, %v215_v48  ;;  %10080 = vst [vmem:[#allocation74_spill] sm:$0xff] %v8568_v5  ;;  %v227_v48 = vld [vmem:[%s9817_s5 + $0xf0] sm:$0xff]  ;;  %v230_v0 = vld [vmem:[%s9817_s5 + $0x108] sm:$0xff]  ;;  %v232_v42 = vld [vmem:[%s9817_s5 + $0x118] sm:$0xff]  ;;  %v8586_v24 = vpack.c.bf16 %v225_v59, %v221_v45 }
  0x6e   :  { %791 = vmatprep.mubr.f32.mxu1 %v10072_v46  ;;  %10079 = vst [vmem:[#allocation73_spill] sm:$0xff] %v8556_v28  ;;  %v231_v45 = vld [vmem:[%s9817_s5 + $0x110] sm:$0xff]  ;;  %v8604_v59 = vpack.c.bf16 %v236_v29, %v232_v42  ;;  %v244_v42 = vld [vmem:[%s9817_s5 + $0x178] sm:$0xff] }
  0x6f   :  { %5791 = vmatpush1.bf16.msra.mxu0 %v8512_v58  ;;  %10078 = vst [vmem:[#allocation72_spill] sm:$0xff] %v8554_v14  ;;  %10081 = vst [vmem:[#allocation75_spill] sm:$0xff] %v8586_v24  ;;  %v233_v58 = vld [vmem:[%s9817_s5 + $0x120] sm:$0xff] }
  0x70   :  { %5823 = vmatpush1.bf16.msra.mxu1 %v8516_v56  ;;  %5793 = vmatprep.subr.bf16.mxu0 %v8518_v30  ;;  %v8592_v30 = vpack.c.bf16 %v234_v21, %v230_v0  ;;  %v229_v56 = vld [vmem:[%s9817_s5 + $0x100] sm:$0xff]  ;;  %10084 = vst [vmem:[#allocation78_spill] sm:$0xff] %v8604_v59  ;;  %v242_v0 = vld [vmem:[%s9817_s5 + $0x168] sm:$0xff]  ;;  %v240_v21 = vld [vmem:[%s9817_s5 + $0x158] sm:$0xff] }
  0x71   :  { %5825 = vmatprep.subr.bf16.mxu1 %v8530_v6  ;;  %v8590_v6 = vpack.c.bf16 %v227_v48, %v223_v32  ;;  %v235_v32 = vld [vmem:[%s9817_s5 + $0x130] sm:$0xff]  ;;  %v238_v48 = vld [vmem:[%s9817_s5 + $0x148] sm:$0xff]  ;;  %v8622_v29 = vpack.c.bf16 %v233_v58, %v229_v56  ;;  %v8640_v58 = vpack.c.bf16 %v244_v42, %v240_v21  ;;  %v252_v21 = vld [vmem:[%s9817_s5 + $0x1b8] sm:$0xff] }
  0x72   :  { %10083 = vst [vmem:[#allocation77_spill] sm:$0xff] %v8592_v30  ;;  %v239_v56 = vld [vmem:[%s9817_s5 + $0x150] sm:$0xff] }
  0x73   :  { %5795 = vmatpush1.bf16.msra.mxu0 %v8550_v49  ;;  %10082 = vst [vmem:[#allocation76_spill] sm:$0xff] %v8590_v6  ;;  %10085 = vst [vmem:[#allocation79_spill] sm:$0xff] %v8622_v29  ;;  %v241_v49 = vld [vmem:[%s9817_s5 + $0x160] sm:$0xff] }
  0x74   :  { %5827 = vmatpush1.bf16.msra.mxu1 %v8554_v14  ;;  %5797 = vmatprep.subr.bf16.mxu0 %v8556_v28  ;;  %v8628_v28 = vpack.c.bf16 %v242_v0, %v238_v48  ;;  %v237_v14 = vld [vmem:[%s9817_s5 + $0x140] sm:$0xff]  ;;  %10088 = vst [vmem:[#allocation82_spill] sm:$0xff] %v8640_v58  ;;  %v250_v48 = vld [vmem:[%s9817_s5 + $0x1a8] sm:$0xff]  ;;  %v248_v0 = vld [vmem:[%s9817_s5 + $0x198] sm:$0xff] }
  0x75   :  { %5829 = vmatprep.subr.bf16.mxu1 %v8568_v5  ;;  %v8626_v5 = vpack.c.bf16 %v235_v32, %v231_v45  ;;  %v243_v45 = vld [vmem:[%s9817_s5 + $0x170] sm:$0xff]  ;;  %v246_v32 = vld [vmem:[%s9817_s5 + $0x188] sm:$0xff]  ;;  %v8658_v42 = vpack.c.bf16 %v241_v49, %v237_v14  ;;  %v8676_v49 = vpack.c.bf16 %v252_v21, %v248_v0  ;;  %v260_v0 = vld [vmem:[%s9817_s5 + $0x1f8] sm:$0xff] }
  0x76   :  { %10087 = vst [vmem:[#allocation81_spill] sm:$0xff] %v8628_v28  ;;  %v247_v14 = vld [vmem:[%s9817_s5 + $0x190] sm:$0xff] }
  0x77   :  { %5799 = vmatpush1.bf16.msra.mxu0 %v8586_v24  ;;  %10086 = vst [vmem:[#allocation80_spill] sm:$0xff] %v8626_v5  ;;  %10089 = vst [vmem:[#allocation83_spill] sm:$0xff] %v8658_v42  ;;  %v249_v24 = vld [vmem:[%s9817_s5 + $0x1a0] sm:$0xff] }
  0x78   :  { %5831 = vmatpush1.bf16.msra.mxu1 %v8590_v6  ;;  %5801 = vmatprep.subr.bf16.mxu0 %v8592_v30  ;;  %v8664_v30 = vpack.c.bf16 %v250_v48, %v246_v32  ;;  %v245_v6 = vld [vmem:[%s9817_s5 + $0x180] sm:$0xff]  ;;  %10092 = vst [vmem:[#allocation86_spill] sm:$0xff] %v8676_v49  ;;  %v258_v32 = vld [vmem:[%s9817_s5 + $0x1e8] sm:$0xff]  ;;  %v256_v48 = vld [vmem:[%s9817_s5 + $0x1d8] sm:$0xff] }
  0x79   :  { %5833 = vmatprep.subr.bf16.mxu1 %v8604_v59  ;;  %v8662_v59 = vpack.c.bf16 %v243_v45, %v239_v56  ;;  %v251_v56 = vld [vmem:[%s9817_s5 + $0x1b0] sm:$0xff]  ;;  %v254_v45 = vld [vmem:[%s9817_s5 + $0x1c8] sm:$0xff]  ;;  %v8694_v21 = vpack.c.bf16 %v249_v24, %v245_v6  ;;  %v8709_v6 = vpack.c.bf16 %v260_v0, %v256_v48 }
  0x7a   :  { %10091 = vst [vmem:[#allocation85_spill] sm:$0xff] %v8664_v30  ;;  %v255_v24 = vld [vmem:[%s9817_s5 + $0x1d0] sm:$0xff] }
  0x7b   :  { %5803 = vmatpush1.bf16.msra.mxu0 %v8622_v29  ;;  %10090 = vst [vmem:[#allocation84_spill] sm:$0xff] %v8662_v59  ;;  %10093 = vst [vmem:[#allocation87_spill] sm:$0xff] %v8694_v21  ;;  %v257_v29 = vld [vmem:[%s9817_s5 + $0x1e0] sm:$0xff] }
  0x7c   :  { %5835 = vmatpush1.bf16.msra.mxu1 %v8626_v5  ;;  %5805 = vmatprep.subr.bf16.mxu0 %v8628_v28  ;;  %v8700_v28 = vpack.c.bf16 %v258_v32, %v254_v45  ;;  %v253_v5 = vld [vmem:[%s9817_s5 + $0x1c0] sm:$0xff]  ;;  %10096 = vst [vmem:[#allocation90_spill] sm:$0xff] %v8709_v6  ;;  %v413_v32 = vlaneseq }
  0x7d   :  { %5837 = vmatprep.subr.bf16.mxu1 %v8640_v58  ;;  %v8698_v58 = vpack.c.bf16 %v251_v56, %v247_v14  ;;  %v259_v14 = vld [vmem:[%s9817_s5 + $0x1f0] sm:$0xff]  ;;  %v8718_v56 = vpack.c.bf16 %v257_v29, %v253_v5  ;;  %v7761_v5 = vmov 1983009808  }
  0x7e   :  { %10095 = vst [vmem:[#allocation89_spill] sm:$0xff] %v8700_v28  ;;  %v8722_v45 = vpack.c.bf16 %v259_v14, %v255_v24  ;;  %v411_v29 = vunpack.c.l.s4 %v7761_v5  ;;  %v8765_v0 = vshrl.u32 %v413_v32, 7  ;;  %v261_v5 = vld [vmem:[%s9812_s0] sm:$0xff] }
  0x7f   :  { %5807 = vmatpush1.bf16.msra.mxu0 %v8658_v42  ;;  %10094 = vst [vmem:[#allocation88_spill] sm:$0xff] %v8698_v58  ;;  %10097 = vst [vmem:[#allocation91_spill] sm:$0xff] %v8718_v56 }
  0x80   :  { %5839 = vmatpush1.bf16.msra.mxu1 %v8662_v59  ;;  %5809 = vmatprep.subr.bf16.mxu0 %v8664_v30  ;;  %10098 = vst [vmem:[#allocation92_spill] sm:$0xff] %v8722_v45  ;;  %v412_v48 = vunpack.c.0.s8 %v411_v29  ;;  %10099 = vst [vmem:[#allocation93_spill] sm:$0xff] %v8765_v0 }
  0x81   :  { %5841 = vmatprep.subr.bf16.mxu1 %v8676_v49 }
  0x82   :  { %v8768_v14 = vsub.s32 %v412_v48, %v8765_v0 }
  0x83   :  { %5811 = vmatpush1.bf16.msra.mxu0 %v8694_v21 }
  0x84   :  { %5843 = vmatpush1.bf16.msra.mxu1 %v8698_v58  ;;  %5813 = vmatprep.subr.bf16.mxu0 %v8700_v28 }
  0x85   :  { %5845 = vmatprep.subr.bf16.mxu1 %v8709_v6 }
  0x87   :  { %5815 = vmatpush1.bf16.msra.mxu0 %v8718_v56 }
  0x88   :  { %5847 = vmatpush1.bf16.msra.mxu1 %v8722_v45  ;;  %5849 = vmatprep.subr.bf16.mxu0 %v7864_v4 }
  0x89   :  { %5881 = vmatprep.subr.bf16.mxu1 %v7875_v8 }
  0x8a   :  { %721 = vmatmul.mubr.f32.vlgmr.msra.gmra.mrb[4].mxu0 %v10072_v46 }
  0x8b   :  { %792 = vmatmul.mubr.f32.vlgmr.msra.gmra.mrb[4].mxu1 %v10072_v46  ;;  %5851 = vmatpush1.bf16.msra.mxu0 %v7877_v9 }
  0x8c   :  { %5883 = vmatpush1.bf16.msra.mxu1 %v7889_v13  ;;  %5853 = vmatprep.subr.bf16.mxu0 %v7902_v17 }
  0x8d   :  { %5885 = vmatprep.subr.bf16.mxu1 %v7904_v18  ;;  %918 = vmatprep.mubr.f32.mxu0 %v10072_v46 }
  0x8e   :  { %989 = vmatprep.mubr.f32.mxu1 %v10072_v46 }
  0x8f   :  { %5855 = vmatpush1.bf16.msra.mxu0 %v7916_v22 }
  0x90   :  { %5887 = vmatpush1.bf16.msra.mxu1 %v7929_v26  ;;  %5857 = vmatprep.subr.bf16.mxu0 %v7931_v27 }
  0x91   :  { %5889 = vmatprep.subr.bf16.mxu1 %v7942_v31 }
  0x93   :  { %5859 = vmatpush1.bf16.msra.mxu0 %v7954_v35 }
  0x94   :  { %5891 = vmatpush1.bf16.msra.mxu1 %v7967_v39  ;;  %5861 = vmatprep.subr.bf16.mxu0 %v7969_v40 }
  0x95   :  { %5893 = vmatprep.subr.bf16.mxu1 %v7981_v44 }
  0x97   :  { %5863 = vmatpush1.bf16.msra.mxu0 %v8002_v51 }
  0x98   :  { %5895 = vmatpush1.bf16.msra.mxu1 %v8006_v52  ;;  %5865 = vmatprep.subr.bf16.mxu0 %v8008_v53 }
  0x99   :  { %5897 = vmatprep.subr.bf16.mxu1 %v8020_v57 }
  0x9b   :  { %5867 = vmatpush1.bf16.msra.mxu0 %v8038_v63 }
  0x9c   :  { %5899 = vmatpush1.bf16.msra.mxu1 %v8042_v1  ;;  %5869 = vmatprep.subr.bf16.mxu0 %v8044_v2 }
  0x9d   :  { %5901 = vmatprep.subr.bf16.mxu1 %v8056_v7 }
  0x9f   :  { %5871 = vmatpush1.bf16.msra.mxu0 %v8074_v16 }
  0xa0   :  { %5903 = vmatpush1.bf16.msra.mxu1 %v8078_v19  ;;  %5873 = vmatprep.subr.bf16.mxu0 %v8080_v20 }
  0xa1   :  { %5905 = vmatprep.subr.bf16.mxu1 %v8092_v25 }
  0xa3   :  { %5875 = vmatpush1.bf16.msra.mxu0 %v8110_v34 }
  0xa4   :  { %5907 = vmatpush1.bf16.msra.mxu1 %v8114_v36  ;;  %5877 = vmatprep.subr.bf16.mxu0 %v8116_v37 }
  0xa5   :  { %5909 = vmatprep.subr.bf16.mxu1 %v8128_v43 }
  0xa7   :  { %5879 = vmatpush1.bf16.msra.mxu0 %v8146_v50 }
  0xa8   :  { %5911 = vmatpush1.bf16.msra.mxu1 %v8150_v54  ;;  %5913 = vmatprep.subr.bf16.mxu0 %v8152_v55 }
  0xa9   :  { %5945 = vmatprep.subr.bf16.mxu1 %v8164_v60 }
 0x11d   :  { %v328_v24 = vpop.f32.mrb[0].mxu0 }
 0x11e   :  { %v399_v37 = vpop.f32.mrb[0].mxu1  ;;  %v330_v43 = vpop.f32.mrb[1].mxu0 }
 0x11f   :  { %v408_v36 = vcombine.low %v328_v24, %v330_v43  ;;  %v401_v50 = vpop.f32.mrb[1].mxu1 }
 0x120   :  { %v409_v34 = vcombine.low %v399_v37, %v401_v50 }
 0x121   :  { %v416_v54 = vrot.slane %v408_v36, %v8768_v14 }
 0x122   :  { %v423_v55 = vrot.slane %v409_v34, %v8768_v14 }
 0x124   :  { %v424_v29 = vcombine.low %v416_v54, %v423_v55 }
 0x126   :  { %v426_v32 = vadd.f32 %v424_v29, %v261_v5 }
 0x128   :  { %v5439_v60 = vmul.f32 -1.442695, %v426_v32  ;;  %v434_v25 = vrot.slane %v426_v32, 2  ;;  %v445_v0 = vrot.slane %v426_v32, 6  ;;  %v442_v24 = vrot.slane %v426_v32, 4 }
 0x12a   :  { %7322 = vpow2.f32 %v5439_v60  ;;  %v5440_v48 = vmul.f32 -1.442695, %v434_v25  ;;  %v5441_v20 = vmul.f32 -1.442695, %v445_v0 }
 0x12c   :  { %7324 = vpow2.f32 %v5440_v48 }
 0x12d   :  { %7326 = vpow2.f32 %v5441_v20  ;;  %v458_v20 = vld [vmem:[%s9813_s1] sm:$0xff] }
 0x134   :  { %v7323_v43 = vpop.eup %7322 }
 0x135   :  { %v430_v37 = vadd.f32 1.0, %v7323_v43 }
 0x136   :  { %v7325_v50 = vpop.eup %7324 }
 0x137   :  { %7328 = vrcp.f32 %v430_v37  ;;  %v439_v34 = vadd.f32 1.0, %v7325_v50  ;;  %v7327_v29 = vpop.eup %7326 }
 0x138   :  { %7330 = vtanh.f32 %v442_v24  ;;  %v450_v24 = vadd.f32 1.0, %v7327_v29 }
 0x139   :  { %7332 = vrcp.f32 %v439_v34 }
 0x13a   :  { %7334 = vrcp.f32 %v450_v24 }
 0x13d   :  { %v525_v36 = vpop.f32.mrb[2].mxu0 }
 0x13e   :  { %v596_v19 = vpop.f32.mrb[2].mxu1  ;;  %v527_v54 = vpop.f32.mrb[3].mxu0 }
 0x13f   :  { %v605_v55 = vcombine.low %v525_v36, %v527_v54  ;;  %v598_v5 = vpop.f32.mrb[3].mxu1 }
 0x140   :  { %v606_v60 = vcombine.low %v596_v19, %v598_v5 }
 0x141   :  { %v7329_v25 = vpop.eup %7328  ;;  %v613_v48 = vrot.slane %v605_v55, %v8768_v14 }
 0x142   :  { %v7331_v0 = vpop.eup %7330  ;;  %v620_v32 = vrot.slane %v606_v60, %v8768_v14 }
 0x143   :  { %v7333_v43 = vpop.eup %7332  ;;  %v454_v34 = vmul.f32 %v7331_v0, %v7329_v25 }
 0x144   :  { %v453_v37 = vmul.f32 0.0, %v7333_v43  ;;  %v621_v50 = vcombine.low %v613_v48, %v620_v32  ;;  %v7335_v60 = vpop.eup %7334 }
 0x146   :  { %v623_v16 = vadd.f32 %v621_v50, %v458_v20  ;;  %v8780_v36 = vadd.f32 %v454_v34, %v453_v37 }
 0x148   :  { %v5442_v54 = vmul.f32 -1.442695, %v623_v16  ;;  %v631_v19 = vrot.slane %v623_v16, 2  ;;  %7336 = vtanh.f32 %v8780_v36  ;;  %v642_v5 = vrot.slane %v623_v16, 6 }
 0x149   :  { %v639_v29 = vrot.slane %v623_v16, 4 }
 0x14a   :  { %7338 = vpow2.f32 %v5442_v54  ;;  %v5443_v55 = vmul.f32 -1.442695, %v631_v19  ;;  %v5444_v7 = vmul.f32 -1.442695, %v642_v5  ;;  %v10100_v5 = vld [vmem:[#allocation43_spill] sm:$0xff] }
 0x14c   :  { %7340 = vpow2.f32 %v5443_v55  ;;  %v655_v55 = vld [vmem:[%s9814_s2] sm:$0xff] }
 0x14d   :  { %7342 = vpow2.f32 %v5444_v7 }
 0x152   :  { %v7337_v2 = vpop.eup %7336 }
 0x153   :  { %v457_v43 = vmul.f32 %v7337_v2, %v7335_v60  ;;  %v10101_v60 = vld [vmem:[#allocation44_spill] sm:$0xff] }
 0x154   :  { %v7339_v1 = vpop.eup %7338 }
 0x155   :  { %v627_v48 = vadd.f32 1.0, %v7339_v1  ;;  %919 = vmatmul.mubr.f32.vlgmr.msra.gmra.mrb[6].mxu0 %v457_v43  ;;  %990 = vmatmul.mubr.f32.vlgmr.msra.gmra.mrb[6].mxu1 %v457_v43 }
 0x156   :  { %v7341_v25 = vpop.eup %7340  ;;  %5915 = vmatpush1.bf16.msra.mxu0 %v8182_v10  ;;  %5947 = vmatpush1.bf16.msra.mxu1 %v8186_v11 }
 0x157   :  { %7344 = vrcp.f32 %v627_v48  ;;  %v636_v0 = vadd.f32 1.0, %v7341_v25  ;;  %5917 = vmatprep.subr.bf16.mxu0 %v8188_v12  ;;  %5949 = vmatprep.subr.bf16.mxu1 %v8200_v23  ;;  %v7343_v20 = vpop.eup %7342  ;;  %v10102_v25 = vld [vmem:[#allocation45_spill] sm:$0xff] }
 0x158   :  { %7346 = vtanh.f32 %v639_v29  ;;  %1116 = vmatprep.mubr.f32.mxu0 %v10072_v46  ;;  %1187 = vmatprep.mubr.f32.mxu1 %v10072_v46  ;;  %v647_v29 = vadd.f32 1.0, %v7343_v20 }
 0x159   :  { %7348 = vrcp.f32 %v636_v0  ;;  %v10103_v0 = vld [vmem:[#allocation46_spill] sm:$0xff] }
 0x15a   :  { %5919 = vmatpush1.bf16.msra.mxu0 %v8220_v33  ;;  %5951 = vmatpush1.bf16.msra.mxu1 %v8224_v38  ;;  %7350 = vrcp.f32 %v647_v29  ;;  %v10115_v29 = vld [vmem:[#allocation58_spill] sm:$0xff] }
 0x15b   :  { %5921 = vmatprep.subr.bf16.mxu0 %v8226_v41  ;;  %5953 = vmatprep.subr.bf16.mxu1 %v8238_v47 }
 0x15d   :  { %v722_v1 = vpop.f32.mrb[4].mxu0 }
 0x15e   :  { %v793_v2 = vpop.f32.mrb[4].mxu1  ;;  %v724_v7 = vpop.f32.mrb[5].mxu0  ;;  %5923 = vmatpush1.bf16.msra.mxu0 %v8258_v61  ;;  %5955 = vmatpush1.bf16.msra.mxu1 %v8262_v62 }
 0x15f   :  { %v802_v16 = vcombine.low %v722_v1, %v724_v7  ;;  %v795_v32 = vpop.f32.mrb[5].mxu1  ;;  %5925 = vmatprep.subr.bf16.mxu0 %v8264_v3  ;;  %5957 = vmatprep.subr.bf16.mxu1 %v8276_v15 }
 0x160   :  { %v803_v24 = vcombine.low %v793_v2, %v795_v32  ;;  %v10105_v32 = vld [vmem:[#allocation48_spill] sm:$0xff] }
 0x161   :  { %v7345_v37 = vpop.eup %7344  ;;  %v810_v50 = vrot.slane %v802_v16, %v8768_v14  ;;  %v10104_v16 = vld [vmem:[#allocation47_spill] sm:$0xff] }
 0x162   :  { %v7347_v34 = vpop.eup %7346  ;;  %v817_v54 = vrot.slane %v803_v24, %v8768_v14  ;;  %5927 = vmatpush1.bf16.msra.mxu0 %v10100_v5  ;;  %5959 = vmatpush1.bf16.msra.mxu1 %v10101_v60  ;;  %v10106_v5 = vld [vmem:[#allocation49_spill] sm:$0xff]  ;;  %v10107_v60 = vld [vmem:[#allocation50_spill] sm:$0xff] }
 0x163   :  { %v7349_v19 = vpop.eup %7348  ;;  %5929 = vmatprep.subr.bf16.mxu0 %v10102_v25  ;;  %5961 = vmatprep.subr.bf16.mxu1 %v10103_v0  ;;  %v651_v1 = vmul.f32 %v7347_v34, %v7345_v37  ;;  %v10109_v37 = vld [vmem:[#allocation52_spill] sm:$0xff]  ;;  %v10110_v34 = vld [vmem:[#allocation53_spill] sm:$0xff] }
 0x164   :  { %v650_v43 = vmul.f32 0.0, %v7349_v19  ;;  %v818_v48 = vcombine.low %v810_v50, %v817_v54  ;;  %v10108_v50 = vld [vmem:[#allocation51_spill] sm:$0xff]  ;;  %v10111_v54 = vld [vmem:[#allocation54_spill] sm:$0xff] }
 0x166   :  { %v820_v2 = vadd.f32 %v818_v48, %v655_v55  ;;  %v8806_v7 = vadd.f32 %v651_v1, %v650_v43  ;;  %5931 = vmatpush1.bf16.msra.mxu0 %v10104_v16  ;;  %5963 = vmatpush1.bf16.msra.mxu1 %v10105_v32  ;;  %v10112_v55 = vld [vmem:[#allocation55_spill] sm:$0xff]  ;;  %v10113_v43 = vld [vmem:[#allocation56_spill] sm:$0xff]  ;;  %v10114_v48 = vld [vmem:[#allocation57_spill] sm:$0xff]  ;;  %v7351_v1 = vpop.eup %7350 }
 0x167   :  { %5933 = vmatprep.subr.bf16.mxu0 %v10106_v5  ;;  %5965 = vmatprep.subr.bf16.mxu1 %v10107_v60  ;;  %v10119_v5 = vld [vmem:[#allocation62_spill] sm:$0xff] }
 0x168   :  { %v5445_v24 = vmul.f32 -1.442695, %v820_v2  ;;  %v828_v15 = vrot.slane %v820_v2, 2  ;;  %7352 = vtanh.f32 %v8806_v7  ;;  %v839_v19 = vrot.slane %v820_v2, 6 }
 0x16a   :  { %7354 = vpow2.f32 %v5445_v24  ;;  %v5446_v20 = vmul.f32 -1.442695, %v828_v15  ;;  %5935 = vmatpush1.bf16.msra.mxu0 %v10108_v50  ;;  %5967 = vmatpush1.bf16.msra.mxu1 %v10109_v37  ;;  %v5447_v15 = vmul.f32 -1.442695, %v839_v19  ;;  %v10116_v50 = vld [vmem:[#allocation59_spill] sm:$0xff]  ;;  %v10117_v37 = vld [vmem:[#allocation60_spill] sm:$0xff] }
 0x16b   :  { %5937 = vmatprep.subr.bf16.mxu0 %v10110_v34  ;;  %5969 = vmatprep.subr.bf16.mxu1 %v10111_v54  ;;  %v836_v34 = vrot.slane %v820_v2, 4  ;;  %v10118_v54 = vld [vmem:[#allocation61_spill] sm:$0xff]  ;;  %v10120_v19 = vld [vmem:[#allocation63_spill] sm:$0xff]  ;;  %v10123_v2 = vld [vmem:[#allocation66_spill] sm:$0xff] }
 0x16c   :  { %7356 = vpow2.f32 %v5446_v20 }
 0x16d   :  { %7358 = vpow2.f32 %v5447_v15  ;;  %v10125_v15 = vld [vmem:[#allocation68_spill] sm:$0xff] }
 0x16e   :  { %5939 = vmatpush1.bf16.msra.mxu0 %v10112_v55  ;;  %5971 = vmatpush1.bf16.msra.mxu1 %v10113_v43 }
 0x16f   :  { %5941 = vmatprep.subr.bf16.mxu0 %v10114_v48  ;;  %5973 = vmatprep.subr.bf16.mxu1 %v10115_v29  ;;  %v10121_v48 = vld [vmem:[#allocation64_spill] sm:$0xff] }
 0x172   :  { %v7353_v24 = vpop.eup %7352  ;;  %5943 = vmatpush1.bf16.msra.mxu0 %v10116_v50  ;;  %5975 = vmatpush1.bf16.msra.mxu1 %v10117_v37  ;;  %v10122_v37 = vld [vmem:[#allocation65_spill] sm:$0xff] }
 0x173   :  { %v654_v60 = vmul.f32 %v7353_v24, %v7351_v1  ;;  %5977 = vmatprep.subr.bf16.mxu0 %v10118_v54  ;;  %6009 = vmatprep.subr.bf16.mxu1 %v10119_v5  ;;  %v10124_v1 = vld [vmem:[#allocation67_spill] sm:$0xff]  ;;  %v10134_v5 = vld [vmem:[#allocation77_spill] sm:$0xff] }
 0x174   :  { %v7355_v20 = vpop.eup %7354  ;;  %v10136_v54 = vld [vmem:[#allocation79_spill] sm:$0xff] }
 0x175   :  { %v824_v55 = vadd.f32 1.0, %v7355_v20  ;;  %1117 = vmatmul.mubr.f32.vlgmr.msra.gmra.mrb[8].mxu0 %v654_v60  ;;  %1188 = vmatmul.mubr.f32.vlgmr.msra.gmra.mrb[8].mxu1 %v654_v60  ;;  %v10126_v60 = vld [vmem:[#allocation69_spill] sm:$0xff] }
 0x176   :  { %v7357_v43 = vpop.eup %7356  ;;  %5979 = vmatpush1.bf16.msra.mxu0 %v10120_v19  ;;  %6011 = vmatpush1.bf16.msra.mxu1 %v10121_v48  ;;  %v10130_v20 = vld [vmem:[#allocation73_spill] sm:$0xff] }
 0x177   :  { %7360 = vrcp.f32 %v824_v55  ;;  %v833_v29 = vadd.f32 1.0, %v7357_v43  ;;  %5981 = vmatprep.subr.bf16.mxu0 %v10122_v37  ;;  %6013 = vmatprep.subr.bf16.mxu1 %v10123_v2  ;;  %v10127_v55 = vld [vmem:[#allocation70_spill] sm:$0xff]  ;;  %v10128_v43 = vld [vmem:[#allocation71_spill] sm:$0xff]  ;;  %v7359_v24 = vpop.eup %7358 }
 0x178   :  { %7362 = vtanh.f32 %v836_v34  ;;  %1314 = vmatprep.mubr.f32.mxu0 %v10072_v46  ;;  %1385 = vmatprep.mubr.f32.mxu1 %v10072_v46  ;;  %v10129_v34 = vld [vmem:[#allocation72_spill] sm:$0xff]  ;;  %v844_v19 = vadd.f32 1.0, %v7359_v24  ;;  %v10139_v24 = vld [vmem:[#allocation82_spill] sm:$0xff] }
 0x179   :  { %7364 = vrcp.f32 %v833_v29  ;;  %v10131_v29 = vld [vmem:[#allocation74_spill] sm:$0xff] }
 0x17a   :  { %5983 = vmatpush1.bf16.msra.mxu0 %v10124_v1  ;;  %6015 = vmatpush1.bf16.msra.mxu1 %v10125_v15  ;;  %v10132_v1 = vld [vmem:[#allocation75_spill] sm:$0xff]  ;;  %v10133_v15 = vld [vmem:[#allocation76_spill] sm:$0xff]  ;;  %7366 = vrcp.f32 %v844_v19 }
 0x17b   :  { %5985 = vmatprep.subr.bf16.mxu0 %v10126_v60  ;;  %6017 = vmatprep.subr.bf16.mxu1 %v10127_v55  ;;  %v10135_v55 = vld [vmem:[#allocation78_spill] sm:$0xff] }
 0x17e   :  { %5987 = vmatpush1.bf16.msra.mxu0 %v10128_v43  ;;  %6019 = vmatpush1.bf16.msra.mxu1 %v10129_v34 }
 0x17f   :  { %5989 = vmatprep.subr.bf16.mxu0 %v10130_v20  ;;  %6021 = vmatprep.subr.bf16.mxu1 %v10131_v29  ;;  %v10137_v20 = vld [vmem:[#allocation80_spill] sm:$0xff]  ;;  %v10138_v29 = vld [vmem:[#allocation81_spill] sm:$0xff] }
 0x181   :  { %v7361_v2 = vpop.eup %7360 }
 0x182   :  { %v7363_v37 = vpop.eup %7362  ;;  %5991 = vmatpush1.bf16.msra.mxu0 %v10132_v1  ;;  %6023 = vmatpush1.bf16.msra.mxu1 %v10133_v15 }
 0x183   :  { %v7365_v48 = vpop.eup %7364  ;;  %5993 = vmatprep.subr.bf16.mxu0 %v10134_v5  ;;  %6025 = vmatprep.subr.bf16.mxu1 %v10135_v55  ;;  %v848_v43 = vmul.f32 %v7363_v37, %v7361_v2  ;;  %v10140_v2 = vld [vmem:[#allocation27_spill] sm:$0xff] }
 0x184   :  { %v847_v60 = vmul.f32 0.0, %v7365_v48  ;;  %v7367_v37 = vpop.eup %7366 }
 0x186   :  { %v8843_v34 = vadd.f32 %v848_v43, %v847_v60  ;;  %5995 = vmatpush1.bf16.msra.mxu0 %v10136_v54  ;;  %6027 = vmatpush1.bf16.msra.mxu1 %v10137_v20  ;;  %v10141_v60 = vld [vmem:[#allocation28_spill] sm:$0xff]  ;;  %v10142_v43 = vld [vmem:[#allocation29_spill] sm:$0xff] }
 0x187   :  { %5997 = vmatprep.subr.bf16.mxu0 %v10138_v29  ;;  %6029 = vmatprep.subr.bf16.mxu1 %v10139_v24 }
 0x188   :  { %7368 = vtanh.f32 %v8843_v34 }
 0x18a   :  { %5999 = vmatpush1.bf16.msra.mxu0 %v8658_v42  ;;  %6031 = vmatpush1.bf16.msra.mxu1 %v8662_v59 }
 0x18b   :  { %6001 = vmatprep.subr.bf16.mxu0 %v8664_v30  ;;  %6033 = vmatprep.subr.bf16.mxu1 %v8676_v49 }
 0x18e   :  { %6003 = vmatpush1.bf16.msra.mxu0 %v8694_v21  ;;  %6035 = vmatpush1.bf16.msra.mxu1 %v8698_v58 }
 0x18f   :  { %6005 = vmatprep.subr.bf16.mxu0 %v8700_v28  ;;  %6037 = vmatprep.subr.bf16.mxu1 %v8709_v6 }
 0x192   :  { %v7369_v48 = vpop.eup %7368  ;;  %6007 = vmatpush1.bf16.msra.mxu0 %v8718_v56  ;;  %6039 = vmatpush1.bf16.msra.mxu1 %v8722_v45 }
 0x193   :  { %v851_v19 = vmul.f32 %v7369_v48, %v7367_v37  ;;  %6041 = vmatprep.subr.bf16.mxu0 %v7864_v4  ;;  %6073 = vmatprep.subr.bf16.mxu1 %v7875_v8  ;;  %v10143_v37 = vld [vmem:[#allocation30_spill] sm:$0xff]  ;;  %v10144_v48 = vld [vmem:[#allocation31_spill] sm:$0xff] }
 0x195   :  { %1315 = vmatmul.mubr.f32.vlgmr.msra.gmra.mrb[10].mxu0 %v851_v19  ;;  %1386 = vmatmul.mubr.f32.vlgmr.msra.gmra.mrb[10].mxu1 %v851_v19  ;;  %v10145_v19 = vld [vmem:[#allocation32_spill] sm:$0xff] }
 0x196   :  { %6043 = vmatpush1.bf16.msra.mxu0 %v7877_v9  ;;  %6075 = vmatpush1.bf16.msra.mxu1 %v7889_v13 }
 0x197   :  { %6045 = vmatprep.subr.bf16.mxu0 %v7902_v17  ;;  %6077 = vmatprep.subr.bf16.mxu1 %v7904_v18 }
 0x198   :  { %1512 = vmatprep.mubr.f32.mxu0 %v10072_v46  ;;  %1583 = vmatprep.mubr.f32.mxu1 %v10072_v46 }
 0x19a   :  { %6047 = vmatpush1.bf16.msra.mxu0 %v7916_v22  ;;  %6079 = vmatpush1.bf16.msra.mxu1 %v7929_v26 }
 0x19b   :  { %6049 = vmatprep.subr.bf16.mxu0 %v7931_v27  ;;  %6081 = vmatprep.subr.bf16.mxu1 %v7942_v31 }
 0x19e   :  { %6051 = vmatpush1.bf16.msra.mxu0 %v7954_v35  ;;  %6083 = vmatpush1.bf16.msra.mxu1 %v7967_v39 }
 0x19f   :  { %6053 = vmatprep.subr.bf16.mxu0 %v7969_v40  ;;  %6085 = vmatprep.subr.bf16.mxu1 %v7981_v44 }
 0x1a2   :  { %6055 = vmatpush1.bf16.msra.mxu0 %v8002_v51  ;;  %6087 = vmatpush1.bf16.msra.mxu1 %v8006_v52  ;;  %v10146_v51 = vld [vmem:[#allocation33_spill] sm:$0xff]  ;;  %v10147_v52 = vld [vmem:[#allocation34_spill] sm:$0xff] }
 0x1a3   :  { %6057 = vmatprep.subr.bf16.mxu0 %v8008_v53  ;;  %6089 = vmatprep.subr.bf16.mxu1 %v8020_v57  ;;  %v10148_v53 = vld [vmem:[#allocation35_spill] sm:$0xff]  ;;  %v10149_v57 = vld [vmem:[#allocation36_spill] sm:$0xff] }
 0x1a6   :  { %6059 = vmatpush1.bf16.msra.mxu0 %v8038_v63  ;;  %6091 = vmatpush1.bf16.msra.mxu1 %v10140_v2  ;;  %v10150_v63 = vld [vmem:[#allocation37_spill] sm:$0xff]  ;;  %v10151_v2 = vld [vmem:[#allocation38_spill] sm:$0xff] }
 0x1a7   :  { %6061 = vmatprep.subr.bf16.mxu0 %v10141_v60  ;;  %6093 = vmatprep.subr.bf16.mxu1 %v10142_v43  ;;  %v10152_v60 = vld [vmem:[#allocation39_spill] sm:$0xff]  ;;  %v10153_v43 = vld [vmem:[#allocation40_spill] sm:$0xff] }
 0x1aa   :  { %6063 = vmatpush1.bf16.msra.mxu0 %v10143_v37  ;;  %6095 = vmatpush1.bf16.msra.mxu1 %v10144_v48  ;;  %v10154_v37 = vld [vmem:[#allocation41_spill] sm:$0xff] }
 0x1ab   :  { %6065 = vmatprep.subr.bf16.mxu0 %v10145_v19  ;;  %6097 = vmatprep.subr.bf16.mxu1 %v10146_v51 }
 0x1ae   :  { %6067 = vmatpush1.bf16.msra.mxu0 %v10147_v52  ;;  %6099 = vmatpush1.bf16.msra.mxu1 %v10148_v53 }
 0x1af   :  { %6069 = vmatprep.subr.bf16.mxu0 %v10149_v57  ;;  %6101 = vmatprep.subr.bf16.mxu1 %v10150_v63 }
 0x1b2   :  { %6071 = vmatpush1.bf16.msra.mxu0 %v10151_v2  ;;  %6103 = vmatpush1.bf16.msra.mxu1 %v10152_v60  ;;  %v5448_v2 = vld [vmem:[%s9812_s0 + $0x8] sm:$0xff] }
 0x1b3   :  { %6105 = vmatprep.subr.bf16.mxu0 %v10153_v43  ;;  %6137 = vmatprep.subr.bf16.mxu1 %v10154_v37 }
 0x228   :  { %v920_v48 = vpop.f32.mrb[6].mxu0  ;;  %v991_v19 = vpop.f32.mrb[6].mxu1 }
 0x229   :  { %v922_v44 = vpop.f32.mrb[7].mxu0  ;;  %v993_v51 = vpop.f32.mrb[7].mxu1 }
 0x22a   :  { %v1000_v40 = vcombine.low %v920_v48, %v922_v44  ;;  %v1001_v52 = vcombine.low %v991_v19, %v993_v51 }
 0x22c   :  { %v1008_v53 = vrot.slane %v1000_v40, %v8768_v14  ;;  %v1015_v57 = vrot.slane %v1001_v52, %v8768_v14 }
 0x22e   :  { %v1016_v63 = vcombine.low %v1008_v53, %v1015_v57 }
 0x230   :  { %v1018_v60 = vadd.f32 %v5448_v2, %v1016_v63 }
 0x232   :  { %v5449_v39 = vmul.f32 -1.442695, %v1018_v60  ;;  %v1026_v43 = vrot.slane %v1018_v60, 2  ;;  %v1037_v35 = vrot.slane %v1018_v60, 6  ;;  %v1034_v44 = vrot.slane %v1018_v60, 4 }
 0x234   :  { %7370 = vpow2.f32 %v5449_v39  ;;  %v5450_v37 = vmul.f32 -1.442695, %v1026_v43  ;;  %v5451_v31 = vmul.f32 -1.442695, %v1037_v35 }
 0x236   :  { %7372 = vpow2.f32 %v5450_v37 }
 0x237   :  { %7374 = vpow2.f32 %v5451_v31  ;;  %v5452_v31 = vld [vmem:[%s9813_s1 + $0x8] sm:$0xff] }
 0x23e   :  { %v7371_v27 = vpop.eup %7370 }
 0x23f   :  { %v1022_v51 = vadd.f32 1.0, %v7371_v27 }
 0x240   :  { %v7373_v48 = vpop.eup %7372 }
 0x241   :  { %7376 = vrcp.f32 %v1022_v51  ;;  %v1031_v40 = vadd.f32 1.0, %v7373_v48  ;;  %v7375_v63 = vpop.eup %7374 }
 0x242   :  { %7378 = vtanh.f32 %v1034_v44  ;;  %v1042_v44 = vadd.f32 1.0, %v7375_v63 }
 0x243   :  { %7380 = vrcp.f32 %v1031_v40 }
 0x244   :  { %7382 = vrcp.f32 %v1042_v44 }
 0x248   :  { %v1118_v52 = vpop.f32.mrb[8].mxu0  ;;  %v1189_v19 = vpop.f32.mrb[8].mxu1 }
 0x249   :  { %v1120_v53 = vpop.f32.mrb[9].mxu0  ;;  %v1191_v57 = vpop.f32.mrb[9].mxu1 }
 0x24a   :  { %v1198_v2 = vcombine.low %v1118_v52, %v1120_v53  ;;  %v1199_v39 = vcombine.low %v1189_v19, %v1191_v57 }
 0x24b   :  { %v7377_v43 = vpop.eup %7376 }
 0x24c   :  { %v7379_v37 = vpop.eup %7378  ;;  %v1206_v35 = vrot.slane %v1198_v2, %v8768_v14  ;;  %v1213_v60 = vrot.slane %v1199_v39, %v8768_v14 }
 0x24d   :  { %v7381_v27 = vpop.eup %7380  ;;  %v1046_v40 = vmul.f32 %v7379_v37, %v7377_v43 }
 0x24e   :  { %v1214_v51 = vcombine.low %v1206_v35, %v1213_v60  ;;  %v1045_v48 = vmul.f32 %v7381_v27, %v8780_v36  ;;  %v7383_v2 = vpop.eup %7382 }
 0x250   :  { %v1216_v26 = vadd.f32 %v5452_v31, %v1214_v51  ;;  %v8907_v22 = vadd.f32 %v1046_v40, %v1045_v48  ;;  %v10155_v40 = vld [vmem:[#allocation42_spill] sm:$0xff] }
 0x252   :  { %v5453_v52 = vmul.f32 -1.442695, %v1216_v26  ;;  %v1224_v19 = vrot.slane %v1216_v26, 2  ;;  %7384 = vtanh.f32 %v8907_v22  ;;  %v1235_v57 = vrot.slane %v1216_v26, 6 }
 0x253   :  { %v1232_v35 = vrot.slane %v1216_v26, 4 }
 0x254   :  { %7386 = vpow2.f32 %v5453_v52  ;;  %v5454_v53 = vmul.f32 -1.442695, %v1224_v19  ;;  %v5455_v39 = vmul.f32 -1.442695, %v1235_v57 }
 0x256   :  { %7388 = vpow2.f32 %v5454_v53 }
 0x257   :  { %7390 = vpow2.f32 %v5455_v39  ;;  %v5456_v39 = vld [vmem:[%s9814_s2 + $0x8] sm:$0xff] }
 0x25c   :  { %v7385_v18 = vpop.eup %7384 }
 0x25d   :  { %v1049_v60 = vmul.f32 %v7385_v18, %v7383_v2 }
 0x25e   :  { %v7387_v63 = vpop.eup %7386 }
 0x25f   :  { %v1220_v36 = vadd.f32 1.0, %v7387_v63  ;;  %1513 = vmatmul.mubr.f32.vlgmr.msra.gmra.mrb[12].mxu0 %v1049_v60  ;;  %1584 = vmatmul.mubr.f32.vlgmr.msra.gmra.mrb[12].mxu1 %v1049_v60  ;;  %v10156_v63 = vld [vmem:[#allocation43_spill] sm:$0xff] }
 0x260   :  { %v7389_v43 = vpop.eup %7388  ;;  %6107 = vmatpush1.bf16.msra.mxu0 %v8182_v10  ;;  %6139 = vmatpush1.bf16.msra.mxu1 %v8186_v11 }
 0x261   :  { %7392 = vrcp.f32 %v1220_v36  ;;  %v1229_v37 = vadd.f32 1.0, %v7389_v43  ;;  %6109 = vmatprep.subr.bf16.mxu0 %v8188_v12  ;;  %6141 = vmatprep.subr.bf16.mxu1 %v8200_v23  ;;  %v7391_v44 = vpop.eup %7390 }
 0x262   :  { %7394 = vtanh.f32 %v1232_v35  ;;  %1710 = vmatprep.mubr.f32.mxu0 %v10072_v46  ;;  %1781 = vmatprep.mubr.f32.mxu1 %v10072_v46  ;;  %v10157_v35 = vld [vmem:[#allocation44_spill] sm:$0xff]  ;;  %v1240_v60 = vadd.f32 1.0, %v7391_v44  ;;  %v10159_v44 = vld [vmem:[#allocation50_spill] sm:$0xff] }
 0x263   :  { %7396 = vrcp.f32 %v1229_v37 }
 0x264   :  { %6111 = vmatpush1.bf16.msra.mxu0 %v8220_v33  ;;  %6143 = vmatpush1.bf16.msra.mxu1 %v8224_v38  ;;  %7398 = vrcp.f32 %v1240_v60  ;;  %v10167_v60 = vld [vmem:[#allocation58_spill] sm:$0xff] }
 0x265   :  { %6113 = vmatprep.subr.bf16.mxu0 %v8226_v41  ;;  %6145 = vmatprep.subr.bf16.mxu1 %v8238_v47 }
 0x268   :  { %v1316_v18 = vpop.f32.mrb[10].mxu0  ;;  %v1387_v26 = vpop.f32.mrb[10].mxu1  ;;  %6115 = vmatpush1.bf16.msra.mxu0 %v8258_v61  ;;  %6147 = vmatpush1.bf16.msra.mxu1 %v8262_v62 }
 0x269   :  { %v1318_v27 = vpop.f32.mrb[11].mxu0  ;;  %v1389_v31 = vpop.f32.mrb[11].mxu1  ;;  %6117 = vmatprep.subr.bf16.mxu0 %v8264_v3  ;;  %6149 = vmatprep.subr.bf16.mxu1 %v10155_v40 }
 0x26a   :  { %v1396_v51 = vcombine.low %v1316_v18, %v1318_v27  ;;  %v1397_v48 = vcombine.low %v1387_v26, %v1389_v31 }
 0x26b   :  { %v7393_v52 = vpop.eup %7392 }
 0x26c   :  { %v7395_v19 = vpop.eup %7394  ;;  %v1404_v53 = vrot.slane %v1396_v51, %v8768_v14  ;;  %v1411_v57 = vrot.slane %v1397_v48, %v8768_v14  ;;  %6119 = vmatpush1.bf16.msra.mxu0 %v10156_v63  ;;  %6151 = vmatpush1.bf16.msra.mxu1 %v10157_v35  ;;  %v10158_v51 = vld [vmem:[#allocation49_spill] sm:$0xff] }
 0x26d   :  { %v7397_v2 = vpop.eup %7396  ;;  %6121 = vmatprep.subr.bf16.mxu0 %v10102_v25  ;;  %6153 = vmatprep.subr.bf16.mxu1 %v10103_v0  ;;  %v1244_v37 = vmul.f32 %v7395_v19, %v7393_v52  ;;  %v10161_v52 = vld [vmem:[#allocation52_spill] sm:$0xff]  ;;  %v10162_v19 = vld [vmem:[#allocation53_spill] sm:$0xff] }
 0x26e   :  { %v1412_v36 = vcombine.low %v1404_v53, %v1411_v57  ;;  %v1243_v43 = vmul.f32 %v7397_v2, %v8806_v7  ;;  %v10160_v7 = vld [vmem:[#allocation51_spill] sm:$0xff]  ;;  %v10163_v53 = vld [vmem:[#allocation54_spill] sm:$0xff] }
 0x26f   :  { %v10164_v2 = vld [vmem:[#allocation55_spill] sm:$0xff] }
 0x270   :  { %v1414_v18 = vadd.f32 %v5456_v39, %v1412_v36  ;;  %v8934_v26 = vadd.f32 %v1244_v37, %v1243_v43  ;;  %6123 = vmatpush1.bf16.msra.mxu0 %v10104_v16  ;;  %6155 = vmatpush1.bf16.msra.mxu1 %v10105_v32  ;;  %v10165_v39 = vld [vmem:[#allocation56_spill] sm:$0xff]  ;;  %v10166_v36 = vld [vmem:[#allocation57_spill] sm:$0xff]  ;;  %v7399_v43 = vpop.eup %7398 }
 0x271   :  { %6125 = vmatprep.subr.bf16.mxu0 %v10158_v51  ;;  %6157 = vmatprep.subr.bf16.mxu1 %v10159_v44 }
 0x272   :  { %v5457_v27 = vmul.f32 -1.442695, %v1414_v18  ;;  %v1422_v31 = vrot.slane %v1414_v18, 2  ;;  %7400 = vtanh.f32 %v8934_v26  ;;  %v1433_v57 = vrot.slane %v1414_v18, 6 }
 0x274   :  { %7402 = vpow2.f32 %v5457_v27  ;;  %v5458_v48 = vmul.f32 -1.442695, %v1422_v31  ;;  %6127 = vmatpush1.bf16.msra.mxu0 %v10160_v7  ;;  %6159 = vmatpush1.bf16.msra.mxu1 %v10161_v52  ;;  %v5459_v37 = vmul.f32 -1.442695, %v1433_v57  ;;  %v10168_v31 = vld [vmem:[#allocation60_spill] sm:$0xff]  ;;  %v10170_v7 = vld [vmem:[#allocation62_spill] sm:$0xff] }
 0x275   :  { %6129 = vmatprep.subr.bf16.mxu0 %v10162_v19  ;;  %6161 = vmatprep.subr.bf16.mxu1 %v10163_v53  ;;  %v1430_v19 = vrot.slane %v1414_v18, 4  ;;  %v10169_v53 = vld [vmem:[#allocation61_spill] sm:$0xff]  ;;  %v10171_v57 = vld [vmem:[#allocation63_spill] sm:$0xff]  ;;  %v10174_v18 = vld [vmem:[#allocation66_spill] sm:$0xff] }
 0x276   :  { %7404 = vpow2.f32 %v5458_v48 }
 0x277   :  { %7406 = vpow2.f32 %v5459_v37  ;;  %v10176_v37 = vld [vmem:[#allocation68_spill] sm:$0xff] }
 0x278   :  { %6131 = vmatpush1.bf16.msra.mxu0 %v10164_v2  ;;  %6163 = vmatpush1.bf16.msra.mxu1 %v10165_v39 }
 0x279   :  { %6133 = vmatprep.subr.bf16.mxu0 %v10166_v36  ;;  %6165 = vmatprep.subr.bf16.mxu1 %v10167_v60  ;;  %v10172_v36 = vld [vmem:[#allocation64_spill] sm:$0xff] }
 0x27c   :  { %v7401_v27 = vpop.eup %7400  ;;  %6135 = vmatpush1.bf16.msra.mxu0 %v10116_v50  ;;  %6167 = vmatpush1.bf16.msra.mxu1 %v10168_v31  ;;  %v10173_v31 = vld [vmem:[#allocation65_spill] sm:$0xff] }
 0x27d   :  { %v1247_v52 = vmul.f32 %v7401_v27, %v7399_v43  ;;  %6169 = vmatprep.subr.bf16.mxu0 %v10169_v53  ;;  %6201 = vmatprep.subr.bf16.mxu1 %v10170_v7  ;;  %v10175_v43 = vld [vmem:[#allocation67_spill] sm:$0xff] }
 0x27e   :  { %v7403_v48 = vpop.eup %7402 }
 0x27f   :  { %v1418_v2 = vadd.f32 1.0, %v7403_v48  ;;  %1711 = vmatmul.mubr.f32.vlgmr.msra.gmra.mrb[14].mxu0 %v1247_v52  ;;  %1782 = vmatmul.mubr.f32.vlgmr.msra.gmra.mrb[14].mxu1 %v1247_v52  ;;  %v10177_v52 = vld [vmem:[#allocation69_spill] sm:$0xff] }
 0x280   :  { %v7405_v39 = vpop.eup %7404  ;;  %6171 = vmatpush1.bf16.msra.mxu0 %v10171_v57  ;;  %6203 = vmatpush1.bf16.msra.mxu1 %v10172_v36  ;;  %v10181_v48 = vld [vmem:[#allocation73_spill] sm:$0xff] }
 0x281   :  { %7408 = vrcp.f32 %v1418_v2  ;;  %v1427_v60 = vadd.f32 1.0, %v7405_v39  ;;  %6173 = vmatprep.subr.bf16.mxu0 %v10173_v31  ;;  %6205 = vmatprep.subr.bf16.mxu1 %v10174_v18  ;;  %v10178_v2 = vld [vmem:[#allocation70_spill] sm:$0xff]  ;;  %v10179_v39 = vld [vmem:[#allocation71_spill] sm:$0xff]  ;;  %v7407_v27 = vpop.eup %7406 }
 0x282   :  { %7410 = vtanh.f32 %v1430_v19  ;;  %1908 = vmatprep.mubr.f32.mxu0 %v10072_v46  ;;  %1979 = vmatprep.mubr.f32.mxu1 %v10072_v46  ;;  %v10180_v19 = vld [vmem:[#allocation72_spill] sm:$0xff]  ;;  %v1438_v57 = vadd.f32 1.0, %v7407_v27  ;;  %v10187_v27 = vld [vmem:[#allocation17_spill] sm:$0xff] }
 0x283   :  { %7412 = vrcp.f32 %v1427_v60  ;;  %v10182_v60 = vld [vmem:[#allocation74_spill] sm:$0xff] }
 0x284   :  { %6175 = vmatpush1.bf16.msra.mxu0 %v10175_v43  ;;  %6207 = vmatpush1.bf16.msra.mxu1 %v10176_v37  ;;  %7414 = vrcp.f32 %v1438_v57  ;;  %v10183_v57 = vld [vmem:[#allocation13_spill] sm:$0xff] }
 0x285   :  { %6177 = vmatprep.subr.bf16.mxu0 %v10177_v52  ;;  %6209 = vmatprep.subr.bf16.mxu1 %v10178_v2 }
 0x288   :  { %6179 = vmatpush1.bf16.msra.mxu0 %v10179_v39  ;;  %6211 = vmatpush1.bf16.msra.mxu1 %v10180_v19 }
 0x289   :  { %6181 = vmatprep.subr.bf16.mxu0 %v10181_v48  ;;  %6213 = vmatprep.subr.bf16.mxu1 %v10182_v60 }
 0x28b   :  { %v7409_v18 = vpop.eup %7408 }
 0x28c   :  { %v7411_v31 = vpop.eup %7410  ;;  %6183 = vmatpush1.bf16.msra.mxu0 %v10132_v1  ;;  %6215 = vmatpush1.bf16.msra.mxu1 %v10133_v15 }
 0x28d   :  { %v7413_v36 = vpop.eup %7412  ;;  %6185 = vmatprep.subr.bf16.mxu0 %v10134_v5  ;;  %6217 = vmatprep.subr.bf16.mxu1 %v10135_v55  ;;  %v1442_v19 = vmul.f32 %v7411_v31, %v7409_v18  ;;  %v10184_v18 = vld [vmem:[#allocation14_spill] sm:$0xff] }
 0x28e   :  { %v1441_v39 = vmul.f32 %v7413_v36, %v8843_v34  ;;  %v7415_v34 = vpop.eup %7414 }
 0x290   :  { %v8972_v2 = vadd.f32 %v1442_v19, %v1441_v39  ;;  %6187 = vmatpush1.bf16.msra.mxu0 %v10136_v54  ;;  %6219 = vmatpush1.bf16.msra.mxu1 %v10137_v20  ;;  %v10185_v39 = vld [vmem:[#allocation15_spill] sm:$0xff]  ;;  %v10186_v19 = vld [vmem:[#allocation16_spill] sm:$0xff] }
 0x291   :  { %6189 = vmatprep.subr.bf16.mxu0 %v10138_v29  ;;  %6221 = vmatprep.subr.bf16.mxu1 %v10139_v24 }
 0x292   :  { %7416 = vtanh.f32 %v8972_v2 }
 0x294   :  { %6191 = vmatpush1.bf16.msra.mxu0 %v8658_v42  ;;  %6223 = vmatpush1.bf16.msra.mxu1 %v8662_v59 }
 0x295   :  { %6193 = vmatprep.subr.bf16.mxu0 %v8664_v30  ;;  %6225 = vmatprep.subr.bf16.mxu1 %v8676_v49 }
 0x298   :  { %6195 = vmatpush1.bf16.msra.mxu0 %v8694_v21  ;;  %6227 = vmatpush1.bf16.msra.mxu1 %v8698_v58 }
 0x299   :  { %6197 = vmatprep.subr.bf16.mxu0 %v8700_v28  ;;  %6229 = vmatprep.subr.bf16.mxu1 %v8709_v6 }
 0x29c   :  { %v7417_v36 = vpop.eup %7416  ;;  %6199 = vmatpush1.bf16.msra.mxu0 %v8718_v56  ;;  %6231 = vmatpush1.bf16.msra.mxu1 %v8722_v45 }
 0x29d   :  { %v1445_v31 = vmul.f32 %v7417_v36, %v7415_v34  ;;  %6233 = vmatprep.subr.bf16.mxu0 %v7864_v4  ;;  %6265 = vmatprep.subr.bf16.mxu1 %v7875_v8  ;;  %v10188_v34 = vld [vmem:[#allocation18_spill] sm:$0xff]  ;;  %v10189_v36 = vld [vmem:[#allocation19_spill] sm:$0xff] }
 0x29f   :  { %1909 = vmatmul.mubr.f32.vlgmr.msra.gmra.mrb[16].mxu0 %v1445_v31  ;;  %1980 = vmatmul.mubr.f32.vlgmr.msra.gmra.mrb[16].mxu1 %v1445_v31  ;;  %v10190_v31 = vld [vmem:[#allocation20_spill] sm:$0xff] }
 0x2a0   :  { %6235 = vmatpush1.bf16.msra.mxu0 %v7877_v9  ;;  %6267 = vmatpush1.bf16.msra.mxu1 %v7889_v13  ;;  %v10193_v13 = vld [vmem:[#allocation23_spill] sm:$0xff]  ;;  %v10194_v9 = vld [vmem:[#allocation24_spill] sm:$0xff] }
 0x2a1   :  { %6237 = vmatprep.subr.bf16.mxu0 %v7902_v17  ;;  %6269 = vmatprep.subr.bf16.mxu1 %v10183_v57  ;;  %v10191_v17 = vld [vmem:[#allocation21_spill] sm:$0xff]  ;;  %v10192_v57 = vld [vmem:[#allocation22_spill] sm:$0xff] }
 0x2a2   :  { %2106 = vmatprep.mubr.f32.mxu0 %v10072_v46  ;;  %2177 = vmatprep.mubr.f32.mxu1 %v10072_v46 }
 0x2a4   :  { %6239 = vmatpush1.bf16.msra.mxu0 %v10184_v18  ;;  %6271 = vmatpush1.bf16.msra.mxu1 %v10185_v39  ;;  %v10195_v18 = vld [vmem:[#allocation25_spill] sm:$0xff]  ;;  %v10196_v39 = vld [vmem:[#allocation26_spill] sm:$0xff] }
 0x2a5   :  { %6241 = vmatprep.subr.bf16.mxu0 %v10186_v19  ;;  %6273 = vmatprep.subr.bf16.mxu1 %v10187_v27  ;;  %v10197_v19 = vld [vmem:[#allocation27_spill] sm:$0xff]  ;;  %v10198_v27 = vld [vmem:[#allocation28_spill] sm:$0xff] }
 0x2a8   :  { %6243 = vmatpush1.bf16.msra.mxu0 %v10188_v34  ;;  %6275 = vmatpush1.bf16.msra.mxu1 %v10189_v36  ;;  %v10199_v34 = vld [vmem:[#allocation29_spill] sm:$0xff]  ;;  %v10200_v36 = vld [vmem:[#allocation30_spill] sm:$0xff] }
 0x2a9   :  { %6245 = vmatprep.subr.bf16.mxu0 %v10190_v31  ;;  %6277 = vmatprep.subr.bf16.mxu1 %v10191_v17  ;;  %v10201_v31 = vld [vmem:[#allocation31_spill] sm:$0xff]  ;;  %v10202_v17 = vld [vmem:[#allocation32_spill] sm:$0xff] }
 0x2ac   :  { %6247 = vmatpush1.bf16.msra.mxu0 %v10192_v57  ;;  %6279 = vmatpush1.bf16.msra.mxu1 %v10193_v13  ;;  %v10203_v57 = vld [vmem:[#allocation33_spill] sm:$0xff]  ;;  %v10204_v13 = vld [vmem:[#allocation34_spill] sm:$0xff] }
 0x2ad   :  { %6249 = vmatprep.subr.bf16.mxu0 %v10194_v9  ;;  %6281 = vmatprep.subr.bf16.mxu1 %v10195_v18  ;;  %v10205_v9 = vld [vmem:[#allocation35_spill] sm:$0xff]  ;;  %v10206_v18 = vld [vmem:[#allocation36_spill] sm:$0xff] }
 0x2b0   :  { %6251 = vmatpush1.bf16.msra.mxu0 %v10196_v39  ;;  %6283 = vmatpush1.bf16.msra.mxu1 %v10197_v19  ;;  %v10207_v39 = vld [vmem:[#allocation37_spill] sm:$0xff]  ;;  %v10208_v19 = vld [vmem:[#allocation38_spill] sm:$0xff] }
 0x2b1   :  { %6253 = vmatprep.subr.bf16.mxu0 %v10198_v27  ;;  %6285 = vmatprep.subr.bf16.mxu1 %v10199_v34  ;;  %v10209_v27 = vld [vmem:[#allocation39_spill] sm:$0xff]  ;;  %v10210_v34 = vld [vmem:[#allocation40_spill] sm:$0xff] }
 0x2b4   :  { %6255 = vmatpush1.bf16.msra.mxu0 %v10200_v36  ;;  %6287 = vmatpush1.bf16.msra.mxu1 %v10201_v31  ;;  %v10211_v36 = vld [vmem:[#allocation41_spill] sm:$0xff] }
 0x2b5   :  { %6257 = vmatprep.subr.bf16.mxu0 %v10202_v17  ;;  %6289 = vmatprep.subr.bf16.mxu1 %v10203_v57 }
 0x2b8   :  { %6259 = vmatpush1.bf16.msra.mxu0 %v10204_v13  ;;  %6291 = vmatpush1.bf16.msra.mxu1 %v10205_v9 }
 0x2b9   :  { %6261 = vmatprep.subr.bf16.mxu0 %v10206_v18  ;;  %6293 = vmatprep.subr.bf16.mxu1 %v10207_v39 }
 0x2bc   :  { %6263 = vmatpush1.bf16.msra.mxu0 %v10208_v19  ;;  %6295 = vmatpush1.bf16.msra.mxu1 %v10209_v27  ;;  %v5460_v19 = vld [vmem:[%s9812_s0 + $0x10] sm:$0xff] }
 0x2bd   :  { %6297 = vmatprep.subr.bf16.mxu0 %v10210_v34  ;;  %6329 = vmatprep.subr.bf16.mxu1 %v10211_v36 }
 0x332   :  { %v1514_v31 = vpop.f32.mrb[12].mxu0  ;;  %v1585_v17 = vpop.f32.mrb[12].mxu1 }
 0x333   :  { %v1516_v8 = vpop.f32.mrb[13].mxu0  ;;  %v1587_v57 = vpop.f32.mrb[13].mxu1 }
 0x334   :  { %v1594_v4 = vcombine.low %v1514_v31, %v1516_v8  ;;  %v1595_v13 = vcombine.low %v1585_v17, %v1587_v57 }
 0x336   :  { %v1602_v9 = vrot.slane %v1594_v4, %v8768_v14  ;;  %v1609_v18 = vrot.slane %v1595_v13, %v8768_v14 }
 0x338   :  { %v1610_v39 = vcombine.low %v1602_v9, %v1609_v18 }
 0x33a   :  { %v1612_v27 = vadd.f32 %v5460_v19, %v1610_v39 }
 0x33c   :  { %v5461_v45 = vmul.f32 -1.442695, %v1612_v27  ;;  %v1620_v34 = vrot.slane %v1612_v27, 2  ;;  %v1631_v56 = vrot.slane %v1612_v27, 6  ;;  %v1628_v8 = vrot.slane %v1612_v27, 4 }
 0x33e   :  { %7418 = vpow2.f32 %v5461_v45  ;;  %v5462_v36 = vmul.f32 -1.442695, %v1620_v34  ;;  %v5463_v6 = vmul.f32 -1.442695, %v1631_v56 }
 0x340   :  { %7420 = vpow2.f32 %v5462_v36 }
 0x341   :  { %7422 = vpow2.f32 %v5463_v6  ;;  %v5464_v6 = vld [vmem:[%s9813_s1 + $0x10] sm:$0xff] }
 0x348   :  { %v7419_v28 = vpop.eup %7418 }
 0x349   :  { %v1616_v17 = vadd.f32 1.0, %v7419_v28 }
 0x34a   :  { %v7421_v57 = vpop.eup %7420 }
 0x34b   :  { %7424 = vrcp.f32 %v1616_v17  ;;  %v1625_v4 = vadd.f32 1.0, %v7421_v57  ;;  %v7423_v39 = vpop.eup %7422 }
 0x34c   :  { %7426 = vtanh.f32 %v1628_v8  ;;  %v1636_v8 = vadd.f32 1.0, %v7423_v39 }
 0x34d   :  { %7428 = vrcp.f32 %v1625_v4 }
 0x34e   :  { %7430 = vrcp.f32 %v1636_v8 }
 0x352   :  { %v1712_v13 = vpop.f32.mrb[14].mxu0  ;;  %v1783_v31 = vpop.f32.mrb[14].mxu1 }
 0x353   :  { %v1714_v9 = vpop.f32.mrb[15].mxu0  ;;  %v1785_v18 = vpop.f32.mrb[15].mxu1 }
 0x354   :  { %v1792_v19 = vcombine.low %v1712_v13, %v1714_v9  ;;  %v1793_v45 = vcombine.low %v1783_v31, %v1785_v18 }
 0x355   :  { %v7425_v34 = vpop.eup %7424 }
 0x356   :  { %v7427_v36 = vpop.eup %7426  ;;  %v1800_v56 = vrot.slane %v1792_v19, %v8768_v14  ;;  %v1807_v27 = vrot.slane %v1793_v45, %v8768_v14 }
 0x357   :  { %v7429_v28 = vpop.eup %7428  ;;  %v1640_v4 = vmul.f32 %v7427_v36, %v7425_v34 }
 0x358   :  { %v1808_v17 = vcombine.low %v1800_v56, %v1807_v27  ;;  %v1639_v57 = vmul.f32 %v7429_v28, %v8907_v22  ;;  %v7431_v19 = vpop.eup %7430 }
 0x35a   :  { %v1810_v58 = vadd.f32 %v5464_v6, %v1808_v17  ;;  %v9036_v21 = vadd.f32 %v1640_v4, %v1639_v57 }
 0x35c   :  { %v5465_v13 = vmul.f32 -1.442695, %v1810_v58  ;;  %v1818_v31 = vrot.slane %v1810_v58, 2  ;;  %7432 = vtanh.f32 %v9036_v21  ;;  %v1829_v18 = vrot.slane %v1810_v58, 6 }
 0x35d   :  { %v1826_v56 = vrot.slane %v1810_v58, 4 }
 0x35e   :  { %7434 = vpow2.f32 %v5465_v13  ;;  %v5466_v9 = vmul.f32 -1.442695, %v1818_v31  ;;  %v5467_v45 = vmul.f32 -1.442695, %v1829_v18 }
 0x360   :  { %7436 = vpow2.f32 %v5466_v9 }
 0x361   :  { %7438 = vpow2.f32 %v5467_v45 }
 0x366   :  { %v7433_v49 = vpop.eup %7432 }
 0x367   :  { %v1643_v27 = vmul.f32 %v7433_v49, %v7431_v19  ;;  %v5468_v19 = vld [vmem:[%s9814_s2 + $0x10] sm:$0xff] }
 0x368   :  { %v7435_v39 = vpop.eup %7434 }
 0x369   :  { %v1814_v22 = vadd.f32 1.0, %v7435_v39  ;;  %2107 = vmatmul.mubr.f32.vlgmr.msra.gmra.mrb[18].mxu0 %v1643_v27  ;;  %2178 = vmatmul.mubr.f32.vlgmr.msra.gmra.mrb[18].mxu1 %v1643_v27 }
 0x36a   :  { %v7437_v34 = vpop.eup %7436  ;;  %6299 = vmatpush1.bf16.msra.mxu0 %v8182_v10  ;;  %6331 = vmatpush1.bf16.msra.mxu1 %v8186_v11 }
 0x36b   :  { %7440 = vrcp.f32 %v1814_v22  ;;  %v1823_v36 = vadd.f32 1.0, %v7437_v34  ;;  %6301 = vmatprep.subr.bf16.mxu0 %v8188_v12  ;;  %6333 = vmatprep.subr.bf16.mxu1 %v8200_v23  ;;  %v7439_v8 = vpop.eup %7438 }
 0x36c   :  { %7442 = vtanh.f32 %v1826_v56  ;;  %2304 = vmatprep.mubr.f32.mxu0 %v10072_v46  ;;  %2375 = vmatprep.mubr.f32.mxu1 %v10072_v46  ;;  %v1834_v45 = vadd.f32 1.0, %v7439_v8  ;;  %v10215_v8 = vld [vmem:[#allocation54_spill] sm:$0xff] }
 0x36d   :  { %7444 = vrcp.f32 %v1823_v36 }
 0x36e   :  { %6303 = vmatpush1.bf16.msra.mxu0 %v8220_v33  ;;  %6335 = vmatpush1.bf16.msra.mxu1 %v8224_v38  ;;  %7446 = vrcp.f32 %v1834_v45  ;;  %v10220_v45 = vld [vmem:[#allocation60_spill] sm:$0xff] }
 0x36f   :  { %6305 = vmatprep.subr.bf16.mxu0 %v8226_v41  ;;  %6337 = vmatprep.subr.bf16.mxu1 %v8238_v47 }
 0x372   :  { %v1910_v58 = vpop.f32.mrb[16].mxu0  ;;  %v1981_v49 = vpop.f32.mrb[16].mxu1  ;;  %6307 = vmatpush1.bf16.msra.mxu0 %v8258_v61  ;;  %6339 = vmatpush1.bf16.msra.mxu1 %v8262_v62 }
 0x373   :  { %v1912_v28 = vpop.f32.mrb[17].mxu0  ;;  %v1983_v6 = vpop.f32.mrb[17].mxu1  ;;  %6309 = vmatprep.subr.bf16.mxu0 %v8264_v3  ;;  %6341 = vmatprep.subr.bf16.mxu1 %v10155_v40 }
 0x374   :  { %v1990_v17 = vcombine.low %v1910_v58, %v1912_v28  ;;  %v1991_v57 = vcombine.low %v1981_v49, %v1983_v6  ;;  %v10213_v28 = vld [vmem:[#allocation52_spill] sm:$0xff]  ;;  %v10214_v6 = vld [vmem:[#allocation53_spill] sm:$0xff] }
 0x375   :  { %v7441_v4 = vpop.eup %7440 }
 0x376   :  { %v7443_v13 = vpop.eup %7442  ;;  %v1998_v31 = vrot.slane %v1990_v17, %v8768_v14  ;;  %v2005_v9 = vrot.slane %v1991_v57, %v8768_v14  ;;  %6311 = vmatpush1.bf16.msra.mxu0 %v10156_v63  ;;  %6343 = vmatpush1.bf16.msra.mxu1 %v10157_v35  ;;  %v10216_v57 = vld [vmem:[#allocation55_spill] sm:$0xff] }
 0x377   :  { %v7445_v18 = vpop.eup %7444  ;;  %6313 = vmatprep.subr.bf16.mxu0 %v10102_v25  ;;  %6345 = vmatprep.subr.bf16.mxu1 %v10103_v0  ;;  %v1838_v27 = vmul.f32 %v7443_v13, %v7441_v4  ;;  %v10217_v4 = vld [vmem:[#allocation56_spill] sm:$0xff]  ;;  %v10218_v13 = vld [vmem:[#allocation57_spill] sm:$0xff] }
 0x378   :  { %v2006_v39 = vcombine.low %v1998_v31, %v2005_v9  ;;  %v1837_v56 = vmul.f32 %v7445_v18, %v8934_v26  ;;  %v10212_v26 = vld [vmem:[#allocation51_spill] sm:$0xff]  ;;  %v10219_v31 = vld [vmem:[#allocation58_spill] sm:$0xff]  ;;  %v7447_v9 = vpop.eup %7446 }
 0x37a   :  { %v2008_v22 = vadd.f32 %v5468_v19, %v2006_v39  ;;  %v9063_v34 = vadd.f32 %v1838_v27, %v1837_v56  ;;  %6315 = vmatpush1.bf16.msra.mxu0 %v10104_v16  ;;  %6347 = vmatpush1.bf16.msra.mxu1 %v10105_v32 }
 0x37b   :  { %6317 = vmatprep.subr.bf16.mxu0 %v10158_v51  ;;  %6349 = vmatprep.subr.bf16.mxu1 %v10159_v44 }
 0x37c   :  { %v5469_v36 = vmul.f32 -1.442695, %v2008_v22  ;;  %v2016_v58 = vrot.slane %v2008_v22, 2  ;;  %7448 = vtanh.f32 %v9063_v34  ;;  %v2027_v17 = vrot.slane %v2008_v22, 6 }
 0x37d   :  { %v2024_v56 = vrot.slane %v2008_v22, 4  ;;  %v10224_v22 = vld [vmem:[#allocation66_spill] sm:$0xff] }
 0x37e   :  { %7450 = vpow2.f32 %v5469_v36  ;;  %v5470_v49 = vmul.f32 -1.442695, %v2016_v58  ;;  %6319 = vmatpush1.bf16.msra.mxu0 %v10212_v26  ;;  %6351 = vmatpush1.bf16.msra.mxu1 %v10213_v28  ;;  %v5471_v18 = vmul.f32 -1.442695, %v2027_v17  ;;  %v10221_v17 = vld [vmem:[#allocation63_spill] sm:$0xff] }
 0x37f   :  { %6321 = vmatprep.subr.bf16.mxu0 %v10214_v6  ;;  %6353 = vmatprep.subr.bf16.mxu1 %v10215_v8 }
 0x380   :  { %7452 = vpow2.f32 %v5470_v49 }
 0x381   :  { %7454 = vpow2.f32 %v5471_v18  ;;  %v10226_v18 = vld [vmem:[#allocation71_spill] sm:$0xff] }
 0x382   :  { %6323 = vmatpush1.bf16.msra.mxu0 %v10216_v57  ;;  %6355 = vmatpush1.bf16.msra.mxu1 %v10217_v4 }
 0x383   :  { %6325 = vmatprep.subr.bf16.mxu0 %v10218_v13  ;;  %6357 = vmatprep.subr.bf16.mxu1 %v10219_v31  ;;  %v10222_v31 = vld [vmem:[#allocation64_spill] sm:$0xff] }
 0x386   :  { %v7449_v19 = vpop.eup %7448  ;;  %6327 = vmatpush1.bf16.msra.mxu0 %v10116_v50  ;;  %6359 = vmatpush1.bf16.msra.mxu1 %v10220_v45  ;;  %v10223_v45 = vld [vmem:[#allocation65_spill] sm:$0xff] }
 0x387   :  { %v1841_v27 = vmul.f32 %v7449_v19, %v7447_v9  ;;  %6361 = vmatprep.subr.bf16.mxu0 %v10169_v53  ;;  %6393 = vmatprep.subr.bf16.mxu1 %v10170_v7  ;;  %v10225_v9 = vld [vmem:[#allocation70_spill] sm:$0xff]  ;;  %v10227_v19 = vld [vmem:[#allocation72_spill] sm:$0xff] }
 0x388   :  { %v7451_v39 = vpop.eup %7450 }
 0x389   :  { %v2012_v36 = vadd.f32 1.0, %v7451_v39  ;;  %2305 = vmatmul.mubr.f32.vlgmr.msra.gmra.mrb[20].mxu0 %v1841_v27  ;;  %2376 = vmatmul.mubr.f32.vlgmr.msra.gmra.mrb[20].mxu1 %v1841_v27 }
 0x38a   :  { %v7453_v58 = vpop.eup %7452  ;;  %6363 = vmatpush1.bf16.msra.mxu0 %v10221_v17  ;;  %6395 = vmatpush1.bf16.msra.mxu1 %v10222_v31 }
 0x38b   :  { %7456 = vrcp.f32 %v2012_v36  ;;  %v2021_v49 = vadd.f32 1.0, %v7453_v58  ;;  %6365 = vmatprep.subr.bf16.mxu0 %v10223_v45  ;;  %6397 = vmatprep.subr.bf16.mxu1 %v10224_v22  ;;  %v7455_v39 = vpop.eup %7454 }
 0x38c   :  { %7458 = vtanh.f32 %v2024_v56  ;;  %2502 = vmatprep.mubr.f32.mxu0 %v10072_v46  ;;  %2573 = vmatprep.mubr.f32.mxu1 %v10072_v46  ;;  %v2032_v58 = vadd.f32 1.0, %v7455_v39  ;;  %v10231_v39 = vld [vmem:[#allocation88_spill] sm:$0xff] }
 0x38d   :  { %7460 = vrcp.f32 %v2021_v49 }
 0x38e   :  { %6367 = vmatpush1.bf16.msra.mxu0 %v10175_v43  ;;  %6399 = vmatpush1.bf16.msra.mxu1 %v10176_v37  ;;  %7462 = vrcp.f32 %v2032_v58 }
 0x38f   :  { %6369 = vmatprep.subr.bf16.mxu0 %v10177_v52  ;;  %6401 = vmatprep.subr.bf16.mxu1 %v10225_v9 }
 0x392   :  { %6371 = vmatpush1.bf16.msra.mxu0 %v10226_v18  ;;  %6403 = vmatpush1.bf16.msra.mxu1 %v10227_v19 }
 0x393   :  { %6373 = vmatprep.subr.bf16.mxu0 %v10181_v48  ;;  %6405 = vmatprep.subr.bf16.mxu1 %v10182_v60 }
 0x395   :  { %v7457_v56 = vpop.eup %7456 }
 0x396   :  { %v7459_v27 = vpop.eup %7458  ;;  %6375 = vmatpush1.bf16.msra.mxu0 %v10132_v1  ;;  %6407 = vmatpush1.bf16.msra.mxu1 %v10133_v15 }
 0x397   :  { %v7461_v36 = vpop.eup %7460  ;;  %6377 = vmatprep.subr.bf16.mxu0 %v10134_v5  ;;  %6409 = vmatprep.subr.bf16.mxu1 %v10135_v55  ;;  %v2036_v19 = vmul.f32 %v7459_v27, %v7457_v56  ;;  %v10232_v56 = vld [vmem:[#allocation89_spill] sm:$0xff]  ;;  %v10233_v27 = vld [vmem:[#allocation90_spill] sm:$0xff] }
 0x398   :  { %v2035_v49 = vmul.f32 %v7461_v36, %v8972_v2  ;;  %v10229_v2 = vld [vmem:[#allocation86_spill] sm:$0xff]  ;;  %v7463_v36 = vpop.eup %7462 }
 0x39a   :  { %v9101_v18 = vadd.f32 %v2036_v19, %v2035_v49  ;;  %6379 = vmatpush1.bf16.msra.mxu0 %v10136_v54  ;;  %6411 = vmatpush1.bf16.msra.mxu1 %v10137_v20  ;;  %v10230_v19 = vld [vmem:[#allocation87_spill] sm:$0xff] }
 0x39b   :  { %6381 = vmatprep.subr.bf16.mxu0 %v10138_v29  ;;  %6413 = vmatprep.subr.bf16.mxu1 %v10139_v24  ;;  %v10234_v49 = vld [vmem:[#allocation91_spill] sm:$0xff]  ;;  %v10235_v24 = vld [vmem:[#allocation92_spill] sm:$0xff] }
 0x39c   :  { %10228 = vst [vmem:[#allocation45_spill] sm:$0xff] %v9101_v18  ;;  %7464 = vtanh.f32 %v9101_v18 }
 0x39e   :  { %6383 = vmatpush1.bf16.msra.mxu0 %v8658_v42  ;;  %6415 = vmatpush1.bf16.msra.mxu1 %v8662_v59  ;;  %v10236_v59 = vld [vmem:[#allocation8_spill] sm:$0xff] }
 0x39f   :  { %6385 = vmatprep.subr.bf16.mxu0 %v8664_v30  ;;  %6417 = vmatprep.subr.bf16.mxu1 %v10229_v2  ;;  %v10237_v30 = vld [vmem:[#allocation9_spill] sm:$0xff] }
 0x3a2   :  { %6387 = vmatpush1.bf16.msra.mxu0 %v10230_v19  ;;  %6419 = vmatpush1.bf16.msra.mxu1 %v10231_v39  ;;  %v10238_v19 = vld [vmem:[#allocation10_spill] sm:$0xff]  ;;  %v10239_v39 = vld [vmem:[#allocation11_spill] sm:$0xff] }
 0x3a3   :  { %6389 = vmatprep.subr.bf16.mxu0 %v10232_v56  ;;  %6421 = vmatprep.subr.bf16.mxu1 %v10233_v27  ;;  %v10240_v56 = vld [vmem:[#allocation12_spill] sm:$0xff]  ;;  %v10241_v27 = vld [vmem:[#allocation13_spill] sm:$0xff] }
 0x3a6   :  { %v7465_v58 = vpop.eup %7464  ;;  %6391 = vmatpush1.bf16.msra.mxu0 %v10234_v49  ;;  %6423 = vmatpush1.bf16.msra.mxu1 %v10235_v24  ;;  %v10242_v24 = vld [vmem:[#allocation14_spill] sm:$0xff]  ;;  %v10252_v49 = vld [vmem:[#allocation24_spill] sm:$0xff] }
 0x3a7   :  { %v2039_v42 = vmul.f32 %v7465_v58, %v7463_v36  ;;  %6425 = vmatprep.subr.bf16.mxu0 %v10236_v59  ;;  %6457 = vmatprep.subr.bf16.mxu1 %v10237_v30  ;;  %v10243_v36 = vld [vmem:[#allocation15_spill] sm:$0xff]  ;;  %v10244_v58 = vld [vmem:[#allocation16_spill] sm:$0xff]  ;;  %v10245_v30 = vld [vmem:[#allocation17_spill] sm:$0xff] }
 0x3a8   :  { %v10251_v59 = vld [vmem:[#allocation23_spill] sm:$0xff] }
 0x3a9   :  { %2503 = vmatmul.mubr.f32.vlgmr.msra.gmra.mrb[22].mxu0 %v2039_v42  ;;  %2574 = vmatmul.mubr.f32.vlgmr.msra.gmra.mrb[22].mxu1 %v2039_v42  ;;  %v10246_v42 = vld [vmem:[#allocation18_spill] sm:$0xff] }
 0x3aa   :  { %6427 = vmatpush1.bf16.msra.mxu0 %v10238_v19  ;;  %6459 = vmatpush1.bf16.msra.mxu1 %v10239_v39  ;;  %v10247_v19 = vld [vmem:[#allocation19_spill] sm:$0xff]  ;;  %v10248_v39 = vld [vmem:[#allocation20_spill] sm:$0xff] }
 0x3ab   :  { %6429 = vmatprep.subr.bf16.mxu0 %v10240_v56  ;;  %6461 = vmatprep.subr.bf16.mxu1 %v10241_v27  ;;  %v10249_v56 = vld [vmem:[#allocation21_spill] sm:$0xff]  ;;  %v10250_v27 = vld [vmem:[#allocation22_spill] sm:$0xff] }
 0x3ac   :  { %2700 = vmatprep.mubr.f32.mxu0 %v10072_v46  ;;  %2771 = vmatprep.mubr.f32.mxu1 %v10072_v46 }
 0x3ae   :  { %6431 = vmatpush1.bf16.msra.mxu0 %v10242_v24  ;;  %6463 = vmatpush1.bf16.msra.mxu1 %v10243_v36  ;;  %v10253_v24 = vld [vmem:[#allocation25_spill] sm:$0xff]  ;;  %v10254_v36 = vld [vmem:[#allocation26_spill] sm:$0xff] }
 0x3af   :  { %6433 = vmatprep.subr.bf16.mxu0 %v10244_v58  ;;  %6465 = vmatprep.subr.bf16.mxu1 %v10245_v30  ;;  %v10255_v58 = vld [vmem:[#allocation27_spill] sm:$0xff]  ;;  %v10256_v30 = vld [vmem:[#allocation28_spill] sm:$0xff] }
 0x3b2   :  { %6435 = vmatpush1.bf16.msra.mxu0 %v10246_v42  ;;  %6467 = vmatpush1.bf16.msra.mxu1 %v10247_v19  ;;  %v10257_v42 = vld [vmem:[#allocation29_spill] sm:$0xff]  ;;  %v10258_v19 = vld [vmem:[#allocation30_spill] sm:$0xff] }
 0x3b3   :  { %6437 = vmatprep.subr.bf16.mxu0 %v10248_v39  ;;  %6469 = vmatprep.subr.bf16.mxu1 %v10249_v56  ;;  %v10259_v39 = vld [vmem:[#allocation31_spill] sm:$0xff]  ;;  %v10260_v56 = vld [vmem:[#allocation32_spill] sm:$0xff] }
 0x3b6   :  { %6439 = vmatpush1.bf16.msra.mxu0 %v10250_v27  ;;  %6471 = vmatpush1.bf16.msra.mxu1 %v10251_v59  ;;  %v10261_v27 = vld [vmem:[#allocation33_spill] sm:$0xff]  ;;  %v10262_v59 = vld [vmem:[#allocation34_spill] sm:$0xff] }
 0x3b7   :  { %6441 = vmatprep.subr.bf16.mxu0 %v10252_v49  ;;  %6473 = vmatprep.subr.bf16.mxu1 %v10253_v24  ;;  %v10263_v49 = vld [vmem:[#allocation35_spill] sm:$0xff]  ;;  %v10264_v24 = vld [vmem:[#allocation36_spill] sm:$0xff] }
 0x3ba   :  { %6443 = vmatpush1.bf16.msra.mxu0 %v10254_v36  ;;  %6475 = vmatpush1.bf16.msra.mxu1 %v10255_v58  ;;  %v10265_v36 = vld [vmem:[#allocation37_spill] sm:$0xff]  ;;  %v10266_v58 = vld [vmem:[#allocation38_spill] sm:$0xff] }
 0x3bb   :  { %6445 = vmatprep.subr.bf16.mxu0 %v10256_v30  ;;  %6477 = vmatprep.subr.bf16.mxu1 %v10257_v42  ;;  %v10267_v30 = vld [vmem:[#allocation39_spill] sm:$0xff]  ;;  %v10268_v42 = vld [vmem:[#allocation40_spill] sm:$0xff] }
 0x3be   :  { %6447 = vmatpush1.bf16.msra.mxu0 %v10258_v19  ;;  %6479 = vmatpush1.bf16.msra.mxu1 %v10259_v39  ;;  %v10269_v19 = vld [vmem:[#allocation41_spill] sm:$0xff] }
 0x3bf   :  { %6449 = vmatprep.subr.bf16.mxu0 %v10260_v56  ;;  %6481 = vmatprep.subr.bf16.mxu1 %v10261_v27 }
 0x3c2   :  { %6451 = vmatpush1.bf16.msra.mxu0 %v10262_v59  ;;  %6483 = vmatpush1.bf16.msra.mxu1 %v10263_v49 }
 0x3c3   :  { %6453 = vmatprep.subr.bf16.mxu0 %v10264_v24  ;;  %6485 = vmatprep.subr.bf16.mxu1 %v10265_v36 }
 0x3c6   :  { %6455 = vmatpush1.bf16.msra.mxu0 %v10266_v58  ;;  %6487 = vmatpush1.bf16.msra.mxu1 %v10267_v30  ;;  %v5472_v58 = vld [vmem:[%s9812_s0 + $0x18] sm:$0xff] }
 0x3c7   :  { %6489 = vmatprep.subr.bf16.mxu0 %v10268_v42  ;;  %6521 = vmatprep.subr.bf16.mxu1 %v10269_v19 }
 0x43c   :  { %v2108_v39 = vpop.f32.mrb[18].mxu0  ;;  %v2179_v56 = vpop.f32.mrb[18].mxu1 }
 0x43d   :  { %v2110_v2 = vpop.f32.mrb[19].mxu0  ;;  %v2181_v27 = vpop.f32.mrb[19].mxu1 }
 0x43e   :  { %v2188_v29 = vcombine.low %v2108_v39, %v2110_v2  ;;  %v2189_v59 = vcombine.low %v2179_v56, %v2181_v27 }
 0x440   :  { %v2196_v49 = vrot.slane %v2188_v29, %v8768_v14  ;;  %v2203_v24 = vrot.slane %v2189_v59, %v8768_v14 }
 0x442   :  { %v2204_v36 = vcombine.low %v2196_v49, %v2203_v24 }
 0x444   :  { %v2206_v30 = vadd.f32 %v5472_v58, %v2204_v36 }
 0x446   :  { %v5473_v20 = vmul.f32 -1.442695, %v2206_v30  ;;  %v2214_v42 = vrot.slane %v2206_v30, 2  ;;  %v2225_v54 = vrot.slane %v2206_v30, 6  ;;  %v2222_v2 = vrot.slane %v2206_v30, 4 }
 0x448   :  { %7466 = vpow2.f32 %v5473_v20  ;;  %v5474_v19 = vmul.f32 -1.442695, %v2214_v42  ;;  %v5475_v18 = vmul.f32 -1.442695, %v2225_v54 }
 0x44a   :  { %7468 = vpow2.f32 %v5474_v19 }
 0x44b   :  { %7470 = vpow2.f32 %v5475_v18  ;;  %v5476_v18 = vld [vmem:[%s9813_s1 + $0x18] sm:$0xff] }
 0x452   :  { %v7467_v55 = vpop.eup %7466 }
 0x453   :  { %v2210_v39 = vadd.f32 1.0, %v7467_v55 }
 0x454   :  { %v7469_v56 = vpop.eup %7468 }
 0x455   :  { %7472 = vrcp.f32 %v2210_v39  ;;  %v2219_v59 = vadd.f32 1.0, %v7469_v56  ;;  %v7471_v36 = vpop.eup %7470 }
 0x456   :  { %7474 = vtanh.f32 %v2222_v2  ;;  %v2230_v2 = vadd.f32 1.0, %v7471_v36 }
 0x457   :  { %7476 = vrcp.f32 %v2219_v59 }
 0x458   :  { %7478 = vrcp.f32 %v2230_v2 }
 0x45c   :  { %v2306_v29 = vpop.f32.mrb[20].mxu0  ;;  %v2377_v27 = vpop.f32.mrb[20].mxu1 }
 0x45d   :  { %v2308_v24 = vpop.f32.mrb[21].mxu0  ;;  %v2379_v49 = vpop.f32.mrb[21].mxu1 }
 0x45e   :  { %v2386_v58 = vcombine.low %v2306_v29, %v2308_v24  ;;  %v2387_v20 = vcombine.low %v2377_v27, %v2379_v49 }
 0x45f   :  { %v7473_v42 = vpop.eup %7472 }
 0x460   :  { %v7475_v19 = vpop.eup %7474  ;;  %v2394_v54 = vrot.slane %v2386_v58, %v8768_v14  ;;  %v2401_v30 = vrot.slane %v2387_v20, %v8768_v14 }
 0x461   :  { %v7477_v55 = vpop.eup %7476  ;;  %v2234_v59 = vmul.f32 %v7475_v19, %v7473_v42 }
 0x462   :  { %v2402_v39 = vcombine.low %v2394_v54, %v2401_v30  ;;  %v2233_v56 = vmul.f32 %v7477_v55, %v9036_v21  ;;  %v7479_v58 = vpop.eup %7478 }
 0x464   :  { %v2404_v5 = vadd.f32 %v5476_v18, %v2402_v39  ;;  %v9165_v15 = vadd.f32 %v2234_v59, %v2233_v56 }
 0x466   :  { %v5477_v29 = vmul.f32 -1.442695, %v2404_v5  ;;  %v2412_v27 = vrot.slane %v2404_v5, 2  ;;  %7480 = vtanh.f32 %v9165_v15  ;;  %v2423_v49 = vrot.slane %v2404_v5, 6 }
 0x467   :  { %v2420_v54 = vrot.slane %v2404_v5, 4 }
 0x468   :  { %7482 = vpow2.f32 %v5477_v29  ;;  %v5478_v24 = vmul.f32 -1.442695, %v2412_v27  ;;  %v5479_v20 = vmul.f32 -1.442695, %v2423_v49 }
 0x46a   :  { %7484 = vpow2.f32 %v5478_v24 }
 0x46b   :  { %7486 = vpow2.f32 %v5479_v20 }
 0x470   :  { %v7481_v1 = vpop.eup %7480 }
 0x471   :  { %v2237_v30 = vmul.f32 %v7481_v1, %v7479_v58  ;;  %v5480_v58 = vld [vmem:[%s9814_s2 + $0x18] sm:$0xff] }
 0x472   :  { %v7483_v36 = vpop.eup %7482 }
 0x473   :  { %v2408_v21 = vadd.f32 1.0, %v7483_v36  ;;  %2701 = vmatmul.mubr.f32.vlgmr.msra.gmra.mrb[24].mxu0 %v2237_v30  ;;  %2772 = vmatmul.mubr.f32.vlgmr.msra.gmra.mrb[24].mxu1 %v2237_v30 }
 0x474   :  { %v7485_v42 = vpop.eup %7484  ;;  %6491 = vmatpush1.bf16.msra.mxu0 %v8182_v10  ;;  %6523 = vmatpush1.bf16.msra.mxu1 %v8186_v11 }
 0x475   :  { %7488 = vrcp.f32 %v2408_v21  ;;  %v2417_v19 = vadd.f32 1.0, %v7485_v42  ;;  %6493 = vmatprep.subr.bf16.mxu0 %v8188_v12  ;;  %6525 = vmatprep.subr.bf16.mxu1 %v8200_v23  ;;  %v7487_v2 = vpop.eup %7486 }
 0x476   :  { %7490 = vtanh.f32 %v2420_v54  ;;  %2898 = vmatprep.mubr.f32.mxu0 %v10072_v46  ;;  %2969 = vmatprep.mubr.f32.mxu1 %v10072_v46  ;;  %v2428_v20 = vadd.f32 1.0, %v7487_v2 }
 0x477   :  { %7492 = vrcp.f32 %v2417_v19 }
 0x478   :  { %6495 = vmatpush1.bf16.msra.mxu0 %v8220_v33  ;;  %6527 = vmatpush1.bf16.msra.mxu1 %v8224_v38  ;;  %7494 = vrcp.f32 %v2428_v20  ;;  %v10272_v20 = vld [vmem:[#allocation71_spill] sm:$0xff] }
 0x479   :  { %6497 = vmatprep.subr.bf16.mxu0 %v8226_v41  ;;  %6529 = vmatprep.subr.bf16.mxu1 %v8238_v47 }
 0x47c   :  { %v2504_v5 = vpop.f32.mrb[22].mxu0  ;;  %v2575_v1 = vpop.f32.mrb[22].mxu1  ;;  %6499 = vmatpush1.bf16.msra.mxu0 %v8258_v61  ;;  %6531 = vmatpush1.bf16.msra.mxu1 %v8262_v62 }
 0x47d   :  { %v2506_v55 = vpop.f32.mrb[23].mxu0  ;;  %v2577_v18 = vpop.f32.mrb[23].mxu1  ;;  %6501 = vmatprep.subr.bf16.mxu0 %v8264_v3  ;;  %6533 = vmatprep.subr.bf16.mxu1 %v10155_v40 }
 0x47e   :  { %v2584_v39 = vcombine.low %v2504_v5, %v2506_v55  ;;  %v2585_v56 = vcombine.low %v2575_v1, %v2577_v18  ;;  %v10270_v55 = vld [vmem:[#allocation58_spill] sm:$0xff] }
 0x47f   :  { %v7489_v59 = vpop.eup %7488 }
 0x480   :  { %v7491_v29 = vpop.eup %7490  ;;  %v2592_v27 = vrot.slane %v2584_v39, %v8768_v14  ;;  %v2599_v24 = vrot.slane %v2585_v56, %v8768_v14  ;;  %6503 = vmatpush1.bf16.msra.mxu0 %v10156_v63  ;;  %6535 = vmatpush1.bf16.msra.mxu1 %v10157_v35  ;;  %v10271_v56 = vld [vmem:[#allocation60_spill] sm:$0xff] }
 0x481   :  { %v7493_v49 = vpop.eup %7492  ;;  %6505 = vmatprep.subr.bf16.mxu0 %v10102_v25  ;;  %6537 = vmatprep.subr.bf16.mxu1 %v10103_v0  ;;  %v2432_v30 = vmul.f32 %v7491_v29, %v7489_v59 }
 0x482   :  { %v2600_v36 = vcombine.low %v2592_v27, %v2599_v24  ;;  %v2431_v54 = vmul.f32 %v7493_v49, %v9063_v34  ;;  %v7495_v18 = vpop.eup %7494 }
 0x484   :  { %v2602_v21 = vadd.f32 %v5480_v58, %v2600_v36  ;;  %v9192_v42 = vadd.f32 %v2432_v30, %v2431_v54  ;;  %6507 = vmatpush1.bf16.msra.mxu0 %v10104_v16  ;;  %6539 = vmatpush1.bf16.msra.mxu1 %v10105_v32  ;;  %v10273_v36 = vld [vmem:[#allocation72_spill] sm:$0xff] }
 0x485   :  { %6509 = vmatprep.subr.bf16.mxu0 %v10158_v51  ;;  %6541 = vmatprep.subr.bf16.mxu1 %v10159_v44 }
 0x486   :  { %v5481_v19 = vmul.f32 -1.442695, %v2602_v21  ;;  %v2610_v5 = vrot.slane %v2602_v21, 2  ;;  %7496 = vtanh.f32 %v9192_v42  ;;  %v2621_v34 = vrot.slane %v2602_v21, 6 }
 0x487   :  { %v2618_v29 = vrot.slane %v2602_v21, 4 }
 0x488   :  { %7498 = vpow2.f32 %v5481_v19  ;;  %v5482_v1 = vmul.f32 -1.442695, %v2610_v5  ;;  %6511 = vmatpush1.bf16.msra.mxu0 %v10212_v26  ;;  %6543 = vmatpush1.bf16.msra.mxu1 %v10213_v28  ;;  %v5483_v2 = vmul.f32 -1.442695, %v2621_v34  ;;  %v10275_v34 = vld [vmem:[#allocation76_spill] sm:$0xff] }
 0x489   :  { %6513 = vmatprep.subr.bf16.mxu0 %v10214_v6  ;;  %6545 = vmatprep.subr.bf16.mxu1 %v10215_v8 }
 0x48a   :  { %7500 = vpow2.f32 %v5482_v1  ;;  %v10274_v1 = vld [vmem:[#allocation75_spill] sm:$0xff] }
 0x48b   :  { %7502 = vpow2.f32 %v5483_v2  ;;  %v10277_v2 = vld [vmem:[#allocation78_spill] sm:$0xff] }
 0x48c   :  { %6515 = vmatpush1.bf16.msra.mxu0 %v10216_v57  ;;  %6547 = vmatpush1.bf16.msra.mxu1 %v10217_v4 }
 0x48d   :  { %6517 = vmatprep.subr.bf16.mxu0 %v10218_v13  ;;  %6549 = vmatprep.subr.bf16.mxu1 %v10270_v55 }
 0x490   :  { %v7497_v39 = vpop.eup %7496  ;;  %6519 = vmatpush1.bf16.msra.mxu0 %v10116_v50  ;;  %6551 = vmatpush1.bf16.msra.mxu1 %v10271_v56 }
 0x491   :  { %v2435_v27 = vmul.f32 %v7497_v39, %v7495_v18  ;;  %6553 = vmatprep.subr.bf16.mxu0 %v10169_v53  ;;  %6585 = vmatprep.subr.bf16.mxu1 %v10170_v7  ;;  %v10276_v18 = vld [vmem:[#allocation77_spill] sm:$0xff] }
 0x492   :  { %v7499_v59 = vpop.eup %7498  ;;  %v10278_v39 = vld [vmem:[#allocation45_spill] sm:$0xff] }
 0x493   :  { %v2606_v24 = vadd.f32 1.0, %v7499_v59  ;;  %2899 = vmatmul.mubr.f32.vlgmr.msra.gmra.mrb[26].mxu0 %v2435_v27  ;;  %2970 = vmatmul.mubr.f32.vlgmr.msra.gmra.mrb[26].mxu1 %v2435_v27 }
 0x494   :  { %v7501_v49 = vpop.eup %7500  ;;  %6555 = vmatpush1.bf16.msra.mxu0 %v10221_v17  ;;  %6587 = vmatpush1.bf16.msra.mxu1 %v10222_v31 }
 0x495   :  { %7504 = vrcp.f32 %v2606_v24  ;;  %v2615_v58 = vadd.f32 1.0, %v7501_v49  ;;  %6557 = vmatprep.subr.bf16.mxu0 %v10223_v45  ;;  %6589 = vmatprep.subr.bf16.mxu1 %v10224_v22  ;;  %v7503_v54 = vpop.eup %7502  ;;  %v10280_v24 = vld [vmem:[#allocation79_spill] sm:$0xff]  ;;  %v10281_v49 = vld [vmem:[#allocation80_spill] sm:$0xff] }
 0x496   :  { %7506 = vtanh.f32 %v2618_v29  ;;  %3096 = vmatprep.mubr.f32.mxu0 %v10072_v46  ;;  %3167 = vmatprep.mubr.f32.mxu1 %v10072_v46  ;;  %v2626_v5 = vadd.f32 1.0, %v7503_v54  ;;  %v10283_v54 = vld [vmem:[#allocation82_spill] sm:$0xff] }
 0x497   :  { %7508 = vrcp.f32 %v2615_v58  ;;  %v10282_v58 = vld [vmem:[#allocation81_spill] sm:$0xff] }
 0x498   :  { %6559 = vmatpush1.bf16.msra.mxu0 %v10175_v43  ;;  %6591 = vmatpush1.bf16.msra.mxu1 %v10176_v37  ;;  %7510 = vrcp.f32 %v2626_v5  ;;  %v10291_v5 = vld [vmem:[#allocation90_spill] sm:$0xff] }
 0x499   :  { %6561 = vmatprep.subr.bf16.mxu0 %v10177_v52  ;;  %6593 = vmatprep.subr.bf16.mxu1 %v10225_v9 }
 0x49c   :  { %6563 = vmatpush1.bf16.msra.mxu0 %v10272_v20  ;;  %6595 = vmatpush1.bf16.msra.mxu1 %v10273_v36 }
 0x49d   :  { %6565 = vmatprep.subr.bf16.mxu0 %v10181_v48  ;;  %6597 = vmatprep.subr.bf16.mxu1 %v10182_v60 }
 0x49f   :  { %v7505_v30 = vpop.eup %7504 }
 0x4a0   :  { %v7507_v21 = vpop.eup %7506  ;;  %6567 = vmatpush1.bf16.msra.mxu0 %v10274_v1  ;;  %6599 = vmatpush1.bf16.msra.mxu1 %v10275_v34  ;;  %v10284_v34 = vld [vmem:[#allocation83_spill] sm:$0xff] }
 0x4a1   :  { %v7509_v19 = vpop.eup %7508  ;;  %6569 = vmatprep.subr.bf16.mxu0 %v10276_v18  ;;  %6601 = vmatprep.subr.bf16.mxu1 %v10277_v2  ;;  %v2630_v29 = vmul.f32 %v7507_v21, %v7505_v30  ;;  %v10285_v18 = vld [vmem:[#allocation84_spill] sm:$0xff]  ;;  %v10286_v2 = vld [vmem:[#allocation85_spill] sm:$0xff]  ;;  %v10287_v30 = vld [vmem:[#allocation86_spill] sm:$0xff] }
 0x4a2   :  { %v2629_v59 = vmul.f32 %v7509_v19, %v10278_v39  ;;  %v10288_v21 = vld [vmem:[#allocation87_spill] sm:$0xff]  ;;  %v10289_v19 = vld [vmem:[#allocation88_spill] sm:$0xff]  ;;  %v10290_v39 = vld [vmem:[#allocation89_spill] sm:$0xff] }
 0x4a4   :  { %v9230_v27 = vadd.f32 %v2630_v29, %v2629_v59  ;;  %6571 = vmatpush1.bf16.msra.mxu0 %v10280_v24  ;;  %6603 = vmatpush1.bf16.msra.mxu1 %v10281_v49  ;;  %v7511_v59 = vpop.eup %7510 }
 0x4a5   :  { %6573 = vmatprep.subr.bf16.mxu0 %v10282_v58  ;;  %6605 = vmatprep.subr.bf16.mxu1 %v10283_v54  ;;  %v10292_v54 = vld [vmem:[#allocation91_spill] sm:$0xff]  ;;  %v10293_v58 = vld [vmem:[#allocation92_spill] sm:$0xff] }
 0x4a6   :  { %10279 = vst [vmem:[#allocation46_spill] sm:$0xff] %v9230_v27  ;;  %7512 = vtanh.f32 %v9230_v27 }
 0x4a8   :  { %6575 = vmatpush1.bf16.msra.mxu0 %v10284_v34  ;;  %6607 = vmatpush1.bf16.msra.mxu1 %v10285_v18  ;;  %v10294_v18 = vld [vmem:[#allocation8_spill] sm:$0xff] }
 0x4a9   :  { %6577 = vmatprep.subr.bf16.mxu0 %v10286_v2  ;;  %6609 = vmatprep.subr.bf16.mxu1 %v10287_v30  ;;  %v10295_v2 = vld [vmem:[#allocation9_spill] sm:$0xff] }
 0x4ac   :  { %6579 = vmatpush1.bf16.msra.mxu0 %v10288_v21  ;;  %6611 = vmatpush1.bf16.msra.mxu1 %v10289_v19  ;;  %v10296_v21 = vld [vmem:[#allocation10_spill] sm:$0xff]  ;;  %v10297_v19 = vld [vmem:[#allocation11_spill] sm:$0xff] }
 0x4ad   :  { %6581 = vmatprep.subr.bf16.mxu0 %v10290_v39  ;;  %6613 = vmatprep.subr.bf16.mxu1 %v10291_v5  ;;  %v10298_v39 = vld [vmem:[#allocation12_spill] sm:$0xff]  ;;  %v10299_v5 = vld [vmem:[#allocation13_spill] sm:$0xff] }
 0x4b0   :  { %v7513_v29 = vpop.eup %7512  ;;  %6583 = vmatpush1.bf16.msra.mxu0 %v10292_v54  ;;  %6615 = vmatpush1.bf16.msra.mxu1 %v10293_v58  ;;  %v10300_v58 = vld [vmem:[#allocation14_spill] sm:$0xff]  ;;  %v10310_v54 = vld [vmem:[#allocation24_spill] sm:$0xff] }
 0x4b1   :  { %v2633_v34 = vmul.f32 %v7513_v29, %v7511_v59  ;;  %6617 = vmatprep.subr.bf16.mxu0 %v10294_v18  ;;  %6649 = vmatprep.subr.bf16.mxu1 %v10295_v2  ;;  %v10301_v59 = vld [vmem:[#allocation15_spill] sm:$0xff]  ;;  %v10302_v29 = vld [vmem:[#allocation16_spill] sm:$0xff]  ;;  %v10303_v2 = vld [vmem:[#allocation17_spill] sm:$0xff] }
 0x4b2   :  { %v10309_v18 = vld [vmem:[#allocation23_spill] sm:$0xff] }
 0x4b3   :  { %3097 = vmatmul.mubr.f32.vlgmr.msra.gmra.mrb[28].mxu0 %v2633_v34  ;;  %3168 = vmatmul.mubr.f32.vlgmr.msra.gmra.mrb[28].mxu1 %v2633_v34  ;;  %v10304_v34 = vld [vmem:[#allocation18_spill] sm:$0xff] }
 0x4b4   :  { %6619 = vmatpush1.bf16.msra.mxu0 %v10296_v21  ;;  %6651 = vmatpush1.bf16.msra.mxu1 %v10297_v19  ;;  %v10305_v21 = vld [vmem:[#allocation19_spill] sm:$0xff]  ;;  %v10306_v19 = vld [vmem:[#allocation20_spill] sm:$0xff] }
 0x4b5   :  { %6621 = vmatprep.subr.bf16.mxu0 %v10298_v39  ;;  %6653 = vmatprep.subr.bf16.mxu1 %v10299_v5  ;;  %v10307_v39 = vld [vmem:[#allocation21_spill] sm:$0xff]  ;;  %v10308_v5 = vld [vmem:[#allocation22_spill] sm:$0xff] }
 0x4b6   :  { %3294 = vmatprep.mubr.f32.mxu0 %v10072_v46  ;;  %3365 = vmatprep.mubr.f32.mxu1 %v10072_v46 }
 0x4b8   :  { %6623 = vmatpush1.bf16.msra.mxu0 %v10300_v58  ;;  %6655 = vmatpush1.bf16.msra.mxu1 %v10301_v59  ;;  %v10311_v58 = vld [vmem:[#allocation25_spill] sm:$0xff]  ;;  %v10312_v59 = vld [vmem:[#allocation26_spill] sm:$0xff] }
 0x4b9   :  { %6625 = vmatprep.subr.bf16.mxu0 %v10302_v29  ;;  %6657 = vmatprep.subr.bf16.mxu1 %v10303_v2  ;;  %v10313_v29 = vld [vmem:[#allocation27_spill] sm:$0xff]  ;;  %v10314_v2 = vld [vmem:[#allocation28_spill] sm:$0xff] }
 0x4bc   :  { %6627 = vmatpush1.bf16.msra.mxu0 %v10304_v34  ;;  %6659 = vmatpush1.bf16.msra.mxu1 %v10305_v21  ;;  %v10315_v34 = vld [vmem:[#allocation29_spill] sm:$0xff]  ;;  %v10316_v21 = vld [vmem:[#allocation30_spill] sm:$0xff] }
 0x4bd   :  { %6629 = vmatprep.subr.bf16.mxu0 %v10306_v19  ;;  %6661 = vmatprep.subr.bf16.mxu1 %v10307_v39  ;;  %v10317_v19 = vld [vmem:[#allocation31_spill] sm:$0xff]  ;;  %v10318_v39 = vld [vmem:[#allocation32_spill] sm:$0xff] }
 0x4c0   :  { %6631 = vmatpush1.bf16.msra.mxu0 %v10308_v5  ;;  %6663 = vmatpush1.bf16.msra.mxu1 %v10309_v18  ;;  %v10319_v5 = vld [vmem:[#allocation33_spill] sm:$0xff]  ;;  %v10320_v18 = vld [vmem:[#allocation34_spill] sm:$0xff] }
 0x4c1   :  { %6633 = vmatprep.subr.bf16.mxu0 %v10310_v54  ;;  %6665 = vmatprep.subr.bf16.mxu1 %v10311_v58  ;;  %v10321_v54 = vld [vmem:[#allocation35_spill] sm:$0xff]  ;;  %v10322_v58 = vld [vmem:[#allocation36_spill] sm:$0xff] }
 0x4c4   :  { %6635 = vmatpush1.bf16.msra.mxu0 %v10312_v59  ;;  %6667 = vmatpush1.bf16.msra.mxu1 %v10313_v29  ;;  %v10323_v59 = vld [vmem:[#allocation37_spill] sm:$0xff]  ;;  %v10324_v29 = vld [vmem:[#allocation38_spill] sm:$0xff] }
 0x4c5   :  { %6637 = vmatprep.subr.bf16.mxu0 %v10314_v2  ;;  %6669 = vmatprep.subr.bf16.mxu1 %v10315_v34  ;;  %v10325_v2 = vld [vmem:[#allocation39_spill] sm:$0xff]  ;;  %v10326_v34 = vld [vmem:[#allocation40_spill] sm:$0xff] }
 0x4c8   :  { %6639 = vmatpush1.bf16.msra.mxu0 %v10316_v21  ;;  %6671 = vmatpush1.bf16.msra.mxu1 %v10317_v19  ;;  %v10327_v21 = vld [vmem:[#allocation41_spill] sm:$0xff] }
 0x4c9   :  { %6641 = vmatprep.subr.bf16.mxu0 %v10318_v39  ;;  %6673 = vmatprep.subr.bf16.mxu1 %v10319_v5 }
 0x4cc   :  { %6643 = vmatpush1.bf16.msra.mxu0 %v10320_v18  ;;  %6675 = vmatpush1.bf16.msra.mxu1 %v10321_v54 }
 0x4cd   :  { %6645 = vmatprep.subr.bf16.mxu0 %v10322_v58  ;;  %6677 = vmatprep.subr.bf16.mxu1 %v10323_v59 }
 0x4d0   :  { %6647 = vmatpush1.bf16.msra.mxu0 %v10324_v29  ;;  %6679 = vmatpush1.bf16.msra.mxu1 %v10325_v2  ;;  %v5484_v29 = vld [vmem:[%s9812_s0 + $0x20] sm:$0xff] }
 0x4d1   :  { %6681 = vmatprep.subr.bf16.mxu0 %v10326_v34  ;;  %6713 = vmatprep.subr.bf16.mxu1 %v10327_v21 }
 0x546   :  { %v2702_v19 = vpop.f32.mrb[24].mxu0  ;;  %v2773_v39 = vpop.f32.mrb[24].mxu1 }
 0x547   :  { %v2704_v30 = vpop.f32.mrb[25].mxu0  ;;  %v2775_v5 = vpop.f32.mrb[25].mxu1 }
 0x548   :  { %v2782_v49 = vcombine.low %v2702_v19, %v2704_v30  ;;  %v2783_v18 = vcombine.low %v2773_v39, %v2775_v5 }
 0x54a   :  { %v2790_v54 = vrot.slane %v2782_v49, %v8768_v14  ;;  %v2797_v58 = vrot.slane %v2783_v18, %v8768_v14 }
 0x54c   :  { %v2798_v59 = vcombine.low %v2790_v54, %v2797_v58 }
 0x54e   :  { %v2800_v2 = vadd.f32 %v5484_v29, %v2798_v59 }
 0x550   :  { %v5485_v24 = vmul.f32 -1.442695, %v2800_v2  ;;  %v2808_v34 = vrot.slane %v2800_v2, 2  ;;  %v2819_v27 = vrot.slane %v2800_v2, 6  ;;  %v2816_v30 = vrot.slane %v2800_v2, 4 }
 0x552   :  { %7514 = vpow2.f32 %v5485_v24  ;;  %v5486_v21 = vmul.f32 -1.442695, %v2808_v34  ;;  %v5487_v1 = vmul.f32 -1.442695, %v2819_v27 }
 0x554   :  { %7516 = vpow2.f32 %v5486_v21 }
 0x555   :  { %7518 = vpow2.f32 %v5487_v1  ;;  %v5488_v1 = vld [vmem:[%s9813_s1 + $0x20] sm:$0xff] }
 0x55c   :  { %v7515_v60 = vpop.eup %7514 }
 0x55d   :  { %v2804_v19 = vadd.f32 1.0, %v7515_v60 }
 0x55e   :  { %v7517_v39 = vpop.eup %7516 }
 0x55f   :  { %7520 = vrcp.f32 %v2804_v19  ;;  %v2813_v18 = vadd.f32 1.0, %v7517_v39  ;;  %v7519_v59 = vpop.eup %7518 }
 0x560   :  { %7522 = vtanh.f32 %v2816_v30  ;;  %v2824_v30 = vadd.f32 1.0, %v7519_v59 }
 0x561   :  { %7524 = vrcp.f32 %v2813_v18 }
 0x562   :  { %7526 = vrcp.f32 %v2824_v30 }
 0x566   :  { %v2900_v49 = vpop.f32.mrb[26].mxu0  ;;  %v2971_v5 = vpop.f32.mrb[26].mxu1 }
 0x567   :  { %v2902_v58 = vpop.f32.mrb[27].mxu0  ;;  %v2973_v54 = vpop.f32.mrb[27].mxu1 }
 0x568   :  { %v2980_v29 = vcombine.low %v2900_v49, %v2902_v58  ;;  %v2981_v24 = vcombine.low %v2971_v5, %v2973_v54 }
 0x569   :  { %v7521_v34 = vpop.eup %7520 }
 0x56a   :  { %v7523_v21 = vpop.eup %7522  ;;  %v2988_v27 = vrot.slane %v2980_v29, %v8768_v14  ;;  %v2995_v2 = vrot.slane %v2981_v24, %v8768_v14 }
 0x56b   :  { %v7525_v60 = vpop.eup %7524  ;;  %v2828_v18 = vmul.f32 %v7523_v21, %v7521_v34 }
 0x56c   :  { %v2996_v19 = vcombine.low %v2988_v27, %v2995_v2  ;;  %v2827_v39 = vmul.f32 %v7525_v60, %v9165_v15  ;;  %v7527_v29 = vpop.eup %7526 }
 0x56e   :  { %v2998_v48 = vadd.f32 %v5488_v1, %v2996_v19  ;;  %v9294_v36 = vadd.f32 %v2828_v18, %v2827_v39 }
 0x570   :  { %v5489_v49 = vmul.f32 -1.442695, %v2998_v48  ;;  %v3006_v5 = vrot.slane %v2998_v48, 2  ;;  %7528 = vtanh.f32 %v9294_v36  ;;  %v3017_v54 = vrot.slane %v2998_v48, 6 }
 0x571   :  { %v3014_v27 = vrot.slane %v2998_v48, 4 }
 0x572   :  { %7530 = vpow2.f32 %v5489_v49  ;;  %v5490_v58 = vmul.f32 -1.442695, %v3006_v5  ;;  %v5491_v24 = vmul.f32 -1.442695, %v3017_v54 }
 0x574   :  { %7532 = vpow2.f32 %v5490_v58 }
 0x575   :  { %7534 = vpow2.f32 %v5491_v24 }
 0x57a   :  { %v7529_v20 = vpop.eup %7528 }
 0x57b   :  { %v2831_v2 = vmul.f32 %v7529_v20, %v7527_v29  ;;  %v5492_v29 = vld [vmem:[%s9814_s2 + $0x20] sm:$0xff] }
 0x57c   :  { %v7531_v59 = vpop.eup %7530 }
 0x57d   :  { %v3002_v15 = vadd.f32 1.0, %v7531_v59  ;;  %3295 = vmatmul.mubr.f32.vlgmr.msra.gmra.mrb[30].mxu0 %v2831_v2  ;;  %3366 = vmatmul.mubr.f32.vlgmr.msra.gmra.mrb[30].mxu1 %v2831_v2 }
 0x57e   :  { %v7533_v34 = vpop.eup %7532  ;;  %6683 = vmatpush1.bf16.msra.mxu0 %v8182_v10  ;;  %6715 = vmatpush1.bf16.msra.mxu1 %v8186_v11 }
 0x57f   :  { %7536 = vrcp.f32 %v3002_v15  ;;  %v3011_v21 = vadd.f32 1.0, %v7533_v34  ;;  %6685 = vmatprep.subr.bf16.mxu0 %v8188_v12  ;;  %6717 = vmatprep.subr.bf16.mxu1 %v8200_v23  ;;  %v7535_v30 = vpop.eup %7534 }
 0x580   :  { %7538 = vtanh.f32 %v3014_v27  ;;  %3492 = vmatprep.mubr.f32.mxu0 %v10072_v46  ;;  %3563 = vmatprep.mubr.f32.mxu1 %v10072_v46  ;;  %v3022_v24 = vadd.f32 1.0, %v7535_v30 }
 0x581   :  { %7540 = vrcp.f32 %v3011_v21 }
 0x582   :  { %6687 = vmatpush1.bf16.msra.mxu0 %v8220_v33  ;;  %6719 = vmatpush1.bf16.msra.mxu1 %v8224_v38  ;;  %7542 = vrcp.f32 %v3022_v24 }
 0x583   :  { %6689 = vmatprep.subr.bf16.mxu0 %v8226_v41  ;;  %6721 = vmatprep.subr.bf16.mxu1 %v8238_v47 }
 0x586   :  { %v3098_v48 = vpop.f32.mrb[28].mxu0  ;;  %v3169_v20 = vpop.f32.mrb[28].mxu1  ;;  %6691 = vmatpush1.bf16.msra.mxu0 %v8258_v61  ;;  %6723 = vmatpush1.bf16.msra.mxu1 %v8262_v62 }
 0x587   :  { %v3100_v60 = vpop.f32.mrb[29].mxu0  ;;  %v3171_v1 = vpop.f32.mrb[29].mxu1  ;;  %6693 = vmatprep.subr.bf16.mxu0 %v8264_v3  ;;  %6725 = vmatprep.subr.bf16.mxu1 %v10155_v40 }
 0x588   :  { %v3178_v19 = vcombine.low %v3098_v48, %v3100_v60  ;;  %v3179_v39 = vcombine.low %v3169_v20, %v3171_v1 }
 0x589   :  { %v7537_v18 = vpop.eup %7536 }
 0x58a   :  { %v7539_v49 = vpop.eup %7538  ;;  %v3186_v5 = vrot.slane %v3178_v19, %v8768_v14  ;;  %v3193_v58 = vrot.slane %v3179_v39, %v8768_v14  ;;  %6695 = vmatpush1.bf16.msra.mxu0 %v10156_v63  ;;  %6727 = vmatpush1.bf16.msra.mxu1 %v10157_v35 }
 0x58b   :  { %v7541_v54 = vpop.eup %7540  ;;  %6697 = vmatprep.subr.bf16.mxu0 %v10102_v25  ;;  %6729 = vmatprep.subr.bf16.mxu1 %v10103_v0  ;;  %v3026_v2 = vmul.f32 %v7539_v49, %v7537_v18 }
 0x58c   :  { %v3194_v59 = vcombine.low %v3186_v5, %v3193_v58  ;;  %v3025_v27 = vmul.f32 %v7541_v54, %v9192_v42  ;;  %v7543_v60 = vpop.eup %7542  ;;  %v10328_v54 = vld [vmem:[#allocation71_spill] sm:$0xff] }
 0x58e   :  { %v3196_v15 = vadd.f32 %v5492_v29, %v3194_v59  ;;  %v9321_v34 = vadd.f32 %v3026_v2, %v3025_v27  ;;  %6699 = vmatpush1.bf16.msra.mxu0 %v10104_v16  ;;  %6731 = vmatpush1.bf16.msra.mxu1 %v10105_v32  ;;  %v10329_v29 = vld [vmem:[#allocation72_spill] sm:$0xff]  ;;  %v10330_v59 = vld [vmem:[#allocation73_spill] sm:$0xff]  ;;  %v10331_v27 = vld [vmem:[#allocation74_spill] sm:$0xff] }
 0x58f   :  { %6701 = vmatprep.subr.bf16.mxu0 %v10158_v51  ;;  %6733 = vmatprep.subr.bf16.mxu1 %v10159_v44 }
 0x590   :  { %v5493_v21 = vmul.f32 -1.442695, %v3196_v15  ;;  %v3204_v48 = vrot.slane %v3196_v15, 2  ;;  %7544 = vtanh.f32 %v9321_v34  ;;  %v3215_v42 = vrot.slane %v3196_v15, 6 }
 0x591   :  { %v3212_v39 = vrot.slane %v3196_v15, 4 }
 0x592   :  { %7546 = vpow2.f32 %v5493_v21  ;;  %v5494_v20 = vmul.f32 -1.442695, %v3204_v48  ;;  %6703 = vmatpush1.bf16.msra.mxu0 %v10212_v26  ;;  %6735 = vmatpush1.bf16.msra.mxu1 %v10213_v28  ;;  %v5495_v1 = vmul.f32 -1.442695, %v3215_v42  ;;  %v10333_v42 = vld [vmem:[#allocation76_spill] sm:$0xff] }
 0x593   :  { %6705 = vmatprep.subr.bf16.mxu0 %v10214_v6  ;;  %6737 = vmatprep.subr.bf16.mxu1 %v10215_v8 }
 0x594   :  { %7548 = vpow2.f32 %v5494_v20  ;;  %v10332_v20 = vld [vmem:[#allocation75_spill] sm:$0xff] }
 0x595   :  { %7550 = vpow2.f32 %v5495_v1  ;;  %v10335_v1 = vld [vmem:[#allocation78_spill] sm:$0xff] }
 0x596   :  { %6707 = vmatpush1.bf16.msra.mxu0 %v10216_v57  ;;  %6739 = vmatpush1.bf16.msra.mxu1 %v10217_v4 }
 0x597   :  { %6709 = vmatprep.subr.bf16.mxu0 %v10218_v13  ;;  %6741 = vmatprep.subr.bf16.mxu1 %v10270_v55 }
 0x59a   :  { %v7545_v30 = vpop.eup %7544  ;;  %6711 = vmatpush1.bf16.msra.mxu0 %v10116_v50  ;;  %6743 = vmatpush1.bf16.msra.mxu1 %v10271_v56 }
 0x59b   :  { %v3029_v18 = vmul.f32 %v7545_v30, %v7543_v60  ;;  %6745 = vmatprep.subr.bf16.mxu0 %v10169_v53  ;;  %6777 = vmatprep.subr.bf16.mxu1 %v10170_v7  ;;  %v10334_v60 = vld [vmem:[#allocation77_spill] sm:$0xff]  ;;  %v10336_v30 = vld [vmem:[#allocation46_spill] sm:$0xff] }
 0x59c   :  { %v7547_v19 = vpop.eup %7546 }
 0x59d   :  { %v3200_v49 = vadd.f32 1.0, %v7547_v19  ;;  %3493 = vmatmul.mubr.f32.vlgmr.msra.gmra.mrb[32].mxu0 %v3029_v18  ;;  %3564 = vmatmul.mubr.f32.vlgmr.msra.gmra.mrb[32].mxu1 %v3029_v18 }
 0x59e   :  { %v7549_v5 = vpop.eup %7548  ;;  %6747 = vmatpush1.bf16.msra.mxu0 %v10221_v17  ;;  %6779 = vmatpush1.bf16.msra.mxu1 %v10222_v31 }
 0x59f   :  { %7552 = vrcp.f32 %v3200_v49  ;;  %v3209_v58 = vadd.f32 1.0, %v7549_v5  ;;  %6749 = vmatprep.subr.bf16.mxu0 %v10223_v45  ;;  %6781 = vmatprep.subr.bf16.mxu1 %v10224_v22  ;;  %v7551_v24 = vpop.eup %7550  ;;  %v10338_v49 = vld [vmem:[#allocation79_spill] sm:$0xff]  ;;  %v10339_v5 = vld [vmem:[#allocation80_spill] sm:$0xff] }
 0x5a0   :  { %7554 = vtanh.f32 %v3212_v39  ;;  %3690 = vmatprep.mubr.f32.mxu0 %v10072_v46  ;;  %3761 = vmatprep.mubr.f32.mxu1 %v10072_v46  ;;  %v3220_v48 = vadd.f32 1.0, %v7551_v24  ;;  %v10341_v24 = vld [vmem:[#allocation82_spill] sm:$0xff] }
 0x5a1   :  { %7556 = vrcp.f32 %v3209_v58  ;;  %v10340_v58 = vld [vmem:[#allocation81_spill] sm:$0xff] }
 0x5a2   :  { %6751 = vmatpush1.bf16.msra.mxu0 %v10175_v43  ;;  %6783 = vmatpush1.bf16.msra.mxu1 %v10176_v37  ;;  %7558 = vrcp.f32 %v3220_v48  ;;  %v10349_v48 = vld [vmem:[#allocation90_spill] sm:$0xff] }
 0x5a3   :  { %6753 = vmatprep.subr.bf16.mxu0 %v10177_v52  ;;  %6785 = vmatprep.subr.bf16.mxu1 %v10225_v9 }
 0x5a6   :  { %6755 = vmatpush1.bf16.msra.mxu0 %v10328_v54  ;;  %6787 = vmatpush1.bf16.msra.mxu1 %v10329_v29 }
 0x5a7   :  { %6757 = vmatprep.subr.bf16.mxu0 %v10330_v59  ;;  %6789 = vmatprep.subr.bf16.mxu1 %v10331_v27 }
 0x5a9   :  { %v7553_v2 = vpop.eup %7552 }
 0x5aa   :  { %v7555_v15 = vpop.eup %7554  ;;  %6759 = vmatpush1.bf16.msra.mxu0 %v10332_v20  ;;  %6791 = vmatpush1.bf16.msra.mxu1 %v10333_v42  ;;  %v10342_v42 = vld [vmem:[#allocation83_spill] sm:$0xff] }
 0x5ab   :  { %v7557_v21 = vpop.eup %7556  ;;  %6761 = vmatprep.subr.bf16.mxu0 %v10334_v60  ;;  %6793 = vmatprep.subr.bf16.mxu1 %v10335_v1  ;;  %v3224_v39 = vmul.f32 %v7555_v15, %v7553_v2  ;;  %v10343_v60 = vld [vmem:[#allocation84_spill] sm:$0xff]  ;;  %v10344_v1 = vld [vmem:[#allocation85_spill] sm:$0xff]  ;;  %v10345_v2 = vld [vmem:[#allocation86_spill] sm:$0xff] }
 0x5ac   :  { %v3223_v19 = vmul.f32 %v7557_v21, %v10336_v30  ;;  %v10346_v15 = vld [vmem:[#allocation87_spill] sm:$0xff]  ;;  %v10347_v21 = vld [vmem:[#allocation88_spill] sm:$0xff]  ;;  %v10348_v30 = vld [vmem:[#allocation89_spill] sm:$0xff] }
 0x5ae   :  { %v9359_v18 = vadd.f32 %v3224_v39, %v3223_v19  ;;  %6763 = vmatpush1.bf16.msra.mxu0 %v10338_v49  ;;  %6795 = vmatpush1.bf16.msra.mxu1 %v10339_v5  ;;  %v7559_v19 = vpop.eup %7558 }
 0x5af   :  { %6765 = vmatprep.subr.bf16.mxu0 %v10340_v58  ;;  %6797 = vmatprep.subr.bf16.mxu1 %v10341_v24  ;;  %v10350_v24 = vld [vmem:[#allocation91_spill] sm:$0xff]  ;;  %v10351_v58 = vld [vmem:[#allocation92_spill] sm:$0xff] }
 0x5b0   :  { %10337 = vst [vmem:[#allocation47_spill] sm:$0xff] %v9359_v18  ;;  %7560 = vtanh.f32 %v9359_v18 }
 0x5b2   :  { %6767 = vmatpush1.bf16.msra.mxu0 %v10342_v42  ;;  %6799 = vmatpush1.bf16.msra.mxu1 %v10343_v60  ;;  %v10352_v60 = vld [vmem:[#allocation8_spill] sm:$0xff] }
 0x5b3   :  { %6769 = vmatprep.subr.bf16.mxu0 %v10344_v1  ;;  %6801 = vmatprep.subr.bf16.mxu1 %v10345_v2  ;;  %v10353_v1 = vld [vmem:[#allocation9_spill] sm:$0xff] }
 0x5b6   :  { %6771 = vmatpush1.bf16.msra.mxu0 %v10346_v15  ;;  %6803 = vmatpush1.bf16.msra.mxu1 %v10347_v21  ;;  %v10354_v15 = vld [vmem:[#allocation10_spill] sm:$0xff]  ;;  %v10355_v21 = vld [vmem:[#allocation11_spill] sm:$0xff] }
 0x5b7   :  { %6773 = vmatprep.subr.bf16.mxu0 %v10348_v30  ;;  %6805 = vmatprep.subr.bf16.mxu1 %v10349_v48  ;;  %v10356_v30 = vld [vmem:[#allocation12_spill] sm:$0xff]  ;;  %v10357_v48 = vld [vmem:[#allocation13_spill] sm:$0xff] }
 0x5ba   :  { %v7561_v39 = vpop.eup %7560  ;;  %6775 = vmatpush1.bf16.msra.mxu0 %v10350_v24  ;;  %6807 = vmatpush1.bf16.msra.mxu1 %v10351_v58  ;;  %v10358_v58 = vld [vmem:[#allocation14_spill] sm:$0xff]  ;;  %v10368_v24 = vld [vmem:[#allocation24_spill] sm:$0xff] }
 0x5bb   :  { %v3227_v42 = vmul.f32 %v7561_v39, %v7559_v19  ;;  %6809 = vmatprep.subr.bf16.mxu0 %v10352_v60  ;;  %6841 = vmatprep.subr.bf16.mxu1 %v10353_v1  ;;  %v10359_v19 = vld [vmem:[#allocation15_spill] sm:$0xff]  ;;  %v10360_v39 = vld [vmem:[#allocation16_spill] sm:$0xff]  ;;  %v10361_v1 = vld [vmem:[#allocation17_spill] sm:$0xff] }
 0x5bc   :  { %v10367_v60 = vld [vmem:[#allocation23_spill] sm:$0xff] }
 0x5bd   :  { %3691 = vmatmul.mubr.f32.vlgmr.msra.gmra.mrb[34].mxu0 %v3227_v42  ;;  %3762 = vmatmul.mubr.f32.vlgmr.msra.gmra.mrb[34].mxu1 %v3227_v42  ;;  %v10362_v42 = vld [vmem:[#allocation18_spill] sm:$0xff] }
 0x5be   :  { %6811 = vmatpush1.bf16.msra.mxu0 %v10354_v15  ;;  %6843 = vmatpush1.bf16.msra.mxu1 %v10355_v21  ;;  %v10363_v15 = vld [vmem:[#allocation19_spill] sm:$0xff]  ;;  %v10364_v21 = vld [vmem:[#allocation20_spill] sm:$0xff] }
 0x5bf   :  { %6813 = vmatprep.subr.bf16.mxu0 %v10356_v30  ;;  %6845 = vmatprep.subr.bf16.mxu1 %v10357_v48  ;;  %v10365_v30 = vld [vmem:[#allocation21_spill] sm:$0xff]  ;;  %v10366_v48 = vld [vmem:[#allocation22_spill] sm:$0xff] }
 0x5c0   :  { %3888 = vmatprep.mubr.f32.mxu0 %v10072_v46  ;;  %3959 = vmatprep.mubr.f32.mxu1 %v10072_v46 }
 0x5c2   :  { %6815 = vmatpush1.bf16.msra.mxu0 %v10358_v58  ;;  %6847 = vmatpush1.bf16.msra.mxu1 %v10359_v19  ;;  %v10369_v58 = vld [vmem:[#allocation25_spill] sm:$0xff]  ;;  %v10370_v19 = vld [vmem:[#allocation26_spill] sm:$0xff] }
 0x5c3   :  { %6817 = vmatprep.subr.bf16.mxu0 %v10360_v39  ;;  %6849 = vmatprep.subr.bf16.mxu1 %v10361_v1  ;;  %v10371_v39 = vld [vmem:[#allocation27_spill] sm:$0xff]  ;;  %v10372_v1 = vld [vmem:[#allocation28_spill] sm:$0xff] }
 0x5c6   :  { %6819 = vmatpush1.bf16.msra.mxu0 %v10362_v42  ;;  %6851 = vmatpush1.bf16.msra.mxu1 %v10363_v15  ;;  %v10373_v42 = vld [vmem:[#allocation29_spill] sm:$0xff]  ;;  %v10374_v15 = vld [vmem:[#allocation30_spill] sm:$0xff] }
 0x5c7   :  { %6821 = vmatprep.subr.bf16.mxu0 %v10364_v21  ;;  %6853 = vmatprep.subr.bf16.mxu1 %v10365_v30  ;;  %v10375_v21 = vld [vmem:[#allocation31_spill] sm:$0xff]  ;;  %v10376_v30 = vld [vmem:[#allocation32_spill] sm:$0xff] }
 0x5ca   :  { %6823 = vmatpush1.bf16.msra.mxu0 %v10366_v48  ;;  %6855 = vmatpush1.bf16.msra.mxu1 %v10367_v60  ;;  %v10377_v48 = vld [vmem:[#allocation33_spill] sm:$0xff]  ;;  %v10378_v60 = vld [vmem:[#allocation34_spill] sm:$0xff] }
 0x5cb   :  { %6825 = vmatprep.subr.bf16.mxu0 %v10368_v24  ;;  %6857 = vmatprep.subr.bf16.mxu1 %v10369_v58  ;;  %v10379_v24 = vld [vmem:[#allocation35_spill] sm:$0xff]  ;;  %v10380_v58 = vld [vmem:[#allocation36_spill] sm:$0xff] }
 0x5ce   :  { %6827 = vmatpush1.bf16.msra.mxu0 %v10370_v19  ;;  %6859 = vmatpush1.bf16.msra.mxu1 %v10371_v39  ;;  %v10381_v19 = vld [vmem:[#allocation37_spill] sm:$0xff]  ;;  %v10382_v39 = vld [vmem:[#allocation38_spill] sm:$0xff] }
 0x5cf   :  { %6829 = vmatprep.subr.bf16.mxu0 %v10372_v1  ;;  %6861 = vmatprep.subr.bf16.mxu1 %v10373_v42  ;;  %v10383_v1 = vld [vmem:[#allocation39_spill] sm:$0xff]  ;;  %v10384_v42 = vld [vmem:[#allocation40_spill] sm:$0xff] }
 0x5d2   :  { %6831 = vmatpush1.bf16.msra.mxu0 %v10374_v15  ;;  %6863 = vmatpush1.bf16.msra.mxu1 %v10375_v21  ;;  %v10385_v15 = vld [vmem:[#allocation41_spill] sm:$0xff] }
 0x5d3   :  { %6833 = vmatprep.subr.bf16.mxu0 %v10376_v30  ;;  %6865 = vmatprep.subr.bf16.mxu1 %v10377_v48 }
 0x5d6   :  { %6835 = vmatpush1.bf16.msra.mxu0 %v10378_v60  ;;  %6867 = vmatpush1.bf16.msra.mxu1 %v10379_v24 }
 0x5d7   :  { %6837 = vmatprep.subr.bf16.mxu0 %v10380_v58  ;;  %6869 = vmatprep.subr.bf16.mxu1 %v10381_v19 }
 0x5da   :  { %6839 = vmatpush1.bf16.msra.mxu0 %v10382_v39  ;;  %6871 = vmatpush1.bf16.msra.mxu1 %v10383_v1  ;;  %v5496_v39 = vld [vmem:[%s9812_s0 + $0x28] sm:$0xff] }
 0x5db   :  { %6873 = vmatprep.subr.bf16.mxu0 %v10384_v42  ;;  %6905 = vmatprep.subr.bf16.mxu1 %v10385_v15 }
 0x650   :  { %v3296_v21 = vpop.f32.mrb[30].mxu0  ;;  %v3367_v30 = vpop.f32.mrb[30].mxu1 }
 0x651   :  { %v3298_v2 = vpop.f32.mrb[31].mxu0  ;;  %v3369_v48 = vpop.f32.mrb[31].mxu1 }
 0x652   :  { %v3376_v5 = vcombine.low %v3296_v21, %v3298_v2  ;;  %v3377_v60 = vcombine.low %v3367_v30, %v3369_v48 }
 0x654   :  { %v3384_v24 = vrot.slane %v3376_v5, %v8768_v14  ;;  %v3391_v58 = vrot.slane %v3377_v60, %v8768_v14 }
 0x656   :  { %v3392_v19 = vcombine.low %v3384_v24, %v3391_v58 }
 0x658   :  { %v3394_v1 = vadd.f32 %v5496_v39, %v3392_v19 }
 0x65a   :  { %v5497_v49 = vmul.f32 -1.442695, %v3394_v1  ;;  %v3402_v42 = vrot.slane %v3394_v1, 2  ;;  %v3413_v18 = vrot.slane %v3394_v1, 6  ;;  %v3410_v2 = vrot.slane %v3394_v1, 4 }
 0x65c   :  { %7562 = vpow2.f32 %v5497_v49  ;;  %v5498_v15 = vmul.f32 -1.442695, %v3402_v42  ;;  %v5499_v20 = vmul.f32 -1.442695, %v3413_v18 }
 0x65e   :  { %7564 = vpow2.f32 %v5498_v15 }
 0x65f   :  { %7566 = vpow2.f32 %v5499_v20  ;;  %v5500_v20 = vld [vmem:[%s9813_s1 + $0x28] sm:$0xff] }
 0x666   :  { %v7563_v27 = vpop.eup %7562 }
 0x667   :  { %v3398_v21 = vadd.f32 1.0, %v7563_v27 }
 0x668   :  { %v7565_v30 = vpop.eup %7564 }
 0x669   :  { %7568 = vrcp.f32 %v3398_v21  ;;  %v3407_v60 = vadd.f32 1.0, %v7565_v30  ;;  %v7567_v19 = vpop.eup %7566 }
 0x66a   :  { %7570 = vtanh.f32 %v3410_v2  ;;  %v3418_v2 = vadd.f32 1.0, %v7567_v19 }
 0x66b   :  { %7572 = vrcp.f32 %v3407_v60 }
 0x66c   :  { %7574 = vrcp.f32 %v3418_v2 }
 0x670   :  { %v3494_v5 = vpop.f32.mrb[32].mxu0  ;;  %v3565_v48 = vpop.f32.mrb[32].mxu1 }
 0x671   :  { %v3496_v58 = vpop.f32.mrb[33].mxu0  ;;  %v3567_v24 = vpop.f32.mrb[33].mxu1 }
 0x672   :  { %v3574_v39 = vcombine.low %v3494_v5, %v3496_v58  ;;  %v3575_v49 = vcombine.low %v3565_v48, %v3567_v24 }
 0x673   :  { %v7569_v42 = vpop.eup %7568 }
 0x674   :  { %v7571_v15 = vpop.eup %7570  ;;  %v3582_v18 = vrot.slane %v3574_v39, %v8768_v14  ;;  %v3589_v1 = vrot.slane %v3575_v49, %v8768_v14 }
 0x675   :  { %v7573_v27 = vpop.eup %7572  ;;  %v3422_v60 = vmul.f32 %v7571_v15, %v7569_v42 }
 0x676   :  { %v3590_v21 = vcombine.low %v3582_v18, %v3589_v1  ;;  %v3421_v30 = vmul.f32 %v7573_v27, %v9294_v36  ;;  %v7575_v39 = vpop.eup %7574 }
 0x678   :  { %v3592_v59 = vadd.f32 %v5500_v20, %v3590_v21  ;;  %v9423_v29 = vadd.f32 %v3422_v60, %v3421_v30 }
 0x67a   :  { %v5501_v5 = vmul.f32 -1.442695, %v3592_v59  ;;  %v3600_v48 = vrot.slane %v3592_v59, 2  ;;  %7576 = vtanh.f32 %v9423_v29  ;;  %v3611_v24 = vrot.slane %v3592_v59, 6 }
 0x67b   :  { %v3608_v18 = vrot.slane %v3592_v59, 4 }
 0x67c   :  { %7578 = vpow2.f32 %v5501_v5  ;;  %v5502_v58 = vmul.f32 -1.442695, %v3600_v48  ;;  %v5503_v49 = vmul.f32 -1.442695, %v3611_v24 }
 0x67e   :  { %7580 = vpow2.f32 %v5502_v58 }
 0x67f   :  { %7582 = vpow2.f32 %v5503_v49 }
 0x684   :  { %v7577_v54 = vpop.eup %7576 }
 0x685   :  { %v3425_v1 = vmul.f32 %v7577_v54, %v7575_v39  ;;  %v5504_v39 = vld [vmem:[%s9814_s2 + $0x28] sm:$0xff] }
 0x686   :  { %v7579_v19 = vpop.eup %7578 }
 0x687   :  { %v3596_v36 = vadd.f32 1.0, %v7579_v19  ;;  %3889 = vmatmul.mubr.f32.vlgmr.msra.gmra.mrb[36].mxu0 %v3425_v1  ;;  %3960 = vmatmul.mubr.f32.vlgmr.msra.gmra.mrb[36].mxu1 %v3425_v1 }
 0x688   :  { %v7581_v42 = vpop.eup %7580  ;;  %6875 = vmatpush1.bf16.msra.mxu0 %v8182_v10  ;;  %6907 = vmatpush1.bf16.msra.mxu1 %v8186_v11 }
 0x689   :  { %7584 = vrcp.f32 %v3596_v36  ;;  %v3605_v15 = vadd.f32 1.0, %v7581_v42  ;;  %6877 = vmatprep.subr.bf16.mxu0 %v8188_v12  ;;  %6909 = vmatprep.subr.bf16.mxu1 %v8200_v23  ;;  %v7583_v2 = vpop.eup %7582 }
 0x68a   :  { %7586 = vtanh.f32 %v3608_v18  ;;  %4086 = vmatprep.mubr.f32.mxu0 %v10072_v46  ;;  %4157 = vmatprep.mubr.f32.mxu1 %v10072_v46  ;;  %v3616_v49 = vadd.f32 1.0, %v7583_v2 }
 0x68b   :  { %7588 = vrcp.f32 %v3605_v15 }
 0x68c   :  { %6879 = vmatpush1.bf16.msra.mxu0 %v8220_v33  ;;  %6911 = vmatpush1.bf16.msra.mxu1 %v8224_v38  ;;  %7590 = vrcp.f32 %v3616_v49 }
 0x68d   :  { %6881 = vmatprep.subr.bf16.mxu0 %v8226_v41  ;;  %6913 = vmatprep.subr.bf16.mxu1 %v8238_v47 }
 0x690   :  { %v3692_v54 = vpop.f32.mrb[34].mxu0  ;;  %v3763_v59 = vpop.f32.mrb[34].mxu1  ;;  %6883 = vmatpush1.bf16.msra.mxu0 %v8258_v61  ;;  %6915 = vmatpush1.bf16.msra.mxu1 %v8262_v62 }
 0x691   :  { %v3694_v27 = vpop.f32.mrb[35].mxu0  ;;  %v3765_v20 = vpop.f32.mrb[35].mxu1  ;;  %6885 = vmatprep.subr.bf16.mxu0 %v8264_v3  ;;  %6917 = vmatprep.subr.bf16.mxu1 %v10155_v40 }
 0x692   :  { %v3772_v21 = vcombine.low %v3692_v54, %v3694_v27  ;;  %v3773_v30 = vcombine.low %v3763_v59, %v3765_v20 }
 0x693   :  { %v7585_v60 = vpop.eup %7584 }
 0x694   :  { %v7587_v5 = vpop.eup %7586  ;;  %v3780_v48 = vrot.slane %v3772_v21, %v8768_v14  ;;  %v3787_v58 = vrot.slane %v3773_v30, %v8768_v14  ;;  %6887 = vmatpush1.bf16.msra.mxu0 %v10156_v63  ;;  %6919 = vmatpush1.bf16.msra.mxu1 %v10157_v35 }
 0x695   :  { %v7589_v24 = vpop.eup %7588  ;;  %6889 = vmatprep.subr.bf16.mxu0 %v10102_v25  ;;  %6921 = vmatprep.subr.bf16.mxu1 %v10103_v0  ;;  %v3620_v1 = vmul.f32 %v7587_v5, %v7585_v60 }
 0x696   :  { %v3788_v19 = vcombine.low %v3780_v48, %v3787_v58  ;;  %v3619_v18 = vmul.f32 %v7589_v24, %v9321_v34  ;;  %v7591_v27 = vpop.eup %7590  ;;  %v10386_v24 = vld [vmem:[#allocation71_spill] sm:$0xff] }
 0x698   :  { %v3790_v36 = vadd.f32 %v5504_v39, %v3788_v19  ;;  %v9450_v42 = vadd.f32 %v3620_v1, %v3619_v18  ;;  %6891 = vmatpush1.bf16.msra.mxu0 %v10104_v16  ;;  %6923 = vmatpush1.bf16.msra.mxu1 %v10105_v32  ;;  %v10387_v39 = vld [vmem:[#allocation72_spill] sm:$0xff]  ;;  %v10388_v19 = vld [vmem:[#allocation73_spill] sm:$0xff]  ;;  %v10389_v18 = vld [vmem:[#allocation74_spill] sm:$0xff] }
 0x699   :  { %6893 = vmatprep.subr.bf16.mxu0 %v10158_v51  ;;  %6925 = vmatprep.subr.bf16.mxu1 %v10159_v44 }
 0x69a   :  { %v5505_v15 = vmul.f32 -1.442695, %v3790_v36  ;;  %v3798_v54 = vrot.slane %v3790_v36, 2  ;;  %7592 = vtanh.f32 %v9450_v42  ;;  %v3809_v34 = vrot.slane %v3790_v36, 6 }
 0x69b   :  { %v3806_v30 = vrot.slane %v3790_v36, 4 }
 0x69c   :  { %7594 = vpow2.f32 %v5505_v15  ;;  %v5506_v59 = vmul.f32 -1.442695, %v3798_v54  ;;  %6895 = vmatpush1.bf16.msra.mxu0 %v10212_v26  ;;  %6927 = vmatpush1.bf16.msra.mxu1 %v10213_v28  ;;  %v5507_v20 = vmul.f32 -1.442695, %v3809_v34  ;;  %v10391_v34 = vld [vmem:[#allocation76_spill] sm:$0xff] }
 0x69d   :  { %6897 = vmatprep.subr.bf16.mxu0 %v10214_v6  ;;  %6929 = vmatprep.subr.bf16.mxu1 %v10215_v8 }
 0x69e   :  { %7596 = vpow2.f32 %v5506_v59  ;;  %v10390_v59 = vld [vmem:[#allocation75_spill] sm:$0xff] }
 0x69f   :  { %7598 = vpow2.f32 %v5507_v20  ;;  %v10393_v20 = vld [vmem:[#allocation78_spill] sm:$0xff] }
 0x6a0   :  { %6899 = vmatpush1.bf16.msra.mxu0 %v10216_v57  ;;  %6931 = vmatpush1.bf16.msra.mxu1 %v10217_v4 }
 0x6a1   :  { %6901 = vmatprep.subr.bf16.mxu0 %v10218_v13  ;;  %6933 = vmatprep.subr.bf16.mxu1 %v10270_v55 }
 0x6a4   :  { %v7593_v2 = vpop.eup %7592  ;;  %6903 = vmatpush1.bf16.msra.mxu0 %v10116_v50  ;;  %6935 = vmatpush1.bf16.msra.mxu1 %v10271_v56 }
 0x6a5   :  { %v3623_v60 = vmul.f32 %v7593_v2, %v7591_v27  ;;  %6937 = vmatprep.subr.bf16.mxu0 %v10169_v53  ;;  %6969 = vmatprep.subr.bf16.mxu1 %v10170_v7  ;;  %v10392_v27 = vld [vmem:[#allocation77_spill] sm:$0xff]  ;;  %v10394_v2 = vld [vmem:[#allocation47_spill] sm:$0xff] }
 0x6a6   :  { %v7595_v21 = vpop.eup %7594 }
 0x6a7   :  { %v3794_v5 = vadd.f32 1.0, %v7595_v21  ;;  %4087 = vmatmul.mubr.f32.vlgmr.msra.gmra.mrb[38].mxu0 %v3623_v60  ;;  %4158 = vmatmul.mubr.f32.vlgmr.msra.gmra.mrb[38].mxu1 %v3623_v60 }
 0x6a8   :  { %v7597_v48 = vpop.eup %7596  ;;  %6939 = vmatpush1.bf16.msra.mxu0 %v10221_v17  ;;  %6971 = vmatpush1.bf16.msra.mxu1 %v10222_v31 }
 0x6a9   :  { %7600 = vrcp.f32 %v3794_v5  ;;  %v3803_v58 = vadd.f32 1.0, %v7597_v48  ;;  %6941 = vmatprep.subr.bf16.mxu0 %v10223_v45  ;;  %6973 = vmatprep.subr.bf16.mxu1 %v10224_v22  ;;  %v7599_v49 = vpop.eup %7598  ;;  %v10396_v5 = vld [vmem:[#allocation79_spill] sm:$0xff]  ;;  %v10397_v48 = vld [vmem:[#allocation80_spill] sm:$0xff] }
 0x6aa   :  { %7602 = vtanh.f32 %v3806_v30  ;;  %4284 = vmatprep.mubr.f32.mxu0 %v10072_v46  ;;  %4355 = vmatprep.mubr.f32.mxu1 %v10072_v46  ;;  %v3814_v54 = vadd.f32 1.0, %v7599_v49  ;;  %v10399_v49 = vld [vmem:[#allocation82_spill] sm:$0xff] }
 0x6ab   :  { %7604 = vrcp.f32 %v3803_v58  ;;  %v10398_v58 = vld [vmem:[#allocation81_spill] sm:$0xff] }
 0x6ac   :  { %6943 = vmatpush1.bf16.msra.mxu0 %v10175_v43  ;;  %6975 = vmatpush1.bf16.msra.mxu1 %v10176_v37  ;;  %7606 = vrcp.f32 %v3814_v54  ;;  %v10407_v54 = vld [vmem:[#allocation90_spill] sm:$0xff] }
 0x6ad   :  { %6945 = vmatprep.subr.bf16.mxu0 %v10177_v52  ;;  %6977 = vmatprep.subr.bf16.mxu1 %v10225_v9 }
 0x6b0   :  { %6947 = vmatpush1.bf16.msra.mxu0 %v10386_v24  ;;  %6979 = vmatpush1.bf16.msra.mxu1 %v10387_v39 }
 0x6b1   :  { %6949 = vmatprep.subr.bf16.mxu0 %v10388_v19  ;;  %6981 = vmatprep.subr.bf16.mxu1 %v10389_v18 }
 0x6b3   :  { %v7601_v1 = vpop.eup %7600 }
 0x6b4   :  { %v7603_v36 = vpop.eup %7602  ;;  %6951 = vmatpush1.bf16.msra.mxu0 %v10390_v59  ;;  %6983 = vmatpush1.bf16.msra.mxu1 %v10391_v34  ;;  %v10400_v34 = vld [vmem:[#allocation83_spill] sm:$0xff] }
 0x6b5   :  { %v7605_v15 = vpop.eup %7604  ;;  %6953 = vmatprep.subr.bf16.mxu0 %v10392_v27  ;;  %6985 = vmatprep.subr.bf16.mxu1 %v10393_v20  ;;  %v3818_v30 = vmul.f32 %v7603_v36, %v7601_v1  ;;  %v10401_v27 = vld [vmem:[#allocation84_spill] sm:$0xff]  ;;  %v10402_v20 = vld [vmem:[#allocation85_spill] sm:$0xff]  ;;  %v10403_v1 = vld [vmem:[#allocation86_spill] sm:$0xff] }
 0x6b6   :  { %v3817_v21 = vmul.f32 %v7605_v15, %v10394_v2  ;;  %v10404_v36 = vld [vmem:[#allocation87_spill] sm:$0xff]  ;;  %v10405_v15 = vld [vmem:[#allocation88_spill] sm:$0xff]  ;;  %v10406_v2 = vld [vmem:[#allocation89_spill] sm:$0xff] }
 0x6b8   :  { %v9488_v60 = vadd.f32 %v3818_v30, %v3817_v21  ;;  %6955 = vmatpush1.bf16.msra.mxu0 %v10396_v5  ;;  %6987 = vmatpush1.bf16.msra.mxu1 %v10397_v48  ;;  %v7607_v21 = vpop.eup %7606 }
 0x6b9   :  { %6957 = vmatprep.subr.bf16.mxu0 %v10398_v58  ;;  %6989 = vmatprep.subr.bf16.mxu1 %v10399_v49  ;;  %v10408_v49 = vld [vmem:[#allocation91_spill] sm:$0xff]  ;;  %v10409_v58 = vld [vmem:[#allocation92_spill] sm:$0xff] }
 0x6ba   :  { %10395 = vst [vmem:[#allocation48_spill] sm:$0xff] %v9488_v60  ;;  %7608 = vtanh.f32 %v9488_v60 }
 0x6bc   :  { %6959 = vmatpush1.bf16.msra.mxu0 %v10400_v34  ;;  %6991 = vmatpush1.bf16.msra.mxu1 %v10401_v27  ;;  %v10410_v27 = vld [vmem:[#allocation8_spill] sm:$0xff] }
 0x6bd   :  { %6961 = vmatprep.subr.bf16.mxu0 %v10402_v20  ;;  %6993 = vmatprep.subr.bf16.mxu1 %v10403_v1  ;;  %v10411_v20 = vld [vmem:[#allocation9_spill] sm:$0xff] }
 0x6c0   :  { %6963 = vmatpush1.bf16.msra.mxu0 %v10404_v36  ;;  %6995 = vmatpush1.bf16.msra.mxu1 %v10405_v15  ;;  %v10412_v36 = vld [vmem:[#allocation10_spill] sm:$0xff]  ;;  %v10413_v15 = vld [vmem:[#allocation11_spill] sm:$0xff] }
 0x6c1   :  { %6965 = vmatprep.subr.bf16.mxu0 %v10406_v2  ;;  %6997 = vmatprep.subr.bf16.mxu1 %v10407_v54  ;;  %v10414_v2 = vld [vmem:[#allocation12_spill] sm:$0xff]  ;;  %v10415_v54 = vld [vmem:[#allocation13_spill] sm:$0xff] }
 0x6c4   :  { %v7609_v30 = vpop.eup %7608  ;;  %6967 = vmatpush1.bf16.msra.mxu0 %v10408_v49  ;;  %6999 = vmatpush1.bf16.msra.mxu1 %v10409_v58  ;;  %v10416_v58 = vld [vmem:[#allocation14_spill] sm:$0xff]  ;;  %v10426_v49 = vld [vmem:[#allocation24_spill] sm:$0xff] }
 0x6c5   :  { %v3821_v34 = vmul.f32 %v7609_v30, %v7607_v21  ;;  %7001 = vmatprep.subr.bf16.mxu0 %v10410_v27  ;;  %7033 = vmatprep.subr.bf16.mxu1 %v10411_v20  ;;  %v10417_v21 = vld [vmem:[#allocation15_spill] sm:$0xff]  ;;  %v10418_v27 = vld [vmem:[#allocation16_spill] sm:$0xff]  ;;  %v10419_v20 = vld [vmem:[#allocation17_spill] sm:$0xff] }
 0x6c6   :  { %v10425_v30 = vld [vmem:[#allocation23_spill] sm:$0xff] }
 0x6c7   :  { %4285 = vmatmul.mubr.f32.vlgmr.msra.gmra.mrb[40].mxu0 %v3821_v34  ;;  %4356 = vmatmul.mubr.f32.vlgmr.msra.gmra.mrb[40].mxu1 %v3821_v34  ;;  %v10420_v34 = vld [vmem:[#allocation18_spill] sm:$0xff] }
 0x6c8   :  { %7003 = vmatpush1.bf16.msra.mxu0 %v10412_v36  ;;  %7035 = vmatpush1.bf16.msra.mxu1 %v10413_v15  ;;  %v10421_v36 = vld [vmem:[#allocation19_spill] sm:$0xff]  ;;  %v10422_v15 = vld [vmem:[#allocation20_spill] sm:$0xff] }
 0x6c9   :  { %7005 = vmatprep.subr.bf16.mxu0 %v10414_v2  ;;  %7037 = vmatprep.subr.bf16.mxu1 %v10415_v54  ;;  %v10423_v2 = vld [vmem:[#allocation21_spill] sm:$0xff]  ;;  %v10424_v54 = vld [vmem:[#allocation22_spill] sm:$0xff] }
 0x6ca   :  { %4482 = vmatprep.mubr.f32.mxu0 %v10072_v46  ;;  %4553 = vmatprep.mubr.f32.mxu1 %v10072_v46 }
 0x6cc   :  { %7007 = vmatpush1.bf16.msra.mxu0 %v10416_v58  ;;  %7039 = vmatpush1.bf16.msra.mxu1 %v10417_v21  ;;  %v10427_v58 = vld [vmem:[#allocation25_spill] sm:$0xff]  ;;  %v10428_v21 = vld [vmem:[#allocation26_spill] sm:$0xff] }
 0x6cd   :  { %7009 = vmatprep.subr.bf16.mxu0 %v10418_v27  ;;  %7041 = vmatprep.subr.bf16.mxu1 %v10419_v20  ;;  %v10429_v27 = vld [vmem:[#allocation27_spill] sm:$0xff]  ;;  %v10430_v20 = vld [vmem:[#allocation28_spill] sm:$0xff] }
 0x6d0   :  { %7011 = vmatpush1.bf16.msra.mxu0 %v10420_v34  ;;  %7043 = vmatpush1.bf16.msra.mxu1 %v10421_v36  ;;  %v10431_v34 = vld [vmem:[#allocation29_spill] sm:$0xff]  ;;  %v10432_v36 = vld [vmem:[#allocation30_spill] sm:$0xff] }
 0x6d1   :  { %7013 = vmatprep.subr.bf16.mxu0 %v10422_v15  ;;  %7045 = vmatprep.subr.bf16.mxu1 %v10423_v2  ;;  %v10433_v15 = vld [vmem:[#allocation31_spill] sm:$0xff]  ;;  %v10434_v2 = vld [vmem:[#allocation32_spill] sm:$0xff] }
 0x6d4   :  { %7015 = vmatpush1.bf16.msra.mxu0 %v10424_v54  ;;  %7047 = vmatpush1.bf16.msra.mxu1 %v10425_v30  ;;  %v10435_v54 = vld [vmem:[#allocation33_spill] sm:$0xff]  ;;  %v10436_v30 = vld [vmem:[#allocation34_spill] sm:$0xff] }
 0x6d5   :  { %7017 = vmatprep.subr.bf16.mxu0 %v10426_v49  ;;  %7049 = vmatprep.subr.bf16.mxu1 %v10427_v58  ;;  %v10437_v49 = vld [vmem:[#allocation35_spill] sm:$0xff]  ;;  %v10438_v58 = vld [vmem:[#allocation36_spill] sm:$0xff] }
 0x6d8   :  { %7019 = vmatpush1.bf16.msra.mxu0 %v10428_v21  ;;  %7051 = vmatpush1.bf16.msra.mxu1 %v10429_v27  ;;  %v10439_v21 = vld [vmem:[#allocation37_spill] sm:$0xff]  ;;  %v10440_v27 = vld [vmem:[#allocation38_spill] sm:$0xff] }
 0x6d9   :  { %7021 = vmatprep.subr.bf16.mxu0 %v10430_v20  ;;  %7053 = vmatprep.subr.bf16.mxu1 %v10431_v34  ;;  %v10441_v20 = vld [vmem:[#allocation39_spill] sm:$0xff]  ;;  %v10442_v34 = vld [vmem:[#allocation40_spill] sm:$0xff] }
 0x6dc   :  { %7023 = vmatpush1.bf16.msra.mxu0 %v10432_v36  ;;  %7055 = vmatpush1.bf16.msra.mxu1 %v10433_v15  ;;  %v10443_v36 = vld [vmem:[#allocation41_spill] sm:$0xff] }
 0x6dd   :  { %7025 = vmatprep.subr.bf16.mxu0 %v10434_v2  ;;  %7057 = vmatprep.subr.bf16.mxu1 %v10435_v54 }
 0x6e0   :  { %7027 = vmatpush1.bf16.msra.mxu0 %v10436_v30  ;;  %7059 = vmatpush1.bf16.msra.mxu1 %v10437_v49 }
 0x6e1   :  { %7029 = vmatprep.subr.bf16.mxu0 %v10438_v58  ;;  %7061 = vmatprep.subr.bf16.mxu1 %v10439_v21  ;;  %v5508_v21 = vld [vmem:[%s9812_s0 + $0x30] sm:$0xff] }
 0x6e4   :  { %7031 = vmatpush1.bf16.msra.mxu0 %v10440_v27  ;;  %7063 = vmatpush1.bf16.msra.mxu1 %v10441_v20 }
 0x6e5   :  { %7065 = vmatprep.subr.bf16.mxu0 %v10442_v34  ;;  %7097 = vmatprep.subr.bf16.mxu1 %v10443_v36 }
 0x75a   :  { %v3890_v15 = vpop.f32.mrb[36].mxu0  ;;  %v3961_v2 = vpop.f32.mrb[36].mxu1 }
 0x75b   :  { %v3892_v1 = vpop.f32.mrb[37].mxu0  ;;  %v3963_v54 = vpop.f32.mrb[37].mxu1 }
 0x75c   :  { %v3970_v48 = vcombine.low %v3890_v15, %v3892_v1  ;;  %v3971_v30 = vcombine.low %v3961_v2, %v3963_v54 }
 0x75e   :  { %v3978_v49 = vrot.slane %v3970_v48, %v8768_v14  ;;  %v3985_v58 = vrot.slane %v3971_v30, %v8768_v14 }
 0x760   :  { %v3986_v27 = vcombine.low %v3978_v49, %v3985_v58 }
 0x762   :  { %v3988_v20 = vadd.f32 %v5508_v21, %v3986_v27 }
 0x764   :  { %v5509_v5 = vmul.f32 -1.442695, %v3988_v20  ;;  %v3996_v34 = vrot.slane %v3988_v20, 2  ;;  %v4007_v60 = vrot.slane %v3988_v20, 6  ;;  %v4004_v1 = vrot.slane %v3988_v20, 4 }
 0x766   :  { %7610 = vpow2.f32 %v5509_v5  ;;  %v5510_v36 = vmul.f32 -1.442695, %v3996_v34  ;;  %v5511_v59 = vmul.f32 -1.442695, %v4007_v60 }
 0x768   :  { %7612 = vpow2.f32 %v5510_v36 }
 0x769   :  { %7614 = vpow2.f32 %v5511_v59  ;;  %v5512_v59 = vld [vmem:[%s9813_s1 + $0x30] sm:$0xff] }
 0x770   :  { %v7611_v18 = vpop.eup %7610 }
 0x771   :  { %v3992_v15 = vadd.f32 1.0, %v7611_v18 }
 0x772   :  { %v7613_v2 = vpop.eup %7612 }
 0x773   :  { %7616 = vrcp.f32 %v3992_v15  ;;  %v4001_v48 = vadd.f32 1.0, %v7613_v2  ;;  %v7615_v21 = vpop.eup %7614 }
 0x774   :  { %7618 = vtanh.f32 %v4004_v1  ;;  %v4012_v1 = vadd.f32 1.0, %v7615_v21 }
 0x775   :  { %7620 = vrcp.f32 %v4001_v48 }
 0x776   :  { %7622 = vrcp.f32 %v4012_v1 }
 0x77a   :  { %v4088_v54 = vpop.f32.mrb[38].mxu0  ;;  %v4159_v30 = vpop.f32.mrb[38].mxu1 }
 0x77b   :  { %v4090_v49 = vpop.f32.mrb[39].mxu0  ;;  %v4161_v58 = vpop.f32.mrb[39].mxu1 }
 0x77c   :  { %v4168_v27 = vcombine.low %v4088_v54, %v4090_v49  ;;  %v4169_v5 = vcombine.low %v4159_v30, %v4161_v58 }
 0x77d   :  { %v7617_v34 = vpop.eup %7616 }
 0x77e   :  { %v7619_v36 = vpop.eup %7618  ;;  %v4176_v60 = vrot.slane %v4168_v27, %v8768_v14  ;;  %v4183_v20 = vrot.slane %v4169_v5, %v8768_v14 }
 0x77f   :  { %v7621_v18 = vpop.eup %7620  ;;  %v4016_v48 = vmul.f32 %v7619_v36, %v7617_v34 }
 0x780   :  { %v4184_v15 = vcombine.low %v4176_v60, %v4183_v20  ;;  %v4015_v2 = vmul.f32 %v7621_v18, %v9423_v29  ;;  %v7623_v27 = vpop.eup %7622 }
 0x782   :  { %v4186_v19 = vadd.f32 %v5512_v59, %v4184_v15  ;;  %v9552_v39 = vadd.f32 %v4016_v48, %v4015_v2 }
 0x784   :  { %v5513_v54 = vmul.f32 -1.442695, %v4186_v19  ;;  %v4194_v30 = vrot.slane %v4186_v19, 2  ;;  %7624 = vtanh.f32 %v9552_v39  ;;  %v4205_v58 = vrot.slane %v4186_v19, 6 }
 0x785   :  { %v4202_v60 = vrot.slane %v4186_v19, 4 }
 0x786   :  { %7626 = vpow2.f32 %v5513_v54  ;;  %v5514_v49 = vmul.f32 -1.442695, %v4194_v30  ;;  %v5515_v5 = vmul.f32 -1.442695, %v4205_v58  ;;  %v10453_v54 = vld [vmem:[#allocation79_spill] sm:$0xff]  ;;  %v10454_v30 = vld [vmem:[#allocation80_spill] sm:$0xff] }
 0x787   :  { %v10456_v58 = vld [vmem:[#allocation82_spill] sm:$0xff] }
 0x788   :  { %7628 = vpow2.f32 %v5514_v49  ;;  %v10455_v49 = vld [vmem:[#allocation81_spill] sm:$0xff] }
 0x789   :  { %7630 = vpow2.f32 %v5515_v5  ;;  %v10458_v5 = vld [vmem:[#allocation84_spill] sm:$0xff] }
 0x78e   :  { %v7625_v24 = vpop.eup %7624 }
 0x78f   :  { %v4019_v20 = vmul.f32 %v7625_v24, %v7623_v27  ;;  %v10457_v27 = vld [vmem:[#allocation83_spill] sm:$0xff] }
 0x790   :  { %v7627_v21 = vpop.eup %7626 }
 0x791   :  { %v4190_v29 = vadd.f32 1.0, %v7627_v21  ;;  %4483 = vmatmul.mubr.f32.vlgmr.msra.gmra.mrb[42].mxu0 %v4019_v20  ;;  %4554 = vmatmul.mubr.f32.vlgmr.msra.gmra.mrb[42].mxu1 %v4019_v20  ;;  %v10459_v21 = vld [vmem:[#allocation85_spill] sm:$0xff]  ;;  %v10461_v20 = vld [vmem:[#allocation87_spill] sm:$0xff] }
 0x792   :  { %v7629_v34 = vpop.eup %7628  ;;  %7067 = vmatpush1.bf16.msra.mxu0 %v8182_v10  ;;  %7099 = vmatpush1.bf16.msra.mxu1 %v8186_v11 }
 0x793   :  { %7632 = vrcp.f32 %v4190_v29  ;;  %v4199_v36 = vadd.f32 1.0, %v7629_v34  ;;  %7069 = vmatprep.subr.bf16.mxu0 %v8188_v12  ;;  %7101 = vmatprep.subr.bf16.mxu1 %v8200_v23  ;;  %v7631_v24 = vpop.eup %7630  ;;  %v10462_v29 = vld [vmem:[#allocation88_spill] sm:$0xff]  ;;  %v10463_v34 = vld [vmem:[#allocation89_spill] sm:$0xff] }
 0x794   :  { %7634 = vtanh.f32 %v4202_v60  ;;  %4680 = vmatprep.mubr.f32.mxu0 %v10072_v46  ;;  %4751 = vmatprep.mubr.f32.mxu1 %v10072_v46  ;;  %v10460_v60 = vld [vmem:[#allocation86_spill] sm:$0xff] }
 0x795   :  { %7636 = vrcp.f32 %v4199_v36  ;;  %v10464_v36 = vld [vmem:[#allocation90_spill] sm:$0xff] }
 0x796   :  { %7071 = vmatpush1.bf16.msra.mxu0 %v8220_v33  ;;  %7103 = vmatpush1.bf16.msra.mxu1 %v8224_v38 }
 0x797   :  { %7073 = vmatprep.subr.bf16.mxu0 %v8226_v41  ;;  %7105 = vmatprep.subr.bf16.mxu1 %v8238_v47 }
 0x79a   :  { %v4286_v10 = vpop.f32.mrb[40].mxu0  ;;  %v4357_v11 = vpop.f32.mrb[40].mxu1  ;;  %7075 = vmatpush1.bf16.msra.mxu0 %v8258_v61  ;;  %7107 = vmatpush1.bf16.msra.mxu1 %v8262_v62  ;;  %v5516_v61 = vld [vmem:[%s9814_s2 + $0x30] sm:$0xff]  ;;  %v4210_v62 = vadd.f32 1.0, %v7631_v24 }
 0x79b   :  { %v4288_v12 = vpop.f32.mrb[41].mxu0  ;;  %v4359_v23 = vpop.f32.mrb[41].mxu1  ;;  %7077 = vmatprep.subr.bf16.mxu0 %v8264_v3  ;;  %7109 = vmatprep.subr.bf16.mxu1 %v10155_v40 }
 0x79c   :  { %v4366_v19 = vcombine.low %v4286_v10, %v4288_v12  ;;  %v4367_v18 = vcombine.low %v4357_v11, %v4359_v23  ;;  %7638 = vrcp.f32 %v4210_v62  ;;  %v10465_v12 = vld [vmem:[#allocation91_spill] sm:$0xff]  ;;  %v10466_v23 = vld [vmem:[#allocation92_spill] sm:$0xff] }
 0x79d   :  { %v7633_v33 = vpop.eup %7632 }
 0x79e   :  { %v7635_v38 = vpop.eup %7634  ;;  %v4374_v41 = vrot.slane %v4366_v19, %v8768_v14  ;;  %v4381_v47 = vrot.slane %v4367_v18, %v8768_v14  ;;  %7079 = vmatpush1.bf16.msra.mxu0 %v10156_v63  ;;  %7111 = vmatpush1.bf16.msra.mxu1 %v10157_v35  ;;  %v5026_v19 = vld [vmem:[%s9818_s6 + $0x80] sm:$0xff]  ;;  %v5027_v18 = vld [vmem:[%s9818_s6 + $0x88] sm:$0xff] }
 0x79f   :  { %v7637_v59 = vpop.eup %7636  ;;  %7081 = vmatprep.subr.bf16.mxu0 %v10102_v25  ;;  %7113 = vmatprep.subr.bf16.mxu1 %v10103_v0  ;;  %v4214_v40 = vmul.f32 %v7635_v38, %v7633_v33  ;;  %v7192_v33 = vpack.c.bf16 %v5027_v18, %v5026_v19  ;;  %v5010_v38 = vld [vmem:[%s9818_s6] sm:$0xff]  ;;  %v5049_v19 = vld [vmem:[%s9818_s6 + $0x138] sm:$0xff] }
 0x7a0   :  { %v4382_v1 = vcombine.low %v4374_v41, %v4381_v47  ;;  %v4213_v3 = vmul.f32 %v7637_v59, %v9450_v42  ;;  %v5011_v41 = vld [vmem:[%s9818_s6 + $0x8] sm:$0xff]  ;;  %v5028_v59 = vld [vmem:[%s9818_s6 + $0x90] sm:$0xff] }
 0x7a1   :  { %v7194_v47 = vpack.c.bf16 %v5011_v41, %v5010_v38  ;;  %v5051_v38 = vld [vmem:[%s9818_s6 + $0x148] sm:$0xff] }
 0x7a2   :  { %v4384_v15 = vadd.f32 %v5516_v61, %v4382_v1  ;;  %v9579_v2 = vadd.f32 %v4214_v40, %v4213_v3  ;;  %7083 = vmatpush1.bf16.msra.mxu0 %v10104_v16  ;;  %7115 = vmatpush1.bf16.msra.mxu1 %v10105_v32  ;;  %v5029_v61 = vld [vmem:[%s9818_s6 + $0x98] sm:$0xff]  ;;  %v5012_v1 = vld [vmem:[%s9818_s6 + $0x10] sm:$0xff] }
 0x7a3   :  { %7085 = vmatprep.subr.bf16.mxu0 %v10158_v51  ;;  %7117 = vmatprep.subr.bf16.mxu1 %v10159_v44  ;;  %v7196_v62 = vpack.c.bf16 %v5029_v61, %v5028_v59  ;;  %v5013_v3 = vld [vmem:[%s9818_s6 + $0x18] sm:$0xff] }
 0x7a4   :  { %v5517_v48 = vmul.f32 -1.442695, %v4384_v15  ;;  %v4392_v63 = vrot.slane %v4384_v15, 2  ;;  %7640 = vtanh.f32 %v9579_v2  ;;  %v4403_v0 = vrot.slane %v4384_v15, 6  ;;  %v5053_v59 = vld [vmem:[%s9818_s6 + $0x158] sm:$0xff] }
 0x7a5   :  { %v4400_v44 = vrot.slane %v4384_v15, 4  ;;  %v7198_v40 = vpack.c.bf16 %v5013_v3, %v5012_v1  ;;  %v5030_v15 = vld [vmem:[%s9818_s6 + $0xa0] sm:$0xff]  ;;  %v5055_v1 = vld [vmem:[%s9818_s6 + $0x168] sm:$0xff] }
 0x7a6   :  { %7642 = vpow2.f32 %v5517_v48  ;;  %v5518_v25 = vmul.f32 -1.442695, %v4392_v63  ;;  %7087 = vmatpush1.bf16.msra.mxu0 %v10212_v26  ;;  %7119 = vmatpush1.bf16.msra.mxu1 %v10213_v28  ;;  %v7639_v16 = vpop.eup %7638  ;;  %v5519_v32 = vmul.f32 -1.442695, %v4403_v0  ;;  %v5031_v48 = vld [vmem:[%s9818_s6 + $0xa8] sm:$0xff] }
 0x7a7   :  { %7089 = vmatprep.subr.bf16.mxu0 %v10214_v6  ;;  %7121 = vmatprep.subr.bf16.mxu1 %v10215_v8  ;;  %v7200_v63 = vpack.c.bf16 %v5031_v48, %v5030_v15  ;;  %v5015_v0 = vld [vmem:[%s9818_s6 + $0x28] sm:$0xff]  ;;  %v5057_v15 = vld [vmem:[%s9818_s6 + $0x178] sm:$0xff] }
 0x7a8   :  { %7644 = vpow2.f32 %v5518_v25  ;;  %v5014_v25 = vld [vmem:[%s9818_s6 + $0x20] sm:$0xff] }
 0x7a9   :  { %7646 = vpow2.f32 %v5519_v32  ;;  %v5032_v32 = vld [vmem:[%s9818_s6 + $0xb0] sm:$0xff] }
 0x7aa   :  { %7091 = vmatpush1.bf16.msra.mxu0 %v10216_v57  ;;  %7123 = vmatpush1.bf16.msra.mxu1 %v10217_v4  ;;  %v10446_v57 = vld [vmem:[#allocation73_spill] sm:$0xff]  ;;  %v10447_v4 = vld [vmem:[#allocation74_spill] sm:$0xff] }
 0x7ab   :  { %7093 = vmatprep.subr.bf16.mxu0 %v10218_v13  ;;  %7125 = vmatprep.subr.bf16.mxu1 %v10270_v55 }
 0x7ae   :  { %v7641_v35 = vpop.eup %7640  ;;  %7095 = vmatpush1.bf16.msra.mxu0 %v10116_v50  ;;  %7127 = vmatpush1.bf16.msra.mxu1 %v10271_v56  ;;  %v10444_v50 = vld [vmem:[#allocation71_spill] sm:$0xff] }
 0x7af   :  { %v4217_v26 = vmul.f32 %v7641_v35, %v7639_v16  ;;  %7129 = vmatprep.subr.bf16.mxu0 %v10169_v53  ;;  %7161 = vmatprep.subr.bf16.mxu1 %v10170_v7  ;;  %v10445_v7 = vld [vmem:[#allocation72_spill] sm:$0xff]  ;;  %v7202_v16 = vpack.c.bf16 %v5015_v0, %v5014_v25  ;;  %v5033_v35 = vld [vmem:[%s9818_s6 + $0xb8] sm:$0xff] }
 0x7b0   :  { %v7643_v51 = vpop.eup %7642 }
 0x7b1   :  { %v4388_v28 = vadd.f32 1.0, %v7643_v51  ;;  %4681 = vmatmul.mubr.f32.vlgmr.msra.gmra.mrb[44].mxu0 %v4217_v26  ;;  %4752 = vmatmul.mubr.f32.vlgmr.msra.gmra.mrb[44].mxu1 %v4217_v26  ;;  %v7204_v51 = vpack.c.bf16 %v5033_v35, %v5032_v32  ;;  %v5017_v26 = vld [vmem:[%s9818_s6 + $0x38] sm:$0xff] }
 0x7b2   :  { %v7645_v6 = vpop.eup %7644  ;;  %7131 = vmatpush1.bf16.msra.mxu0 %v10221_v17  ;;  %7163 = vmatpush1.bf16.msra.mxu1 %v10222_v31 }
 0x7b3   :  { %7648 = vrcp.f32 %v4388_v28  ;;  %v4397_v8 = vadd.f32 1.0, %v7645_v6  ;;  %7133 = vmatprep.subr.bf16.mxu0 %v10223_v45  ;;  %7165 = vmatprep.subr.bf16.mxu1 %v10224_v22  ;;  %v7647_v53 = vpop.eup %7646  ;;  %v10451_v22 = vld [vmem:[#allocation78_spill] sm:$0xff]  ;;  %v5034_v6 = vld [vmem:[%s9818_s6 + $0xc0] sm:$0xff] }
 0x7b4   :  { %7650 = vtanh.f32 %v4400_v44  ;;  %4878 = vmatprep.mubr.f32.mxu0 %v10072_v46  ;;  %4949 = vmatprep.mubr.f32.mxu1 %v10072_v46  ;;  %v4408_v17 = vadd.f32 1.0, %v7647_v53  ;;  %v5016_v44 = vld [vmem:[%s9818_s6 + $0x30] sm:$0xff]  ;;  %v5019_v53 = vld [vmem:[%s9818_s6 + $0x48] sm:$0xff] }
 0x7b5   :  { %7652 = vrcp.f32 %v4397_v8  ;;  %v7206_v28 = vpack.c.bf16 %v5017_v26, %v5016_v44  ;;  %v5035_v8 = vld [vmem:[%s9818_s6 + $0xc8] sm:$0xff] }
 0x7b6   :  { %7135 = vmatpush1.bf16.msra.mxu0 %v10175_v43  ;;  %7167 = vmatpush1.bf16.msra.mxu1 %v10176_v37  ;;  %v10448_v43 = vld [vmem:[#allocation75_spill] sm:$0xff]  ;;  %v10449_v37 = vld [vmem:[#allocation76_spill] sm:$0xff]  ;;  %7654 = vrcp.f32 %v4408_v17 }
 0x7b7   :  { %7137 = vmatprep.subr.bf16.mxu0 %v10177_v52  ;;  %7169 = vmatprep.subr.bf16.mxu1 %v10225_v9  ;;  %v10450_v52 = vld [vmem:[#allocation77_spill] sm:$0xff]  ;;  %v10452_v9 = vld [vmem:[#allocation48_spill] sm:$0xff]  ;;  %v5021_v17 = vld [vmem:[%s9818_s6 + $0x58] sm:$0xff] }
 0x7ba   :  { %7139 = vmatpush1.bf16.msra.mxu0 %v10444_v50  ;;  %7171 = vmatpush1.bf16.msra.mxu1 %v10445_v7  ;;  %v7208_v50 = vpack.c.bf16 %v5035_v8, %v5034_v6  ;;  %v5018_v7 = vld [vmem:[%s9818_s6 + $0x40] sm:$0xff] }
 0x7bb   :  { %7141 = vmatprep.subr.bf16.mxu0 %v10446_v57  ;;  %7173 = vmatprep.subr.bf16.mxu1 %v10447_v4  ;;  %v7210_v57 = vpack.c.bf16 %v5019_v53, %v5018_v7  ;;  %v5036_v4 = vld [vmem:[%s9818_s6 + $0xd0] sm:$0xff] }
 0x7bd   :  { %v7649_v13 = vpop.eup %7648 }
 0x7be   :  { %v7651_v31 = vpop.eup %7650  ;;  %7143 = vmatpush1.bf16.msra.mxu0 %v10448_v43  ;;  %7175 = vmatpush1.bf16.msra.mxu1 %v10449_v37  ;;  %v5038_v37 = vld [vmem:[%s9818_s6 + $0xe0] sm:$0xff] }
 0x7bf   :  { %v7653_v45 = vpop.eup %7652  ;;  %7145 = vmatprep.subr.bf16.mxu0 %v10450_v52  ;;  %7177 = vmatprep.subr.bf16.mxu1 %v10451_v22  ;;  %v4412_v56 = vmul.f32 %v7651_v31, %v7649_v13  ;;  %v5037_v13 = vld [vmem:[%s9818_s6 + $0xd8] sm:$0xff]  ;;  %v5039_v52 = vld [vmem:[%s9818_s6 + $0xe8] sm:$0xff] }
 0x7c0   :  { %v4411_v55 = vmul.f32 %v7653_v45, %v10452_v9  ;;  %v7655_v10 = vpop.eup %7654  ;;  %v7212_v31 = vpack.c.bf16 %v5037_v13, %v5036_v4  ;;  %v5020_v45 = vld [vmem:[%s9818_s6 + $0x50] sm:$0xff]  ;;  %v7216_v22 = vpack.c.bf16 %v5039_v52, %v5038_v37  ;;  %v5022_v9 = vld [vmem:[%s9818_s6 + $0x60] sm:$0xff]  ;;  %v5524_v37 = vld [vmem:[%s9813_s1 + $0x38] sm:$0xff] }
 0x7c1   :  { %v7214_v43 = vpack.c.bf16 %v5021_v17, %v5020_v45 }
 0x7c2   :  { %v9617_v42 = vadd.f32 %v4412_v56, %v4411_v55  ;;  %7147 = vmatpush1.bf16.msra.mxu0 %v10453_v54  ;;  %7179 = vmatpush1.bf16.msra.mxu1 %v10454_v30  ;;  %v5023_v55 = vld [vmem:[%s9818_s6 + $0x68] sm:$0xff]  ;;  %v5040_v54 = vld [vmem:[%s9818_s6 + $0xf0] sm:$0xff]  ;;  %v5041_v30 = vld [vmem:[%s9818_s6 + $0xf8] sm:$0xff] }
 0x7c3   :  { %7149 = vmatprep.subr.bf16.mxu0 %v10455_v49  ;;  %7181 = vmatprep.subr.bf16.mxu1 %v10456_v58  ;;  %v7218_v56 = vpack.c.bf16 %v5023_v55, %v5022_v9  ;;  %v7220_v49 = vpack.c.bf16 %v5041_v30, %v5040_v54  ;;  %v5024_v58 = vld [vmem:[%s9818_s6 + $0x70] sm:$0xff] }
 0x7c4   :  { %7656 = vtanh.f32 %v9617_v42 }
 0x7c6   :  { %7151 = vmatpush1.bf16.msra.mxu0 %v10457_v27  ;;  %7183 = vmatpush1.bf16.msra.mxu1 %v10458_v5  ;;  %v5025_v27 = vld [vmem:[%s9818_s6 + $0x78] sm:$0xff] }
 0x7c7   :  { %7153 = vmatprep.subr.bf16.mxu0 %v10459_v21  ;;  %7185 = vmatprep.subr.bf16.mxu1 %v10460_v60  ;;  %v7222_v5 = vpack.c.bf16 %v5025_v27, %v5024_v58  ;;  %v5042_v21 = vld [vmem:[%s9818_s6 + $0x100] sm:$0xff]  ;;  %v5043_v60 = vld [vmem:[%s9818_s6 + $0x108] sm:$0xff] }
 0x7ca   :  { %7155 = vmatpush1.bf16.msra.mxu0 %v10461_v20  ;;  %7187 = vmatpush1.bf16.msra.mxu1 %v10462_v29  ;;  %v7225_v20 = vpack.c.bf16 %v5043_v60, %v5042_v21  ;;  %v7762_v29 = vmov 0.0|0.0  }
 0x7cb   :  { %7157 = vmatprep.subr.bf16.mxu0 %v10463_v34  ;;  %7189 = vmatprep.subr.bf16.mxu1 %v10464_v36  ;;  %v5044_v34 = vld [vmem:[%s9818_s6 + $0x110] sm:$0xff]  ;;  %v5045_v36 = vld [vmem:[%s9818_s6 + $0x118] sm:$0xff] }
 0x7ce   :  { %v7657_v11 = vpop.eup %7656  ;;  %7159 = vmatpush1.bf16.msra.mxu0 %v10465_v12  ;;  %7191 = vmatpush1.bf16.msra.mxu1 %v10466_v23  ;;  %v5047_v12 = vld [vmem:[%s9818_s6 + $0x128] sm:$0xff] }
 0x7cf   :  { %v4415_v24 = vmul.f32 %v7657_v11, %v7655_v10  ;;  %7193 = vmatprep.subr.bf16.mxu0 %v7192_v33  ;;  %7224 = vmatprep.subr.bf16.mxu1 %v7762_v29  ;;  %v7228_v10 = vpack.c.bf16 %v5045_v36, %v5044_v34  ;;  %v5046_v11 = vld [vmem:[%s9818_s6 + $0x120] sm:$0xff] }
 0x7d0   :  { %v7231_v23 = vpack.c.bf16 %v5047_v12, %v5046_v11  ;;  %v5050_v33 = vld [vmem:[%s9818_s6 + $0x140] sm:$0xff] }
 0x7d1   :  { %4879 = vmatmul.mubr.f32.vlgmr.msra.gmra.mrb[46].mxu0 %v4415_v24  ;;  %4950 = vmatmul.mubr.f32.vlgmr.msra.gmra.mrb[46].mxu1 %v4415_v24  ;;  %v5048_v24 = vld [vmem:[%s9818_s6 + $0x130] sm:$0xff]  ;;  %v7237_v41 = vpack.c.bf16 %v5051_v38, %v5050_v33 }
 0x7d2   :  { %7195 = vmatpush3.bf16.msra.mxu0 %v7194_v47  ;;  %7226 = vmatpush3.bf16.msra.mxu1 %v7225_v20  ;;  %v7234_v18 = vpack.c.bf16 %v5049_v19, %v5048_v24  ;;  %v5052_v47 = vld [vmem:[%s9818_s6 + $0x150] sm:$0xff] }
 0x7d3   :  { %7197 = vmatprep.subr.bf16.mxu0 %v7196_v62  ;;  %7227 = vmatprep.subr.bf16.mxu1 %v7762_v29  ;;  %v7240_v61 = vpack.c.bf16 %v5053_v59, %v5052_v47  ;;  %v5054_v62 = vld [vmem:[%s9818_s6 + $0x160] sm:$0xff] }
 0x7d4   :  { %5653 = vmatprep.mubr.msk.f32.mxu1 %vm7763_vm0, %v10072_v46  ;;  %v7243_v3 = vpack.c.bf16 %v5055_v1, %v5054_v62 }
 0x7d6   :  { %7199 = vmatpush3.bf16.msra.mxu0 %v7198_v40  ;;  %7229 = vmatpush3.bf16.msra.mxu1 %v7228_v10  ;;  %v5056_v40 = vld [vmem:[%s9818_s6 + $0x170] sm:$0xff] }
 0x7d7   :  { %7201 = vmatprep.subr.bf16.mxu0 %v7200_v63  ;;  %7230 = vmatprep.subr.bf16.mxu1 %v7762_v29  ;;  %v7246_v48 = vpack.c.bf16 %v5057_v15, %v5056_v40 }
 0x7da   :  { %7203 = vmatpush3.bf16.msra.mxu0 %v7202_v16  ;;  %7232 = vmatpush3.bf16.msra.mxu1 %v7231_v23 }
 0x7db   :  { %7205 = vmatprep.subr.bf16.mxu0 %v7204_v51  ;;  %7233 = vmatprep.subr.bf16.mxu1 %v7762_v29 }
 0x7de   :  { %7207 = vmatpush3.bf16.msra.mxu0 %v7206_v28  ;;  %7235 = vmatpush3.bf16.msra.mxu1 %v7234_v18  ;;  %v5520_v28 = vld [vmem:[%s9812_s0 + $0x38] sm:$0xff] }
 0x7df   :  { %7209 = vmatprep.subr.bf16.mxu0 %v7208_v50  ;;  %7236 = vmatprep.subr.bf16.mxu1 %v7762_v29 }
 0x7e2   :  { %7211 = vmatpush3.bf16.msra.mxu0 %v7210_v57  ;;  %7238 = vmatpush3.bf16.msra.mxu1 %v7237_v41 }
 0x7e3   :  { %7213 = vmatprep.subr.bf16.mxu0 %v7212_v31  ;;  %7239 = vmatprep.subr.bf16.mxu1 %v7762_v29 }
 0x7e6   :  { %7215 = vmatpush3.bf16.msra.mxu0 %v7214_v43  ;;  %7241 = vmatpush3.bf16.msra.mxu1 %v7240_v61 }
 0x7e7   :  { %7217 = vmatprep.subr.bf16.mxu0 %v7216_v22  ;;  %7242 = vmatprep.subr.bf16.mxu1 %v7762_v29 }
 0x7ea   :  { %7219 = vmatpush3.bf16.msra.mxu0 %v7218_v56  ;;  %7244 = vmatpush3.bf16.msra.mxu1 %v7243_v3 }
 0x7eb   :  { %7221 = vmatprep.subr.bf16.mxu0 %v7220_v49  ;;  %7245 = vmatprep.subr.bf16.mxu1 %v7762_v29 }
 0x7ee   :  { %7223 = vmatpush3.bf16.msra.mxu0 %v7222_v5  ;;  %7247 = vmatpush3.bf16.msra.mxu1 %v7246_v48 }
 0x864   :  { %v4484_v63 = vpop.f32.mrb[42].mxu0  ;;  %v4555_v25 = vpop.f32.mrb[42].mxu1 }
 0x865   :  { %v4486_v0 = vpop.f32.mrb[43].mxu0  ;;  %v4557_v16 = vpop.f32.mrb[43].mxu1 }
 0x866   :  { %v4564_v32 = vcombine.low %v4484_v63, %v4486_v0  ;;  %v4565_v35 = vcombine.low %v4555_v25, %v4557_v16  ;;  %v5528_v0 = vld [vmem:[%s9814_s2 + $0x38] sm:$0xff] }
 0x868   :  { %v4572_v51 = vrot.slane %v4564_v32, %v8768_v14  ;;  %v4579_v44 = vrot.slane %v4565_v35, %v8768_v14 }
 0x86a   :  { %v4580_v26 = vcombine.low %v4572_v51, %v4579_v44 }
 0x86c   :  { %v4582_v6 = vadd.f32 %v5520_v28, %v4580_v26 }
 0x86e   :  { %v4590_v8 = vrot.slane %v4582_v6, 2  ;;  %v5521_v57 = vmul.f32 -1.442695, %v4582_v6  ;;  %v4601_v49 = vrot.slane %v4582_v6, 6  ;;  %v4598_v5 = vrot.slane %v4582_v6, 4 }
 0x870   :  { %v5522_v50 = vmul.f32 -1.442695, %v4590_v8  ;;  %v5523_v60 = vmul.f32 -1.442695, %v4601_v49 }
 0x872   :  { %7658 = vpow2.f32 %v5522_v50 }
 0x873   :  { %7660 = vpow2.f32 %v5521_v57 }
 0x87c   :  { %v7659_v54 = vpop.eup %7658 }
 0x87d   :  { %v7661_v30 = vpop.eup %7660  ;;  %v4595_v58 = vadd.f32 1.0, %v7659_v54 }
 0x87e   :  { %v4586_v21 = vadd.f32 1.0, %v7661_v30 }
 0x884   :  { %v4682_v7 = vpop.f32.mrb[44].mxu0  ;;  %v4753_v53 = vpop.f32.mrb[44].mxu1 }
 0x885   :  { %v4684_v4 = vpop.f32.mrb[45].mxu0  ;;  %v4755_v13 = vpop.f32.mrb[45].mxu1 }
 0x886   :  { %v4762_v31 = vcombine.low %v4682_v7, %v4684_v4  ;;  %v4763_v45 = vcombine.low %v4753_v53, %v4755_v13 }
 0x888   :  { %v4770_v17 = vrot.slane %v4762_v31, %v8768_v14  ;;  %v4777_v43 = vrot.slane %v4763_v45, %v8768_v14 }
 0x88a   :  { %v4778_v52 = vcombine.low %v4770_v17, %v4777_v43 }
 0x88c   :  { %v4780_v22 = vadd.f32 %v5524_v37, %v4778_v52 }
 0x88e   :  { %v5525_v9 = vmul.f32 -1.442695, %v4780_v22  ;;  %v4788_v55 = vrot.slane %v4780_v22, 2  ;;  %v4799_v27 = vrot.slane %v4780_v22, 6  ;;  %v4796_v34 = vrot.slane %v4780_v22, 4 }
 0x890   :  { %7662 = vpow2.f32 %v5525_v9  ;;  %v5526_v56 = vmul.f32 -1.442695, %v4788_v55  ;;  %v5527_v20 = vmul.f32 -1.442695, %v4799_v27 }
 0x892   :  { %7664 = vpow2.f32 %v5526_v56 }
 0x893   :  { %7666 = vrcp.f32 %v4595_v58 }
 0x894   :  { %7668 = vtanh.f32 %v4598_v5 }
 0x895   :  { %7670 = vrcp.f32 %v4586_v21  ;;  %v5207_v21 = vld [vmem:[#allocation2 + $0x8] sm:$0xff] }
 0x896   :  { %7672 = vpow2.f32 %v5523_v60  ;;  %v5209_v60 = vld [vmem:[#allocation2 + $0x18] sm:$0xff] }
 0x897   :  { %7674 = vpow2.f32 %v5527_v20  ;;  %v7248_v20 = vpack.c.bf16 %v5209_v60, %v5207_v21  ;;  %v5328_v21 = vld [vmem:[#allocation4 + $0x28] sm:$0xff]  ;;  %v5345_v60 = vld [vmem:[#allocation4 + $0xb0] sm:$0xff] }
 0x899   :  { %7249 = vmatprep.subr.bf16.mxu0 %v7248_v20  ;;  %v5346_v20 = vld [vmem:[#allocation4 + $0xb8] sm:$0xff] }
 0x89a   :  { %v7663_v29 = vpop.eup %7662 }
 0x89b   :  { %v4784_v36 = vadd.f32 1.0, %v7663_v29  ;;  %v5208_v29 = vld [vmem:[#allocation2 + $0x10] sm:$0xff] }
 0x89c   :  { %v7665_v10 = vpop.eup %7664 }
 0x89d   :  { %7676 = vrcp.f32 %v4784_v36  ;;  %v4793_v11 = vadd.f32 1.0, %v7665_v10  ;;  %v7667_v12 = vpop.eup %7666  ;;  %v5213_v10 = vld [vmem:[#allocation2 + $0x38] sm:$0xff] }
 0x89e   :  { %7678 = vtanh.f32 %v4796_v34  ;;  %v7669_v23 = vpop.eup %7668  ;;  %v4609_v47 = vmul.f32 %v7667_v12, %v9552_v39  ;;  %v5211_v34 = vld [vmem:[#allocation2 + $0x28] sm:$0xff]  ;;  %v5212_v12 = vld [vmem:[#allocation2 + $0x30] sm:$0xff] }
 0x89f   :  { %7680 = vrcp.f32 %v4793_v11  ;;  %v7671_v24 = vpop.eup %7670  ;;  %v5210_v11 = vld [vmem:[#allocation2 + $0x20] sm:$0xff] }
 0x8a0   :  { %v7673_v33 = vpop.eup %7672  ;;  %v4610_v3 = vmul.f32 %v7671_v24, %v7669_v23  ;;  %v5215_v23 = vld [vmem:[#allocation2 + $0x48] sm:$0xff]  ;;  %v5217_v24 = vld [vmem:[#allocation2 + $0x58] sm:$0xff] }
 0x8a1   :  { %v7675_v59 = vpop.eup %7674  ;;  %v4606_v15 = vadd.f32 1.0, %v7673_v33  ;;  %v5214_v33 = vld [vmem:[#allocation2 + $0x40] sm:$0xff] }
 0x8a2   :  { %v4611_v16 = vadd.f32 %v4610_v3, %v4609_v47  ;;  %v4804_v35 = vadd.f32 1.0, %v7675_v59  ;;  %v5221_v47 = vld [vmem:[#allocation2 + $0x78] sm:$0xff]  ;;  %v5223_v3 = vld [vmem:[#allocation2 + $0x88] sm:$0xff] }
 0x8a3   :  { %7682 = vrcp.f32 %v4606_v15 }
 0x8a4   :  { %v4880_v19 = vpop.f32.mrb[46].mxu0  ;;  %v4951_v18 = vpop.f32.mrb[46].mxu1  ;;  %7684 = vtanh.f32 %v4611_v16  ;;  %v5229_v16 = vld [vmem:[#allocation2 + $0xb8] sm:$0xff] }
 0x8a5   :  { %v4882_v38 = vpop.f32.mrb[47].mxu0  ;;  %v4953_v41 = vpop.f32.mrb[47].mxu1  ;;  %7686 = vrcp.f32 %v4804_v35 }
 0x8a6   :  { %v4960_v61 = vcombine.low %v4880_v19, %v4882_v38  ;;  %v4961_v62 = vcombine.low %v4951_v18, %v4953_v41  ;;  %v7254_v19 = vpack.c.bf16 %v5212_v12, %v5210_v11  ;;  %v7256_v18 = vpack.c.bf16 %v5217_v24, %v5215_v23  ;;  %v5216_v38 = vld [vmem:[#allocation2 + $0x50] sm:$0xff]  ;;  %v5219_v41 = vld [vmem:[#allocation2 + $0x68] sm:$0xff]  ;;  %v5331_v23 = vld [vmem:[#allocation4 + $0x40] sm:$0xff] }
 0x8a7   :  { %v7677_v1 = vpop.eup %7676  ;;  %v7258_v59 = vpack.c.bf16 %v5216_v38, %v5214_v33  ;;  %v5348_v11 = vld [vmem:[#allocation4 + $0xc8] sm:$0xff] }
 0x8a8   :  { %v7679_v40 = vpop.eup %7678  ;;  %v4968_v48 = vrot.slane %v4960_v61, %v8768_v14  ;;  %v4975_v63 = vrot.slane %v4961_v62, %v8768_v14  ;;  %v7260_v61 = vpack.c.bf16 %v5221_v47, %v5219_v41  ;;  %v5218_v62 = vld [vmem:[#allocation2 + $0x60] sm:$0xff]  ;;  %v5332_v24 = vld [vmem:[#allocation4 + $0x48] sm:$0xff]  ;;  %v5333_v41 = vld [vmem:[#allocation4 + $0x50] sm:$0xff] }
 0x8a9   :  { %v7681_v25 = vpop.eup %7680  ;;  %v4808_v51 = vmul.f32 %v7679_v40, %v7677_v1  ;;  %v5220_v1 = vld [vmem:[#allocation2 + $0x70] sm:$0xff]  ;;  %v5225_v40 = vld [vmem:[#allocation2 + $0x98] sm:$0xff]  ;;  %v7298_v33 = vpack.c.bf16 %v5332_v24, %v5331_v23 }
 0x8aa   :  { %v4976_v32 = vcombine.low %v4968_v48, %v4975_v63  ;;  %v4807_v39 = vmul.f32 %v7681_v25, %v9579_v2  ;;  %v7262_v15 = vpack.c.bf16 %v5220_v1, %v5218_v62  ;;  %v7264_v48 = vpack.c.bf16 %v5225_v40, %v5223_v3  ;;  %v5222_v63 = vld [vmem:[#allocation2 + $0x80] sm:$0xff]  ;;  %v5224_v25 = vld [vmem:[#allocation2 + $0x90] sm:$0xff]  ;;  %v5334_v47 = vld [vmem:[#allocation4 + $0x58] sm:$0xff] }
 0x8ab   :  { %v7302_v62 = vpack.c.bf16 %v5334_v47, %v5333_v41 }
 0x8ac   :  { %v4978_v44 = vadd.f32 %v5528_v0, %v4976_v32  ;;  %v4809_v26 = vadd.f32 %v4808_v51, %v4807_v39  ;;  %v5227_v0 = vld [vmem:[#allocation2 + $0xa8] sm:$0xff]  ;;  %v7266_v32 = vpack.c.bf16 %v5224_v25, %v5222_v63  ;;  %v5226_v39 = vld [vmem:[#allocation2 + $0xa0] sm:$0xff]  ;;  %v5228_v51 = vld [vmem:[#allocation2 + $0xb0] sm:$0xff] }
 0x8ad   :  { %v7683_v50 = vpop.eup %7682  ;;  %v7268_v35 = vpack.c.bf16 %v5229_v16, %v5227_v0 }
 0x8ae   :  { %v5529_v28 = vmul.f32 -1.442695, %v4978_v44  ;;  %v4986_v6 = vrot.slane %v4978_v44, 2  ;;  %7688 = vtanh.f32 %v4809_v26  ;;  %v4997_v8 = vrot.slane %v4978_v44, 6  ;;  %v7685_v7 = vpop.eup %7684  ;;  %v5233_v26 = vld [vmem:[#allocation2 + $0xd8] sm:$0xff] }
 0x8af   :  { %v7687_v53 = vpop.eup %7686  ;;  %v4994_v2 = vrot.slane %v4978_v44, 4  ;;  %v4613_v17 = vmul.f32 %v7685_v7, %v7683_v50  ;;  %v5231_v44 = vld [vmem:[#allocation2 + $0xc8] sm:$0xff] }
 0x8b0   :  { %7690 = vpow2.f32 %v5529_v28  ;;  %v5530_v14 = vmul.f32 -1.442695, %v4986_v6  ;;  %v5531_v57 = vmul.f32 -1.442695, %v4997_v8  ;;  %v7270_v28 = vpack.c.bf16 %v5228_v51, %v5226_v39  ;;  %v5232_v8 = vld [vmem:[#allocation2 + $0xd0] sm:$0xff]  ;;  %v5235_v7 = vld [vmem:[#allocation2 + $0xe8] sm:$0xff] }
 0x8b1   :  { %v7272_v6 = vpack.c.bf16 %v5233_v26, %v5231_v44  ;;  %v5336_v39 = vld [vmem:[#allocation4 + $0x68] sm:$0xff]  ;;  %v5353_v44 = vld [vmem:[#allocation4 + $0xf0] sm:$0xff]  ;;  %v5354_v26 = vld [vmem:[#allocation4 + $0xf8] sm:$0xff] }
 0x8b2   :  { %7692 = vpow2.f32 %v5530_v14  ;;  %v5230_v14 = vld [vmem:[#allocation2 + $0xc0] sm:$0xff] }
 0x8b3   :  { %7694 = vpow2.f32 %v5531_v57  ;;  %v7274_v50 = vpack.c.bf16 %v5232_v8, %v5230_v14  ;;  %v5338_v14 = vld [vmem:[#allocation4 + $0x78] sm:$0xff] }
 0x8b8   :  { %v7689_v4 = vpop.eup %7688 }
 0x8b9   :  { %v4811_v31 = vmul.f32 %v7689_v4, %v7687_v53  ;;  %v5237_v53 = vld [vmem:[#allocation2 + $0xf8] sm:$0xff]  ;;  %v5234_v4 = vld [vmem:[#allocation2 + $0xe0] sm:$0xff] }
 0x8ba   :  { %v7691_v13 = vpop.eup %7690  ;;  %v7276_v57 = vpack.c.bf16 %v5237_v53, %v5235_v7  ;;  %v5238_v53 = vld [vmem:[%s9821_s9] sm:$0x3] }
 0x8bb   :  { %v4982_v45 = vadd.f32 1.0, %v7691_v13  ;;  %5129 = vmatprep.mubr.f32.mxu0 %v4811_v31  ;;  %v5236_v13 = vld [vmem:[#allocation2 + $0xf0] sm:$0xff]  ;;  %v5339_v31 = vld [vmem:[#allocation4 + $0x80] sm:$0xff] }
 0x8bc   :  { %v7693_v43 = vpop.eup %7692  ;;  %5130 = vmatmul.mubr.f32.vlgmr.msra.gmra.mrb[48].mxu0 %v4613_v17  ;;  %v5323_v17 = vld [vmem:[#allocation4] sm:$0xff] }
 0x8bd   :  { %7696 = vrcp.f32 %v4982_v45  ;;  %v4991_v37 = vadd.f32 1.0, %v7693_v43  ;;  %5314 = vmatprep.mubr.f32.mxu0 %v10072_v46  ;;  %v7695_v52 = vpop.eup %7694  ;;  %v5206_v46 = vld [vmem:[#allocation2] sm:$0xff]  ;;  %v5340_v45 = vld [vmem:[#allocation4 + $0x88] sm:$0xff] }
 0x8be   :  { %7698 = vtanh.f32 %v4994_v2  ;;  %v5002_v56 = vadd.f32 1.0, %v7695_v52  ;;  %v7250_v36 = vpack.c.bf16 %v5208_v29, %v5206_v46  ;;  %v7278_v2 = vpack.c.bf16 %v5236_v13, %v5234_v4  ;;  %v5341_v52 = vld [vmem:[#allocation4 + $0x90] sm:$0xff] }
 0x8bf   :  { %7700 = vrcp.f32 %v4991_v37  ;;  %v7280_v43 = vpack.c.bf16 %v5340_v45, %v5339_v31  ;;  %v5324_v37 = vld [vmem:[#allocation4 + $0x8] sm:$0xff]  ;;  %v7292_v29 = vpack.c.bf16 %v5346_v20, %v5345_v60 }
 0x8c0   :  { %7702 = vrcp.f32 %v5002_v56  ;;  %7251 = vmatpush1.bf16.msra.mxu0 %v7250_v36  ;;  %v5325_v56 = vld [vmem:[#allocation4 + $0x10] sm:$0xff]  ;;  %v5330_v36 = vld [vmem:[#allocation4 + $0x38] sm:$0xff] }
 0x8c1   :  { %7281 = vmatprep.subr.bf16.mxu1 %v7280_v43 }
 0x8c7   :  { %v7697_v22 = vpop.eup %7696 }
 0x8c8   :  { %v7699_v9 = vpop.eup %7698 }
 0x8c9   :  { %v7701_v55 = vpop.eup %7700  ;;  %v5006_v30 = vmul.f32 %v7699_v9, %v7697_v22  ;;  %v5342_v22 = vld [vmem:[#allocation4 + $0x98] sm:$0xff]  ;;  %v7282_v9 = vpack.c.bf16 %v5324_v37, %v5323_v17 }
 0x8ca   :  { %v5005_v54 = vmul.f32 %v7701_v55, %v9617_v42  ;;  %v7703_v58 = vpop.eup %7702  ;;  %v7252_v42 = vpack.c.bf16 %v5213_v10, %v5211_v34  ;;  %v7284_v55 = vpack.c.bf16 %v5342_v22, %v5341_v52  ;;  %v5329_v34 = vld [vmem:[#allocation4 + $0x30] sm:$0xff]  ;;  %v5347_v10 = vld [vmem:[#allocation4 + $0xc0] sm:$0xff] }
 0x8cb   :  { %v7294_v12 = vpack.c.bf16 %v5330_v36, %v5329_v34  ;;  %v5533_v22 = vld [vmem:[%s9823_s11] ss:$0 sm:$0xff] }
 0x8cc   :  { %v5007_v49 = vadd.f32 %v5006_v30, %v5005_v54  ;;  %7253 = vmatprep.subr.bf16.mxu0 %v7252_v42  ;;  %v5326_v54 = vld [vmem:[#allocation4 + $0x18] sm:$0xff]  ;;  %v5343_v30 = vld [vmem:[#allocation4 + $0xa0] sm:$0xff]  ;;  %v7296_v42 = vpack.c.bf16 %v5348_v11, %v5347_v10 }
 0x8cd   :  { %7255 = vmatpush1.bf16.msra.mxu0 %v7254_v19  ;;  %v5349_v19 = vld [vmem:[#allocation4 + $0xd0] sm:$0xff] }
 0x8ce   :  { %7704 = vtanh.f32 %v5007_v49  ;;  %7257 = vmatprep.subr.bf16.mxu0 %v7256_v18  ;;  %v5344_v49 = vld [vmem:[#allocation4 + $0xa8] sm:$0xff]  ;;  %v5350_v18 = vld [vmem:[#allocation4 + $0xd8] sm:$0xff] }
 0x8cf   :  { %v7300_v38 = vpack.c.bf16 %v5350_v18, %v5349_v19 }
 0x8d1   :  { %7259 = vmatpush1.bf16.msra.mxu0 %v7258_v59  ;;  %v5351_v59 = vld [vmem:[#allocation4 + $0xe0] sm:$0xff] }
 0x8d2   :  { %7261 = vmatprep.subr.bf16.mxu0 %v7260_v61  ;;  %v5352_v61 = vld [vmem:[#allocation4 + $0xe8] sm:$0xff] }
 0x8d3   :  { %v7304_v1 = vpack.c.bf16 %v5352_v61, %v5351_v59 }
 0x8d5   :  { %7263 = vmatpush1.bf16.msra.mxu0 %v7262_v15 }
 0x8d6   :  { %7265 = vmatprep.subr.bf16.mxu0 %v7264_v48  ;;  %v5532_v48 = vld [vmem:[%s9819_s7] ss:$0 sm:$0xff] }
 0x8d8   :  { %v7705_v27 = vpop.eup %7704 }
 0x8d9   :  { %v5009_v5 = vmul.f32 %v7705_v27, %v7703_v58  ;;  %7267 = vmatpush1.bf16.msra.mxu0 %v7266_v32  ;;  %v7286_v58 = vpack.c.bf16 %v5326_v54, %v5325_v56  ;;  %v7288_v27 = vpack.c.bf16 %v5344_v49, %v5343_v30 }
 0x8da   :  { %7269 = vmatprep.subr.bf16.mxu0 %v7268_v35  ;;  %v5335_v35 = vld [vmem:[#allocation4 + $0x60] sm:$0xff] }
 0x8db   :  { %5654 = vmatmul.mubr.f32.vlgmr.msra.gmra.mrb[48].mxu1 %v5009_v5  ;;  %v5327_v5 = vld [vmem:[#allocation4 + $0x20] sm:$0xff]  ;;  %v7306_v51 = vpack.c.bf16 %v5336_v39, %v5335_v35 }
 0x8dc   :  { %7283 = vmatpush3.bf16.msra.mxu1 %v7282_v9  ;;  %v7290_v46 = vpack.c.bf16 %v5328_v21, %v5327_v5 }
 0x8dd   :  { %7271 = vmatpush1.bf16.msra.mxu0 %v7270_v28  ;;  %7285 = vmatprep.subr.bf16.mxu1 %v7284_v55  ;;  %v7308_v28 = vpack.c.bf16 %v5354_v26, %v5353_v44 }
 0x8de   :  { %7273 = vmatprep.subr.bf16.mxu0 %v7272_v6  ;;  %v5337_v6 = vld [vmem:[#allocation4 + $0x70] sm:$0xff] }
 0x8df   :  { %v7310_v8 = vpack.c.bf16 %v5338_v14, %v5337_v6 }
 0x8e0   :  { %7287 = vmatpush3.bf16.msra.mxu1 %v7286_v58 }
 0x8e1   :  { %7275 = vmatpush1.bf16.msra.mxu0 %v7274_v50  ;;  %7289 = vmatprep.subr.bf16.mxu1 %v7288_v27  ;;  %v10467_v50 = vld [vmem:[#allocation93_spill] sm:$0xff] }
 0x8e2   :  { %7277 = vmatprep.subr.bf16.mxu0 %v7276_v57  ;;  %v5242_v7 = vsub.s32 0, %v10467_v50  ;;  %v5246_v57 = vsub.s32 1, %v10467_v50 }
 0x8e4   :  { %7291 = vmatpush3.bf16.msra.mxu1 %v7290_v46  ;;  %v5243_v4 = vrot.slane %v5238_v53, %v5242_v7  ;;  %v5247_v13 = vrot.slane %v5238_v53, %v5246_v57 }
 0x8e5   :  { %7279 = vmatpush1.bf16.msra.mxu0 %v7278_v2  ;;  %7293 = vmatprep.subr.bf16.mxu1 %v7292_v29 }
 0x8e8   :  { %7295 = vmatpush3.bf16.msra.mxu1 %v7294_v12 }
 0x8e9   :  { %7297 = vmatprep.subr.bf16.mxu1 %v7296_v42 }
 0x8ec   :  { %7299 = vmatpush3.bf16.msra.mxu1 %v7298_v33 }
 0x8ed   :  { %7301 = vmatprep.subr.bf16.mxu1 %v7300_v38 }
 0x8f0   :  { %7303 = vmatpush3.bf16.msra.mxu1 %v7302_v62 }
 0x8f1   :  { %7305 = vmatprep.subr.bf16.mxu1 %v7304_v1 }
 0x8f4   :  { %7307 = vmatpush3.bf16.msra.mxu1 %v7306_v51 }
 0x8f5   :  { %7309 = vmatprep.subr.bf16.mxu1 %v7308_v28 }
 0x8f8   :  { %7311 = vmatpush3.bf16.msra.mxu1 %v7310_v8 }
 0x98f   :  { %v5566_v3 = vpop.f32.mrb[48].mxu0 }
 0x990   :  { %v5567_v40 = vpop.f32.mrb[49].mxu0 }
 0x991   :  { %v5568_v15 = vadd.f32 %v5567_v40, %v5566_v3 }
 0x993   :  { %v5132_v63 = vadd.f32 %v5568_v15, %v5532_v48 }
 0x9ae   :  { %v5201_v25 = vpop.f32.mrb[48].mxu1 }
 0x9af   :  { %v5202_v0 = vadd.f32 %v5201_v25, %v5132_v63  ;;  %v5655_v16 = vpop.f32.mrb[49].mxu1 }
 0x9b1   :  { %v5205_v32 = vmax.f32 %v5202_v0, 0.0 }
 0x9b3   :  { %5315 = vmatmul.mubr.f32.vlgmr.msra.gmra.mrb[50].mxu0 %v5205_v32 }
 0xa86   :  { %v5316_v2 = vpop.f32.mrb[50].mxu0 }
 0xa87   :  { %v5317_v31 = vadd.f32 %v5316_v2, %v5243_v4  ;;  %v5318_v45 = vpop.f32.mrb[51].mxu0 }
 0xa88   :  { %v5319_v17 = vadd.f32 %v5318_v45, %v5247_v13 }
 0xa89   :  { %v5321_v37 = vmax.f32 %v5317_v31, 0.0 }
 0xa8a   :  { %v5322_v43 = vmax.f32 %v5319_v17, 0.0 }
 0xa8c   :  { %5426 = vmatprep.mubr.f32.mxu1 %v5322_v43 }
 0xa8d   :  { %5427 = vmatmul.mubr.f32.vlgmr.msra.gmra.mrb[50].mxu1 %v5321_v37 }
 0xb60   :  { %v5618_v52 = vpop.f32.mrb[50].mxu1 }
 0xb61   :  { %v5619_v9 = vpop.f32.mrb[51].mxu1 }
 0xb62   :  { %v5620_v55 = vadd.f32 %v5619_v9, %v5618_v52 }
 0xb64   :  { %v5429_v56 = vadd.f32 %v5620_v55, %v5533_v22 }
 0xb66   :  { %5432 = vst [vmem:[%s9824_s12] sm:$0x3] %v5429_v56 }
 0xb67   :  { %5437 = vsyncpa [#allocation3], 1 }
 0xb68   :  { %5438 = vsyncpa [#allocation5], 1 }

</bundles_post_ra>
